<compile_context>
chip_gen: v6e
topology: v6e:2x2x1
jax: 0.10.0
libtpu: 0.0.40
codegen_flags: <defaults>
</compile_context>

<pallas_src>
import functools
import math

import jax
import jax.numpy as jnp
from jax.experimental import pallas as pl
from jax.experimental.pallas import tpu as pltpu

LN_EPS = 1e-5
_INV_SQRT2 = 1.0 / math.sqrt(2.0)
_GELU_TANH_C = math.sqrt(2.0 / math.pi)


def _round_up(x, m):
    return (x + m - 1) // m * m


def _physical_vmem_bytes():
    """Best-effort physical VMEM query; falls back to the smallest (v7x per-TC) size."""
    try:
        info = pltpu.get_tpu_info()
        cap = getattr(info, "vmem_capacity_bytes", None)
        if cap:
            return int(cap)
    except Exception:
        pass
    return 64 << 20


def _layernorm(x, gamma, beta):
    # Two-pass centered form kept deliberately (better cancellation than E[x^2]-mu^2);
    # the lane reductions are not the binding slot once GELU is off the VALU.
    mu = jnp.mean(x, axis=-1, keepdims=True)
    xc = x - mu
    var = jnp.mean(xc * xc, axis=-1, keepdims=True)
    return xc * jax.lax.rsqrt(var + LN_EPS) * gamma + beta


def _gelu_exact(h):
    # torch.nn.GELU() default (erf) form -- VALU-heavy, kept for exact validation.
    return 0.5 * h * (1.0 + jax.lax.erf(h * _INV_SQRT2))


def _gelu_tanh(h):
    # tanh approximation: the transcendental goes to the EUP slot, leaving only a
    # handful of muls/adds on the VALU over the (tm, Hm) intermediate.
    return 0.5 * h * (1.0 + jnp.tanh(_GELU_TANH_C * (h + 0.044715 * h * h * h)))


def vit_block_kernel(x_ref,
                     g1_ref, be1_ref, wA_ref, bA_ref,
                     g2_ref, be2_ref, w1_ref, b1_ref, w2_ref, b2_ref,
                     o_ref, *, approx_gelu):
    # Hoist every parameter read once (JAX does not CSE broadcast_in_dim).
    g1, be1, bA = g1_ref[...], be1_ref[...], bA_ref[...]
    g2, be2 = g2_ref[...], be2_ref[...]
    b1, b2 = b1_ref[...], b2_ref[...]
    wA, w1, w2 = wA_ref[...], w1_ref[...], w2_ref[...]

    x = x_ref[...].astype(jnp.float32)

    # --- norm1 + attention_output linear + residual ---
    n1 = _layernorm(x, g1, be1)
    attn = jnp.dot(n1.astype(wA.dtype), wA,
                   preferred_element_type=jnp.float32) + bA
    x = x + attn

    # --- norm2 + MLP (fc1 -> GELU -> fc2) + residual ---
    n2 = _layernorm(x, g2, be2)
    h = jnp.dot(n2.astype(w1.dtype), w1,
                preferred_element_type=jnp.float32) + b1
    h = _gelu_tanh(h) if approx_gelu else _gelu_exact(h)
    mlp = jnp.dot(h.astype(w2.dtype), w2,
                  preferred_element_type=jnp.float32) + b2

    o_ref[...] = (x + mlp).astype(o_ref.dtype)


def _build_call(Mp, H, Hm, tm, out_dtype, vmem_limit, approx_gelu):
    def row_spec(shape):
        return pl.BlockSpec(shape, lambda i: (i, 0))

    def resident_spec(shape):
        # Constant index_map => block stays resident across the whole grid
        # (the DMA is only issued once; no re-fetch on later steps).
        return pl.BlockSpec(shape, lambda i: (0, 0))

    kernel = functools.partial(vit_block_kernel, approx_gelu=approx_gelu)

    return pl.pallas_call(
        kernel,
        out_shape=jax.ShapeDtypeStruct((Mp, H), out_dtype),
        grid_spec=pltpu.PrefetchScalarGridSpec(
            num_scalar_prefetch=0,
            grid=(Mp // tm,),
            in_specs=[
                row_spec((tm, H)),          # x tile
                resident_spec((1, H)),      # norm1 gamma
                resident_spec((1, H)),      # norm1 beta
                resident_spec((H, H)),      # attention_output weight (in, out)
                resident_spec((1, H)),      # attention_output bias
                resident_spec((1, H)),      # norm2 gamma
                resident_spec((1, H)),      # norm2 beta
                resident_spec((H, Hm)),     # mlp_fc1 weight (in, out)
                resident_spec((1, Hm)),     # mlp_fc1 bias
                resident_spec((Hm, H)),     # mlp_fc2 weight (in, out)
                resident_spec((1, H)),      # mlp_fc2 bias
            ],
            out_specs=row_spec((tm, H)),
        ),
        compiler_params=pltpu.CompilerParams(
            dimension_semantics=("parallel",),
            vmem_limit_bytes=vmem_limit),
    )


def prepare_params(params, weights_dtype=jnp.bfloat16):
    """Cast the matmul weights once (keep bf16 master copies across calls)."""
    out = dict(params)
    for k in ("wA", "w1", "w2"):
        out[k] = params[k].astype(weights_dtype)
    return out


def simple_vit_block(x, params, *, tm=512, weights_dtype=jnp.bfloat16,
                     approx_gelu=True):
    """x: (B, N, H) float32. params: dict of weights (see init_params).

    approx_gelu=True uses the tanh GELU approximation (EUP-friendly, default
    performance path); approx_gelu=False matches torch.nn.GELU()'s exact erf.
    """
    B, N, H = x.shape
    Hm = params["w1"].shape[1]
    M = B * N

    # Row tile: as large as requested, but (a) 8-aligned, (b) no larger than
    # needed for >=2 grid steps when M allows, so v7x's second TensorCore gets
    # work via megacore sharding of the "parallel" axis.  v5e/v6e are single-TC
    # so the only cost there is one extra (cheap) pipeline step.
    tm_cap = _round_up(M, 8)
    if M > 8:
        tm_cap = max(8, _round_up(pl.cdiv(M, 2), 8))
    tm_eff = _round_up(max(8, min(tm, tm_cap)), 8)
    Mp = _round_up(M, tm_eff)

    x2 = x.reshape(M, H)
    if Mp != M:
        x2 = jnp.pad(x2, ((0, Mp - M), (0, 0)))   # padded rows are discarded below

    # Matmul weights for the MXU (bf16 by default); skip the cast if the caller
    # already prepared bf16 master copies (prepare_params).
    def _w(name):
        w = params[name]
        return w if w.dtype == weights_dtype else w.astype(weights_dtype)
    wA, w1, w2 = _w("wA"), _w("w1"), _w("w2")

    # Generation-aware VMEM budget: resident (double-buffered) weights, x/out
    # tiles, and the f32 intermediates; clamp to ~75% of physical VMEM so the
    # same code is safe on v5e/v6e (128 MiB) and v7x (64 MiB per TC).
    wb = jnp.dtype(weights_dtype).itemsize
    est = 2 * (H * H + 2 * H * Hm) * wb            # double-buffered matmul weights
    est += 4 * (6 * H + Hm) * 4                    # LN params + biases
    est += 2 * 2 * tm_eff * H * x.dtype.itemsize   # double-buffered x / out tiles
    est += 2 * tm_eff * Hm * 4                     # (tm, Hm) f32 intermediates
    est += 8 * tm_eff * H * 4                      # (tm, H) f32 intermediates headroom
    vmem_limit = max(int(est * 5 // 4), 32 << 20)
    vmem_limit = int(min(vmem_limit, _physical_vmem_bytes() * 3 // 4))

    # TODO(synk): for much larger models (H >= 768, Hm = 4H) the MLP weights should
    # be streamed in Hm-chunks instead of kept fully resident (needed on v7x VMEM).
    out = _build_call(Mp, H, Hm, tm_eff, x.dtype, vmem_limit, approx_gelu)(
        x2, params["g1"], params["be1"], wA, params["bA"],
        params["g2"], params["be2"], w1, params["b1"], w2, params["b2"])

    return out[:M].reshape(B, N, H)


def init_params(key, hidden_size, mlp_hidden_size):
    ks = jax.random.split(key, 8)
    s = 0.02
    f32 = jnp.float32
    return {
        # LayerNorm params (stored as (1, H) for clean lane broadcasting in-kernel)
        "g1": 1.0 + s * jax.random.normal(ks[0], (1, hidden_size), f32),
        "be1": s * jax.random.normal(ks[1], (1, hidden_size), f32),
        "g2": 1.0 + s * jax.random.normal(ks[2], (1, hidden_size), f32),
        "be2": s * jax.random.normal(ks[3], (1, hidden_size), f32),
        # Linear layers stored pre-transposed as (in, out); y = x @ W + b
        "wA": s * jax.random.normal(ks[4], (hidden_size, hidden_size), f32),
        "bA": jnp.zeros((1, hidden_size), f32),
        "w1": s * jax.random.normal(ks[5], (hidden_size, mlp_hidden_size), f32),
        "b1": s * jax.random.normal(ks[6], (1, mlp_hidden_size), f32),
        "w2": s * jax.random.normal(ks[7], (mlp_hidden_size, hidden_size), f32),
        "b2": jnp.zeros((1, hidden_size), f32),
    }


def reference_forward(x, p):
    """Pure-JAX reference matching the PyTorch forward semantics (f32, exact erf GELU)."""
    def ln(v, g, b):
        mu = jnp.mean(v, axis=-1, keepdims=True)
        var = jnp.mean((v - mu) ** 2, axis=-1, keepdims=True)
        return (v - mu) / jnp.sqrt(var + LN_EPS) * g[0] + b[0]

    n1 = ln(x, p["g1"], p["be1"])
    x = x + (n1 @ p["wA"] + p["bA"][0])
    n2 = ln(x, p["g2"], p["be2"])
    h = n2 @ p["w1"] + p["b1"][0]
    h = 0.5 * h * (1.0 + jax.lax.erf(h * _INV_SQRT2))
    return x + (h @ p["w2"] + p["b2"][0])


if __name__ == "__main__":
    # Small shapes consistent with the module defaults: hidden=384 (multiple of 128),
    # mlp_ratio=4 -> mlp_hidden=1536, batch=2, seq=8.
    B, N, H = 2, 8, 384
    MLP_H = 4 * H

    key = jax.random.PRNGKey(0)
    kx, kp = jax.random.split(key)
    x = jax.random.normal(kx, (B, N, H), jnp.float32)
    params = init_params(kp, H, MLP_H)

    ref = reference_forward(x, params)

    # Full-precision path with exact (erf) GELU: validates the fused kernel tightly.
    out_f32 = jax.block_until_ready(
        simple_vit_block(x, params, weights_dtype=jnp.float32, approx_gelu=False))
    assert out_f32.shape == (B, N, H)
    assert jnp.allclose(out_f32, ref, atol=1e-3, rtol=1e-3), "f32 mismatch vs reference"

    # Default performance path: bf16 master weights on the MXU, f32 accumulation,
    # tanh-approximate GELU.  Tolerance covers bf16 activation quantization plus
    # the (smaller) tanh-vs-erf GELU divergence.
    params_bf16 = prepare_params(params)
    out = jax.block_until_ready(simple_vit_block(x, params_bf16))
    assert out.shape == (B, N, H)
    assert jnp.allclose(out, ref, atol=3e-2, rtol=2e-2), "bf16 mismatch vs reference"

    print("KERNEL_OK")
</pallas_src>

<mosaic_0001>
module attributes {stable_mosaic.version = 11 : i64} {
  func.func @vit_block_kernel(%arg0: i32, %arg1: memref<8x384xf32, #tpu.memory_space<vmem>>, %arg2: memref<1x384xf32, #tpu.memory_space<vmem>>, %arg3: memref<1x384xf32, #tpu.memory_space<vmem>>, %arg4: memref<384x384xf32, #tpu.memory_space<vmem>>, %arg5: memref<1x384xf32, #tpu.memory_space<vmem>>, %arg6: memref<1x384xf32, #tpu.memory_space<vmem>>, %arg7: memref<1x384xf32, #tpu.memory_space<vmem>>, %arg8: memref<384x1536xf32, #tpu.memory_space<vmem>>, %arg9: memref<1x1536xf32, #tpu.memory_space<vmem>>, %arg10: memref<1536x384xf32, #tpu.memory_space<vmem>>, %arg11: memref<1x384xf32, #tpu.memory_space<vmem>>, %arg12: memref<8x384xf32, #tpu.memory_space<vmem>>) attributes {dimension_semantics = [#tpu.dimension_semantics<parallel>], iteration_bounds = array<i64: 2>, scalar_prefetch = 0 : i64, scratch_operands = 0 : i64, tpu.core_type = #tpu.core_type<tc>, window_params = [{transform_indices = @transform_0, window_bounds = array<i64: 8, 384>}, {pipeline_mode = #tpu.pipeline_mode<synchronous>, transform_indices = @transform_1, window_bounds = array<i64: 1, 384>}, {pipeline_mode = #tpu.pipeline_mode<synchronous>, transform_indices = @transform_2, window_bounds = array<i64: 1, 384>}, {pipeline_mode = #tpu.pipeline_mode<synchronous>, transform_indices = @transform_3, window_bounds = array<i64: 384, 384>}, {pipeline_mode = #tpu.pipeline_mode<synchronous>, transform_indices = @transform_4, window_bounds = array<i64: 1, 384>}, {pipeline_mode = #tpu.pipeline_mode<synchronous>, transform_indices = @transform_5, window_bounds = array<i64: 1, 384>}, {pipeline_mode = #tpu.pipeline_mode<synchronous>, transform_indices = @transform_6, window_bounds = array<i64: 1, 384>}, {pipeline_mode = #tpu.pipeline_mode<synchronous>, transform_indices = @transform_7, window_bounds = array<i64: 384, 1536>}, {pipeline_mode = #tpu.pipeline_mode<synchronous>, transform_indices = @transform_8, window_bounds = array<i64: 1, 1536>}, {pipeline_mode = #tpu.pipeline_mode<synchronous>, transform_indices = @transform_9, window_bounds = array<i64: 1536, 384>}, {pipeline_mode = #tpu.pipeline_mode<synchronous>, transform_indices = @transform_10, window_bounds = array<i64: 1, 384>}, {transform_indices = @transform_11, window_bounds = array<i64: 8, 384>}]} {
    %c0 = arith.constant 0 : index
    %c0_0 = arith.constant 0 : index
    %0 = vector.load %arg2[%c0, %c0_0] : memref<1x384xf32, #tpu.memory_space<vmem>>, vector<1x384xf32>
    %c0_1 = arith.constant 0 : index
    %c0_2 = arith.constant 0 : index
    %1 = vector.load %arg3[%c0_1, %c0_2] : memref<1x384xf32, #tpu.memory_space<vmem>>, vector<1x384xf32>
    %c0_3 = arith.constant 0 : index
    %c0_4 = arith.constant 0 : index
    %2 = vector.load %arg5[%c0_3, %c0_4] : memref<1x384xf32, #tpu.memory_space<vmem>>, vector<1x384xf32>
    %c0_5 = arith.constant 0 : index
    %c0_6 = arith.constant 0 : index
    %3 = vector.load %arg6[%c0_5, %c0_6] : memref<1x384xf32, #tpu.memory_space<vmem>>, vector<1x384xf32>
    %c0_7 = arith.constant 0 : index
    %c0_8 = arith.constant 0 : index
    %4 = vector.load %arg7[%c0_7, %c0_8] : memref<1x384xf32, #tpu.memory_space<vmem>>, vector<1x384xf32>
    %c0_9 = arith.constant 0 : index
    %c0_10 = arith.constant 0 : index
    %5 = vector.load %arg9[%c0_9, %c0_10] : memref<1x1536xf32, #tpu.memory_space<vmem>>, vector<1x1536xf32>
    %c0_11 = arith.constant 0 : index
    %c0_12 = arith.constant 0 : index
    %6 = vector.load %arg11[%c0_11, %c0_12] : memref<1x384xf32, #tpu.memory_space<vmem>>, vector<1x384xf32>
    %c0_13 = arith.constant 0 : index
    %c0_14 = arith.constant 0 : index
    %7 = vector.load %arg4[%c0_13, %c0_14] : memref<384x384xf32, #tpu.memory_space<vmem>>, vector<384x384xf32>
    %c0_15 = arith.constant 0 : index
    %c0_16 = arith.constant 0 : index
    %8 = vector.load %arg8[%c0_15, %c0_16] : memref<384x1536xf32, #tpu.memory_space<vmem>>, vector<384x1536xf32>
    %c0_17 = arith.constant 0 : index
    %c0_18 = arith.constant 0 : index
    %9 = vector.load %arg10[%c0_17, %c0_18] : memref<1536x384xf32, #tpu.memory_space<vmem>>, vector<1536x384xf32>
    %c0_19 = arith.constant 0 : index
    %c0_20 = arith.constant 0 : index
    %10 = vector.load %arg1[%c0_19, %c0_20] : memref<8x384xf32, #tpu.memory_space<vmem>>, vector<8x384xf32>
    %cst = arith.constant dense<0.000000e+00> : vector<8xf32>
    %11 = vector.multi_reduction <add>, %10, %cst [1] : vector<8x384xf32> to vector<8xf32>
    %12 = vector.shape_cast %11 : vector<8xf32> to vector<8x1xf32>
    %cst_21 = arith.constant 3.840000e+02 : f32
    %13 = vector.broadcast %cst_21 : f32 to vector<8x1xf32>
    %14 = arith.divf %12, %13 : vector<8x1xf32>
    %15 = vector.broadcast %14 : vector<8x1xf32> to vector<8x384xf32>
    %16 = arith.subf %10, %15 : vector<8x384xf32>
    %17 = arith.mulf %16, %16 : vector<8x384xf32>
    %cst_22 = arith.constant dense<0.000000e+00> : vector<8xf32>
    %18 = vector.multi_reduction <add>, %17, %cst_22 [1] : vector<8x384xf32> to vector<8xf32>
    %19 = vector.shape_cast %18 : vector<8xf32> to vector<8x1xf32>
    %cst_23 = arith.constant 3.840000e+02 : f32
    %20 = vector.broadcast %cst_23 : f32 to vector<8x1xf32>
    %21 = arith.divf %19, %20 : vector<8x1xf32>
    %cst_24 = arith.constant 9.99999974E-6 : f32
    %22 = vector.broadcast %cst_24 : f32 to vector<8x1xf32>
    %23 = arith.addf %21, %22 : vector<8x1xf32>
    %24 = math.rsqrt %23 : vector<8x1xf32>
    %25 = vector.broadcast %24 : vector<8x1xf32> to vector<8x384xf32>
    %26 = arith.mulf %16, %25 : vector<8x384xf32>
    %27 = vector.broadcast %0 : vector<1x384xf32> to vector<8x384xf32>
    %28 = arith.mulf %26, %27 : vector<8x384xf32>
    %29 = vector.broadcast %1 : vector<1x384xf32> to vector<8x384xf32>
    %30 = arith.addf %28, %29 : vector<8x384xf32>
    %cst_25 = arith.constant dense<0.000000e+00> : vector<8x384xf32>
    %31 = tpu.matmul %30, %7, %cst_25 {dimension_numbers = #tpu.dot_dimension_numbers<[1], [0], [0], [1], [0, 0, 1, 1], [], []>} : vector<8x384xf32>, vector<384x384xf32>, vector<8x384xf32> -> vector<8x384xf32>
    %32 = vector.broadcast %2 : vector<1x384xf32> to vector<8x384xf32>
    %33 = arith.addf %31, %32 : vector<8x384xf32>
    %34 = arith.addf %10, %33 : vector<8x384xf32>
    %cst_26 = arith.constant dense<0.000000e+00> : vector<8xf32>
    %35 = vector.multi_reduction <add>, %34, %cst_26 [1] : vector<8x384xf32> to vector<8xf32>
    %36 = vector.shape_cast %35 : vector<8xf32> to vector<8x1xf32>
    %cst_27 = arith.constant 3.840000e+02 : f32
    %37 = vector.broadcast %cst_27 : f32 to vector<8x1xf32>
    %38 = arith.divf %36, %37 : vector<8x1xf32>
    %39 = vector.broadcast %38 : vector<8x1xf32> to vector<8x384xf32>
    %40 = arith.subf %34, %39 : vector<8x384xf32>
    %41 = arith.mulf %40, %40 : vector<8x384xf32>
    %cst_28 = arith.constant dense<0.000000e+00> : vector<8xf32>
    %42 = vector.multi_reduction <add>, %41, %cst_28 [1] : vector<8x384xf32> to vector<8xf32>
    %43 = vector.shape_cast %42 : vector<8xf32> to vector<8x1xf32>
    %cst_29 = arith.constant 3.840000e+02 : f32
    %44 = vector.broadcast %cst_29 : f32 to vector<8x1xf32>
    %45 = arith.divf %43, %44 : vector<8x1xf32>
    %cst_30 = arith.constant 9.99999974E-6 : f32
    %46 = vector.broadcast %cst_30 : f32 to vector<8x1xf32>
    %47 = arith.addf %45, %46 : vector<8x1xf32>
    %48 = math.rsqrt %47 : vector<8x1xf32>
    %49 = vector.broadcast %48 : vector<8x1xf32> to vector<8x384xf32>
    %50 = arith.mulf %40, %49 : vector<8x384xf32>
    %51 = vector.broadcast %3 : vector<1x384xf32> to vector<8x384xf32>
    %52 = arith.mulf %50, %51 : vector<8x384xf32>
    %53 = vector.broadcast %4 : vector<1x384xf32> to vector<8x384xf32>
    %54 = arith.addf %52, %53 : vector<8x384xf32>
    %cst_31 = arith.constant dense<0.000000e+00> : vector<8x1536xf32>
    %55 = tpu.matmul %54, %8, %cst_31 {dimension_numbers = #tpu.dot_dimension_numbers<[1], [0], [0], [1], [0, 0, 1, 1], [], []>} : vector<8x384xf32>, vector<384x1536xf32>, vector<8x1536xf32> -> vector<8x1536xf32>
    %56 = vector.broadcast %5 : vector<1x1536xf32> to vector<8x1536xf32>
    %57 = arith.addf %55, %56 : vector<8x1536xf32>
    %cst_32 = arith.constant 5.000000e-01 : f32
    %58 = vector.broadcast %cst_32 : f32 to vector<8x1536xf32>
    %59 = arith.mulf %58, %57 : vector<8x1536xf32>
    %cst_33 = arith.constant 0.707106769 : f32
    %60 = vector.broadcast %cst_33 : f32 to vector<8x1536xf32>
    %61 = arith.mulf %57, %60 : vector<8x1536xf32>
    %62 = math.erf %61 : vector<8x1536xf32>
    %cst_34 = arith.constant 1.000000e+00 : f32
    %63 = vector.broadcast %cst_34 : f32 to vector<8x1536xf32>
    %64 = arith.addf %63, %62 : vector<8x1536xf32>
    %65 = arith.mulf %59, %64 : vector<8x1536xf32>
    %cst_35 = arith.constant dense<0.000000e+00> : vector<8x384xf32>
    %66 = tpu.matmul %65, %9, %cst_35 {dimension_numbers = #tpu.dot_dimension_numbers<[1], [0], [0], [1], [0, 0, 1, 1], [], []>} : vector<8x1536xf32>, vector<1536x384xf32>, vector<8x384xf32> -> vector<8x384xf32>
    %67 = vector.broadcast %6 : vector<1x384xf32> to vector<8x384xf32>
    %68 = arith.addf %66, %67 : vector<8x384xf32>
    %69 = arith.addf %34, %68 : vector<8x384xf32>
    %c0_36 = arith.constant 0 : index
    %c0_37 = arith.constant 0 : index
    %70 = vector.load %arg12[%c0_36, %c0_37] : memref<8x384xf32, #tpu.memory_space<vmem>>, vector<8x384xf32>
    tpu.vector_store %arg12[%c0_36, %c0_37], %69 {strides = array<i32>} : memref<8x384xf32, #tpu.memory_space<vmem>>, vector<8x384xf32>,
    return
  }
  func.func @transform_0(%arg0: i32) -> (i32, i32) {
    %c0_i32 = arith.constant 0 : i32
    %c0_i32_0 = arith.constant 0 : i32
    return %arg0, %c0_i32 : i32, i32
  }
  func.func @transform_1(%arg0: i32) -> (i32, i32) {
    %c0_i32 = arith.constant 0 : i32
    %c0_i32_0 = arith.constant 0 : i32
    %c0_i32_1 = arith.constant 0 : i32
    return %c0_i32, %c0_i32_0 : i32, i32
  }
  func.func @transform_2(%arg0: i32) -> (i32, i32) {
    %c0_i32 = arith.constant 0 : i32
    %c0_i32_0 = arith.constant 0 : i32
    %c0_i32_1 = arith.constant 0 : i32
    return %c0_i32, %c0_i32_0 : i32, i32
  }
  func.func @transform_3(%arg0: i32) -> (i32, i32) {
    %c0_i32 = arith.constant 0 : i32
    %c0_i32_0 = arith.constant 0 : i32
    %c0_i32_1 = arith.constant 0 : i32
    return %c0_i32, %c0_i32_0 : i32, i32
  }
  func.func @transform_4(%arg0: i32) -> (i32, i32) {
    %c0_i32 = arith.constant 0 : i32
    %c0_i32_0 = arith.constant 0 : i32
    %c0_i32_1 = arith.constant 0 : i32
    return %c0_i32, %c0_i32_0 : i32, i32
  }
  func.func @transform_5(%arg0: i32) -> (i32, i32) {
    %c0_i32 = arith.constant 0 : i32
    %c0_i32_0 = arith.constant 0 : i32
    %c0_i32_1 = arith.constant 0 : i32
    return %c0_i32, %c0_i32_0 : i32, i32
  }
  func.func @transform_6(%arg0: i32) -> (i32, i32) {
    %c0_i32 = arith.constant 0 : i32
    %c0_i32_0 = arith.constant 0 : i32
    %c0_i32_1 = arith.constant 0 : i32
    return %c0_i32, %c0_i32_0 : i32, i32
  }
  func.func @transform_7(%arg0: i32) -> (i32, i32) {
    %c0_i32 = arith.constant 0 : i32
    %c0_i32_0 = arith.constant 0 : i32
    %c0_i32_1 = arith.constant 0 : i32
    return %c0_i32, %c0_i32_0 : i32, i32
  }
  func.func @transform_8(%arg0: i32) -> (i32, i32) {
    %c0_i32 = arith.constant 0 : i32
    %c0_i32_0 = arith.constant 0 : i32
    %c0_i32_1 = arith.constant 0 : i32
    return %c0_i32, %c0_i32_0 : i32, i32
  }
  func.func @transform_9(%arg0: i32) -> (i32, i32) {
    %c0_i32 = arith.constant 0 : i32
    %c0_i32_0 = arith.constant 0 : i32
    %c0_i32_1 = arith.constant 0 : i32
    return %c0_i32, %c0_i32_0 : i32, i32
  }
  func.func @transform_10(%arg0: i32) -> (i32, i32) {
    %c0_i32 = arith.constant 0 : i32
    %c0_i32_0 = arith.constant 0 : i32
    %c0_i32_1 = arith.constant 0 : i32
    return %c0_i32, %c0_i32_0 : i32, i32
  }
  func.func @transform_11(%arg0: i32) -> (i32, i32) {
    %c0_i32 = arith.constant 0 : i32
    %c0_i32_0 = arith.constant 0 : i32
    return %arg0, %c0_i32 : i32, i32
  }
}

</mosaic_0001>

<bundles_post_ra>
// kernel: tpu_custom_call.1
= control target key start
LH: loop header
LB: loop body
LE: loop exit
PB: predicated region body
PF: predicated region fallthrough
CT: control target
= control target key end

     0   :  { %s5796_s0 = inlined_call_operand.hbm [shape: f32[16,384], index: 0, kind: input, shape index: {}]   ;;  %s5797_s1 = inlined_call_operand.hbm [shape: f32[1,384], index: 1, kind: input, shape index: {}]   ;;  %s5798_s2 = inlined_call_operand.hbm [shape: f32[1,384], index: 2, kind: input, shape index: {}]   ;;  %s5799_s3 = inlined_call_operand.hbm [shape: f32[384,384], index: 3, kind: input, shape index: {}]   ;;  %s5800_s4 = inlined_call_operand.hbm [shape: f32[1,384], index: 4, kind: input, shape index: {}]   ;;  %s5801_s5 = inlined_call_operand.hbm [shape: f32[1,384], index: 5, kind: input, shape index: {}]   ;;  %s5802_s6 = inlined_call_operand.hbm [shape: f32[1,384], index: 6, kind: input, shape index: {}]   ;;  %s5803_s7 = inlined_call_operand.hbm [shape: f32[384,1536], index: 7, kind: input, shape index: {}]   ;;  %s5804_s8 = inlined_call_operand.hbm [shape: f32[1,1536], index: 8, kind: input, shape index: {}]   ;;  %s5805_s9 = inlined_call_operand.hbm [shape: f32[1536,384], index: 9, kind: input, shape index: {}]   ;;  %s5806_s10 = inlined_call_operand.hbm [shape: f32[1,384], index: 10, kind: input, shape index: {}]   ;;  %s5807_s11 = inlined_call_operand.hbm [shape: f32[16,384], index: 11, kind: output, shape index: {}]  }
   0x1   :  { %5814 = sst [smem:[#allocation28_spill]] %s5797_s1 }
   0x2   :  { %5815 = sst [smem:[#allocation29_spill]] %s5798_s2 }
   0x3   :  { %5816 = sst [smem:[#allocation30_spill]] %s5799_s3 }
   0x4   :  { %5817 = sst [smem:[#allocation31_spill]] %s5800_s4 }
   0x5   :  { %5818 = sst [smem:[#allocation32_spill]] %s5801_s5 }
   0x6   :  { %5819 = sst [smem:[#allocation33_spill]] %s5802_s6 }
   0x7   :  { %16 = vsyncpa [#allocation3], 0 }
   0x8   :  { %18 = vsyncpa [#allocation3 + $0x1], 0 }
   0x9   :  { %19 = vsyncpa [#allocation6], 0 }
   0xa   :  { %20 = vsyncpa [#allocation9], 0 }
   0xb   :  { %21 = vsyncpa [#allocation12], 0 }
   0xc   :  { %22 = vsyncpa [#allocation15], 0 }
   0xd   :  { %23 = vsyncpa [#allocation18], 0 }
   0xe   :  { %24 = vsyncpa [#allocation4], 0 }
   0xf   :  { %26 = vsyncpa [#allocation4 + $0x1], 0  ;;  %s5246_s17 = smov 0   ;;  %s5248_s18 = smov 0  }
  0x10   :  { %s5250_s19 = smov 0   ;;  %s5252_s20 = smov 0  }
  0x11 LB: > { %s5168_s21 = smov [#allocation5]   ;;  %s5267_s23 = sadd.s32 4294967295, %s5166_s20   ;;  %s5166_s20 = sphi %s5252_s20, %s5854_s20   ;;  %s5162_s19 = sphi %s5250_s19, %s5853_s19   ;;  %s5158_s18 = sphi %s5248_s18, %s5852_s18   ;;  %s5154_s17 = sphi %s5246_s17, %s5851_s17  }
  0x12   : > { %s312_s22 = sshll.u32 %s5168_s21, 4  ;;  %p4284_p0 = scmp.ge.s32.totalorder %s5166_s20, 1  ;;  %s313_s22 = int_to_ptr.vmem [resolvable:$true] %s312_s22 }
  0x13   : > { %p5810_p1 = scmp.eq.s32.totalorder %s5267_s23, 0  ;;  %p299_p2 = scmp.lt.s32.totalorder %s5166_s20, 3 }
  0x14   : > { %s5169_s25 = smov [#allocation8]   ;;  %s5170_s28 = smov [#allocation11]  }
  0x15   : > { %p5272_p3 = pnand %p4284_p0, %p299_p2  ;;  %s333_s26 = sshll.u32 %s5169_s25, 4  ;;  %s5279_s26 = int_to_ptr.vmem [resolvable:$true] %s333_s26 }
  0x16   : > { %s358_s29 = sshll.u32 %s5170_s28, 4  ;;  %s4805_s12 = scalar_lea.vmem %s313_s22, 48  ;;  %s5287_s29 = int_to_ptr.vmem [resolvable:$true] %s358_s29 }
  0x17   : > { %s5820_s24 = scalar_select %p5272_p3, 1, 0 }
  0x18   : > { %p4656_p5 = pneg %p5272_p3  ;;  %p4806_p8 = scmp.ne.s32.totalorder %s313_s22, %s4805_s12 }
  0x19   : > { %s4812_s13 = scalar_lea.vmem %s313_s22, 64  ;;  %p4813_p11 = scmp.lt.s32.totalorder %s313_s22, %s313_s22 }
  0x1a   : > { %p5283_p6 = pnand %p4656_p5, %p5810_p1  ;;  %p4814_p12 = scmp.lt.s32.totalorder %s4812_s13, %s4805_s12 }
  0x1c   : > { %p5291_p7 = pneg %p5283_p6  ;;  %p4815_p13 = por %p4814_p12, %p4813_p11 }
  0x1e   : > { %p4808_p9 = pnand %p4806_p8, %p5291_p7 }
  0x20   : > { %p4809_p10 = pneg %p4808_p9 }
  0x22   : > { %p4816_p0 = pnand %p4815_p13, %p4809_p10 }
  0x24   : > { %4819 = shalt.err (!%p4816_p0)
}
  0x25   : > { %s5823_s1 = sld [smem:[#allocation28_spill]]  ;;  %s4831_s16 = scalar_lea.vmem %s5279_s26, 18432 }
  0x26   : > { %p4832_p2 = scmp.ne.s32.totalorder %s5279_s26, %s4831_s16  ;;  %p4839_p9 = scmp.lt.s32.totalorder %s5279_s26, %s5279_s26 }
  0x27   : > { %p4840_p11 = scmp.lt.s32.totalorder %s4831_s16, %s4831_s16 }
  0x28   : > { %p4834_p5 = pnand %p4832_p2, %p5291_p7 }
  0x29   : > { %p4841_p10 = por %p4840_p11, %p4839_p9 }
  0x2a   : > { %p4835_p8 = pneg %p4834_p5 }
  0x2b   : > { %4659 = dma.hbm_to_vmem [thread:$0]  (!%p5283_p6), %s5823_s1, 48, %s313_s22, [#allocation6]  }
  0x2c   : > { %p4842_p12 = pnand %p4841_p10, %p4835_p8 }
  0x2e   : > { %4845 = shalt.err (!%p4842_p12)
}
  0x2f   : > { %s5808_s21 = smov 384   ;;  %s5809_s22 = smov 24  }
  0x30   : > { %s5824_s3 = sld [smem:[#allocation30_spill]]  ;;  %s4857_s12 = scalar_lea.vmem %s5287_s29, 48 }
  0x31   : > { %p4858_p13 = scmp.ne.s32.totalorder %s5287_s29, %s4857_s12  ;;  %s4864_s13 = scalar_lea.vmem %s5287_s29, 64 }
  0x32   : > { %p4865_p5 = scmp.lt.s32.totalorder %s5287_s29, %s5287_s29  ;;  %p4866_p8 = scmp.lt.s32.totalorder %s4864_s13, %s4857_s12 }
  0x33   : > { %p4860_p0 = pnand %p4858_p13, %p5291_p7 }
  0x34   : > { %p4867_p9 = por %p4866_p8, %p4865_p5 }
  0x35   : > { %p4861_p2 = pneg %p4860_p0 }
  0x36   : > { %4665 = dma.hbm_to_vmem [thread:$0]  (!%p5283_p6), %s5824_s3, 18432, %s5279_s26, [#allocation9], %s5808_s21, %s5808_s21, %s5809_s22  }
  0x37   : > { %p4868_p11 = pnand %p4867_p9, %p4861_p2 }
  0x39   : > { %4871 = shalt.err (!%p4868_p11)
}
  0x3a   : > { %s5825_s5 = sld [smem:[#allocation32_spill]]  ;;  %s5173_s26 = smov [#allocation14]  }
  0x3b   : > { %s379_s16 = sshll.u32 %s5173_s26, 4  ;;  %s380_s16 = int_to_ptr.vmem [resolvable:$true] %s379_s16 }
  0x3c   : > { %s4883_s25 = scalar_lea.vmem %s380_s16, 73728  ;;  %p4891_p0 = scmp.lt.s32.totalorder %s380_s16, %s380_s16 }
  0x3d   : > { %p4884_p10 = scmp.ne.s32.totalorder %s380_s16, %s4883_s25  ;;  %p4892_p5 = scmp.lt.s32.totalorder %s4883_s25, %s4883_s25 }
  0x3f   : > { %p4886_p12 = pnand %p4884_p10, %p5291_p7  ;;  %p4893_p2 = por %p4892_p5, %p4891_p0 }
  0x40   : > { %4671 = dma.hbm_to_vmem [thread:$0]  (!%p5283_p6), %s5825_s5, 48, %s5287_s29, [#allocation12]  }
  0x41   : > { %p4887_p13 = pneg %p4886_p12 }
  0x43   : > { %p4894_p8 = pnand %p4893_p2, %p4887_p13 }
  0x45   : > { %4897 = shalt.err (!%p4894_p8)
}
  0x46   : > { %s5174_s28 = smov 1536   ;;  %s5175_s12 = smov 96  }
  0x47   : > { %4677 = dma.hbm_to_vmem [thread:$0]  (!%p5283_p6), %s5803_s7, 73728, %s380_s16, [#allocation15], %s5174_s28, %s5174_s28, %s5175_s12  }
  0x48   : > { %s5176_s14 = smov [#allocation17]   ;;  %s5177_s26 = smov [#allocation7]  }
  0x49   : > { %s403_s15 = sshll.u32 %s5176_s14, 4  ;;  %s323_s21 = sshll.u32 %s5177_s26, 4  ;;  %s404_s15 = int_to_ptr.vmem [resolvable:$true] %s403_s15  ;;  %s324_s21 = int_to_ptr.vmem [resolvable:$true] %s323_s21 }
  0x4a   : > { %s4909_s22 = scalar_lea.vmem %s404_s15, 73728  ;;  %p4917_p12 = scmp.lt.s32.totalorder %s404_s15, %s404_s15 }
  0x4b   : > { %p4910_p9 = scmp.ne.s32.totalorder %s404_s15, %s4909_s22  ;;  %p4918_p13 = scmp.lt.s32.totalorder %s4909_s22, %s4909_s22 }
  0x4d   : > { %p4912_p11 = pnand %p4910_p9, %p5291_p7  ;;  %p4919_p0 = por %p4918_p13, %p4917_p12 }
  0x4f   : > { %p4913_p10 = pneg %p4912_p11 }
  0x51   : > { %p4920_p5 = pnand %p4919_p0, %p4913_p10 }
  0x53   : > { %4923 = shalt.err (!%p4920_p5)
}
  0x54   : > { %s5826_s25 = smov 24   ;;  %s5827_s16 = smov 384  }
  0x55   : > { %4683 = dma.hbm_to_vmem [thread:$0]  (!%p5283_p6), %s5805_s9, 73728, %s404_s15, [#allocation18], %s5827_s16, %s5827_s16, %s5826_s25  }
  0x56   : > { %s4935_s13 = scalar_lea.vmem %s324_s21, 48  ;;  %s4942_s29 = scalar_lea.vmem %s324_s21, 64 }
  0x57   : > { %p4936_p2 = scmp.ne.s32.totalorder %s324_s21, %s4935_s13  ;;  %p4943_p11 = scmp.lt.s32.totalorder %s324_s21, %s324_s21 }
  0x58   : > { %p4944_p12 = scmp.lt.s32.totalorder %s4942_s29, %s4935_s13 }
  0x59   : > { %p4938_p8 = pnand %p4936_p2, %p5291_p7 }
  0x5a   : > { %p4945_p10 = por %p4944_p12, %p4943_p11 }
  0x5b   : > { %p4939_p9 = pneg %p4938_p8 }
  0x5d   : > { %p4946_p13 = pnand %p4945_p10, %p4939_p9 }
  0x5f   : > { %4949 = shalt.err (!%p4946_p13)
}
  0x60   : > { %s5828_s2 = sld [smem:[#allocation29_spill]]  ;;  %s5178_s26 = smov [#allocation10]  }
  0x61   : > { %s347_s15 = sshll.u32 %s5178_s26, 4  ;;  %s5179_s25 = smov [#allocation13]   ;;  %s348_s15 = int_to_ptr.vmem [resolvable:$true] %s347_s15 }
  0x62   : > { %s369_s16 = sshll.u32 %s5179_s25, 4  ;;  %s4961_s28 = scalar_lea.vmem %s348_s15, 48  ;;  %s370_s16 = int_to_ptr.vmem [resolvable:$true] %s369_s16 }
  0x63   : > { %p4962_p0 = scmp.ne.s32.totalorder %s348_s15, %s4961_s28  ;;  %s4968_s12 = scalar_lea.vmem %s348_s15, 64 }
  0x64   : > { %p4969_p8 = scmp.lt.s32.totalorder %s348_s15, %s348_s15  ;;  %p4970_p9 = scmp.lt.s32.totalorder %s4968_s12, %s4961_s28 }
  0x65   : > { %p4964_p5 = pnand %p4962_p0, %p5291_p7 }
  0x66   : > { %4662 = dma.hbm_to_vmem [thread:$0]  (!%p5283_p6), %s5828_s2, 48, %s324_s21, [#allocation6]  }
  0x67   : > { %p4965_p2 = pneg %p4964_p5  ;;  %p4971_p11 = por %p4970_p9, %p4969_p8 }
  0x69   : > { %p4972_p12 = pnand %p4971_p11, %p4965_p2 }
  0x6b   : > { %4975 = shalt.err (!%p4972_p12)
}
  0x6c   : > { %s5829_s4 = sld [smem:[#allocation31_spill]]  ;;  %s4987_s29 = scalar_lea.vmem %s370_s16, 48 }
  0x6d   : > { %p4988_p10 = scmp.ne.s32.totalorder %s370_s16, %s4987_s29  ;;  %s4994_s22 = scalar_lea.vmem %s370_s16, 64 }
  0x6e   : > { %p4995_p0 = scmp.lt.s32.totalorder %s370_s16, %s370_s16  ;;  %p4996_p5 = scmp.lt.s32.totalorder %s4994_s22, %s4987_s29 }
  0x6f   : > { %p4990_p13 = pnand %p4988_p10, %p5291_p7 }
  0x70   : > { %p4997_p1 = por %p4996_p5, %p4995_p0 }
  0x71   : > { %p4991_p4 = pneg %p4990_p13 }
  0x72   : > { %4668 = dma.hbm_to_vmem [thread:$0]  (!%p5283_p6), %s5829_s4, 48, %s348_s15, [#allocation9]  }
  0x73   : > { %p4998_p3 = pnand %p4997_p1, %p4991_p4 }
  0x75   : > { %5001 = shalt.err (!%p4998_p3)
}
  0x76   : > { %s5830_s6 = sld [smem:[#allocation33_spill]]  ;;  %s5180_s25 = smov [#allocation16]  }
  0x77   : > { %s393_s15 = sshll.u32 %s5180_s25, 4  ;;  %s5181_s28 = smov [#allocation19]   ;;  %s394_s15 = int_to_ptr.vmem [resolvable:$true] %s393_s15 }
  0x78   : > { %s417_s12 = sshll.u32 %s5181_s28, 4  ;;  %s5013_s21 = scalar_lea.vmem %s394_s15, 192  ;;  %s418_s12 = int_to_ptr.vmem [resolvable:$true] %s417_s12 }
  0x79   : > { %p5014_p2 = scmp.ne.s32.totalorder %s394_s15, %s5013_s21  ;;  %p5021_p1 = scmp.lt.s32.totalorder %s394_s15, %s394_s15 }
  0x7a   : > { %p5022_p3 = scmp.lt.s32.totalorder %s5013_s21, %s5013_s21 }
  0x7b   : > { %p5016_p8 = pnand %p5014_p2, %p5291_p7 }
  0x7c   : > { %4674 = dma.hbm_to_vmem [thread:$0]  (!%p5283_p6), %s5830_s6, 48, %s370_s16, [#allocation12]  }
  0x7d   : > { %p5017_p9 = pneg %p5016_p8  ;;  %p5023_p4 = por %p5022_p3, %p5021_p1 }
  0x7f   : > { %p5024_p11 = pnand %p5023_p4, %p5017_p9 }
  0x81   : > { %5027 = shalt.err (!%p5024_p11)
}
  0x82   : > { %4680 = dma.hbm_to_vmem [thread:$0]  (!%p5283_p6), %s5804_s8, 192, %s394_s15, [#allocation15]  }
  0x83   : > { %s5039_s29 = scalar_lea.vmem %s418_s12, 48  ;;  %s5046_s22 = scalar_lea.vmem %s418_s12, 64 }
  0x84   : > { %p5040_p12 = scmp.ne.s32.totalorder %s418_s12, %s5039_s29  ;;  %p5047_p0 = scmp.lt.s32.totalorder %s418_s12, %s418_s12 }
  0x85   : > { %p5048_p5 = scmp.lt.s32.totalorder %s5046_s22, %s5039_s29 }
  0x86   : > { %p5042_p10 = pnand %p5040_p12, %p5291_p7 }
  0x87   : > { %p5049_p2 = por %p5048_p5, %p5047_p0 }
  0x88   : > { %p5043_p13 = pneg %p5042_p10 }
  0x8a   : > { %p5050_p8 = pnand %p5049_p2, %p5043_p13 }
  0x8c   : > { %5053 = shalt.err (!%p5050_p8)
}
  0x8d   : > { %4686 = dma.hbm_to_vmem [thread:$0]  (!%p5283_p6), %s5806_s10, 48, %s418_s12, [#allocation18]  }
  0x8e   : > { %s4283_s30 = sadd.s32 4294967294, %s5166_s20   ;;  %s5384_s27 = sadd.s32 1, %s5166_s20  }
  0x8f   : > { %s36_s25 = ssub.s32 %s5166_s20, %s5384_s27  ;;  %s39_s15 = sadd.s32 1, %s5162_s19 }
  0x90   : > { %p37_p7 = scmp.eq.s32.totalorder %s36_s25, 0  ;;  %p46_p9 = scmp.ne.s32.totalorder %s5162_s19, %s5158_s18 }
  0x91   : > { %p47_p1 = scmp.eq.s32.totalorder %s5166_s20, 0  ;;  %p52_p3 = scmp.ne.s32.totalorder %s5158_s18, %s5154_s17 }
  0x92   : > { %s5395_s28 = scalar_select %p37_p7, %s5162_s19, %s39_s15  }
  0x93   : > { %p48_p4 = por %p47_p1, %p46_p9  ;;  %p5831_p11 = scmp.eq.s32.totalorder %s5267_s23, 0 }
  0x94   : > { %p286_p6 = scmp.eq.s32.totalorder %s5267_s23, 1  ;;  %p292_p10 = scmp.eq.s32.totalorder %s4283_s30, 1 }
  0x95   : > { %p5399_p12 = por %p5831_p11, %p52_p3  ;;  %p4705_p13 = scmp.lt.s32.totalorder %s5166_s20, 2 }
  0x96   : > { %s428_s12 = sand.u32 1, %s5162_s19   ;;  %p5406_p0 = por %p286_p6, %p46_p9 }
  0x97   : > { %s5832_s21 = scalar_select %p5399_p12, 1, 0 }
  0x98   : > { %s5833_s13 = scalar_select %p5406_p0, 1, 0 }
  0x99   : > { %p5410_p5 = por %p292_p10, %p52_p3  ;;  %s4608_s29 = smul.u32 24, %s428_s12 }
  0x9a   : > { %s4609_s22 = smul.u32 384, %s5166_s20  ;;  %p5415_p2 = pnand %p4705_p13, %p48_p4 }
  0x9b   : > { %s5834_s16 = scalar_select %p5410_p5, 1, 0 }
  0x9c   : > { %s5422_s30 = scalar_lea.hbm %s5796_s0, %s4609_s22  ;;  %s432_s15 = scalar_lea.vmem [#allocation2], %s4608_s29 }
  0x9d   : > { %s440_s1 = sshll.u32 %s432_s15, 4  ;;  %s429_s2 = scalar_lea.sflag [#allocation3], %s428_s12  ;;  %s441_s1 = int_to_ptr.vmem [resolvable:$true] %s440_s1 }
  0x9e   : > { %s5054_s3 = scalar_lea.hbm %s5422_s30, 384  ;;  %p5056_p7 = pneg %p5415_p2 }
  0x9f   : > { %p5055_p8 = scmp.ne.s32.totalorder %s5422_s30, %s5054_s3  ;;  %s5059_s26 = scalar_lea.hbm %s5796_s0, 768 }
  0xa0   : > { %p5060_p3 = scmp.lt.s32.totalorder %s5422_s30, %s5796_s0  ;;  %p5061_p4 = scmp.lt.s32.totalorder %s5059_s26, %s5054_s3 }
  0xa1   : > { %p5057_p9 = pnand %p5056_p7, %p5055_p8 }
  0xa2   : > { %p5062_p11 = por %p5061_p4, %p5060_p3 }
  0xa3   : > { %p5058_p1 = pneg %p5057_p9 }
  0xa5   : > { %p5063_p6 = pnand %p5062_p11, %p5058_p1 }
  0xa7   : > { %5066 = shalt.err (!%p5063_p6)
}
  0xa8   : > { %s5067_s29 = scalar_lea.vmem %s441_s1, 384  ;;  %s5182_s12 = smov [#allocation2]  }
  0xa9   : > { %p5068_p10 = scmp.ne.s32.totalorder %s441_s1, %s5067_s29  ;;  %s5072_s15 = sshll.u32 %s5182_s12, 4  ;;  %s5073_s15 = int_to_ptr.vmem [resolvable:$false] %s5072_s15 }
  0xaa   : > { %s5074_s6 = scalar_lea.vmem %s5073_s15, 768  ;;  %p5075_p8 = scmp.lt.s32.totalorder %s441_s1, %s5073_s15 }
  0xab   : > { %p5070_p13 = pnand %p5068_p10, %p5056_p7  ;;  %p5076_p9 = scmp.lt.s32.totalorder %s5074_s6, %s5067_s29 }
  0xad   : > { %p5071_p5 = pneg %p5070_p13  ;;  %p5077_p0 = por %p5076_p9, %p5075_p8 }
  0xaf   : > { %p5078_p12 = pnand %p5077_p0, %p5071_p5 }
  0xb1   : > { %5081 = shalt.err (!%p5078_p12)
}
  0xb2   : > { %4690 = dma.hbm_to_vmem [thread:$0]  (!%p5415_p2), %s5422_s30, 384, %s441_s1, %s429_s2  }
  0xb3   : > { %p5836_p1 = scmp.ne.s32.totalorder %s5820_s24, 0 }
  0xb4   : > { %s5441_s3 = sand.u32 (!%p5836_p1), 1, %s5158_s18   ;;  %p5837_p0 = scmp.ne.s32.totalorder (!%p5836_p1), %s5832_s21, 0 }
  0xb5   : > { %449 = sbr.rel (%p5836_p1) target bundleno = 1865 (0x749), region = 64  ;;  %s452_s5 = scalar_lea.sflag (!%p5836_p1), [#allocation3], %s5441_s3 }
  0xb6   : > { %s4610_s4 = smul.u32 (!%p5836_p1), 24, %s5441_s3 }
  0xb8   : > { %s455_s6 = scalar_lea.vmem (!%p5836_p1), [#allocation2], %s4610_s4 }
  0xba   : > { %5125 = dma.done.wait (%p5837_p0), %s452_s5, 384  }
  0xbb   : > { %5127 = vsyncadd (%p5837_p0), %s452_s5, 4294966912  ;;  %p5838_p12 = scmp.eq.s32.totalorder %s5267_s23, 0 }
  0xbd   : > { %5129 = dma.done.wait (%p5838_p12), [#allocation6], 96   ;;  %p5839_p5 = pmov %p5838_p12 }
  0xbf   : > { %5131 = vsyncadd (%p5839_p5), [#allocation6], 4294967200  ;;  %p5840_p2 = pmov %p5839_p5 }
  0xc1   : > { %5133 = dma.done.wait (%p5840_p2), [#allocation9], 18480   ;;  %p5841_p7 = pmov %p5840_p2 }
  0xc2   : > { %p5842_p3 = pmov %p5840_p2 }
  0xc3   : > { %5135 = vsyncadd (%p5841_p7), [#allocation9], 4294948816 }
  0xc4   : > { %5137 = dma.done.wait (%p5842_p3), [#allocation12], 96   ;;  %p5843_p4 = pmov %p5840_p2 }
  0xc5   : > { %p5844_p11 = pmov %p5840_p2 }
  0xc6   : > { %5139 = vsyncadd (%p5843_p4), [#allocation12], 4294967200 }
  0xc7   : > { %5141 = dma.done.wait (%p5844_p11), [#allocation15], 73920   ;;  %p5845_p6 = pmov %p5840_p2 }
  0xc8   : > { %p5846_p10 = pmov %p5840_p2 }
  0xc9   : > { %5143 = vsyncadd (%p5845_p6), [#allocation15], 4294893376 }
  0xca   : > { %5145 = dma.done.wait (%p5846_p10), [#allocation18], 73776   ;;  %p5847_p13 = pmov %p5840_p2 }
  0xcb   : > { %v5471_v0 = vld [vmem:[%s455_s6] sm:$0xff]  ;;  %v5473_v1 = vld [vmem:[%s455_s6 + $0x8] sm:$0xff]  ;;  %v5475_v2 = vld [vmem:[%s455_s6 + $0x10] sm:$0xff]  ;;  %vm5184_vm0 = vmmov 0   ;;  %s5752_s1 = scalar_lea.vmem [#allocation20], %s4610_s4  ;;  %s4611_s2 = smul.u32 384, %s5267_s23 }
  0xcc   : > { %5147 = vsyncadd (%p5847_p13), [#allocation18], 4294893520  ;;  %v1841_v3 = vadd.f32 %v5473_v1, %v5471_v0  ;;  %v588_v5 = vld [vmem:[#allocation8 + $0x170] sm:$0xff]  ;;  %v587_v6 = vld [vmem:[#allocation8 + $0x168] sm:$0xff]  ;;  %s4118_s24 = sshll.u32 %s5752_s1, 4  ;;  %s4104_s26 = scalar_lea.sflag [#allocation4], %s5441_s3  ;;  %s4119_s24 = int_to_ptr.vmem [resolvable:$true] %s4118_s24 }
  0xcd   : > { %v585_v7 = vld [vmem:[#allocation8 + $0x158] sm:$0xff]  ;;  %1917 = vmatprep.subr.mxu0 %v588_v5  ;;  %v584_v8 = vld [vmem:[#allocation8 + $0x150] sm:$0xff]  ;;  %v582_v9 = vld [vmem:[#allocation8 + $0x140] sm:$0xff]  ;;  %s4116_s30 = scalar_lea.hbm %s5807_s11, %s4611_s2  ;;  %s5082_s25 = scalar_lea.vmem %s4119_s24, 384 }
  0xce   : > { %v1842_v4 = vadd.f32 %v1841_v3, %v5475_v2  ;;  %1918 = vmatpush1.msra.mxu0 %v587_v6  ;;  %v581_v10 = vld [vmem:[#allocation8 + $0x138] sm:$0xff]  ;;  %v579_v11 = vld [vmem:[#allocation8 + $0x128] sm:$0xff]  ;;  %v578_v12 = vld [vmem:[#allocation8 + $0x120] sm:$0xff]  ;;  %p5083_p8 = scmp.ne.s32.totalorder %s4119_s24, %s5082_s25  ;;  %p5848_p9 = scmp.ne.s32.totalorder %s5833_s13, 0 }
  0xcf   : > { %1919 = vmatprep.subr.mxu0 %v585_v7  ;;  %v576_v13 = vld [vmem:[#allocation8 + $0x110] sm:$0xff]  ;;  %v575_v14 = vld [vmem:[#allocation8 + $0x108] sm:$0xff]  ;;  %v573_v15 = vld [vmem:[#allocation8 + $0xf8] sm:$0xff]  ;;  %s5185_s22 = smov [#allocation20]  }
  0xd0   : > { %1843 = vadd.xlane.f32.xlu0 %v1842_v4  ;;  %1920 = vmatpush1.msra.mxu0 %v584_v8  ;;  %v572_v16 = vld [vmem:[#allocation8 + $0xf0] sm:$0xff]  ;;  %v570_v17 = vld [vmem:[#allocation8 + $0xe0] sm:$0xff]  ;;  %v569_v19 = vld [vmem:[#allocation8 + $0xd8] sm:$0xff]  ;;  %p5084_p1 = pnand %p5083_p8, %p5848_p9  ;;  %s5086_s29 = sshll.u32 %s5185_s22, 4  ;;  %s5087_s29 = int_to_ptr.vmem [resolvable:$false] %s5086_s29 }
  0xd1   : > { %1921 = vmatprep.subr.mxu0 %v582_v9  ;;  %v684_v18 = vld [vmem:[#allocation8 + $0x470] sm:$0xff]  ;;  %v683_v20 = vld [vmem:[#allocation8 + $0x468] sm:$0xff]  ;;  %v681_v22 = vld [vmem:[#allocation8 + $0x458] sm:$0xff]  ;;  %s5088_s23 = scalar_lea.vmem %s5087_s29, 768  ;;  %p5089_p12 = scmp.lt.s32.totalorder %s4119_s24, %s5087_s29 }
  0xd2   : > { %1922 = vmatpush1.msra.mxu0 %v581_v10  ;;  %1988 = vmatprep.subr.mxu1 %v684_v18  ;;  %v567_v21 = vld [vmem:[#allocation8 + $0xc8] sm:$0xff]  ;;  %v680_v23 = vld [vmem:[#allocation8 + $0x450] sm:$0xff]  ;;  %v566_v24 = vld [vmem:[#allocation8 + $0xc0] sm:$0xff]  ;;  %p5085_p0 = pneg %p5084_p1  ;;  %p5090_p5 = scmp.lt.s32.totalorder %s5088_s23, %s5082_s25 }
  0xd3   : > { %1923 = vmatprep.subr.mxu0 %v579_v11  ;;  %1989 = vmatpush1.msra.mxu1 %v683_v20  ;;  %v678_v25 = vld [vmem:[#allocation8 + $0x440] sm:$0xff]  ;;  %v564_v26 = vld [vmem:[#allocation8 + $0xb0] sm:$0xff]  ;;  %v677_v27 = vld [vmem:[#allocation8 + $0x438] sm:$0xff] }
  0xd4   : > { %1924 = vmatpush1.msra.mxu0 %v578_v12  ;;  %1990 = vmatprep.subr.mxu1 %v681_v22  ;;  %v675_v28 = vld [vmem:[#allocation8 + $0x428] sm:$0xff]  ;;  %v674_v30 = vld [vmem:[#allocation8 + $0x420] sm:$0xff]  ;;  %v561_v31 = vld [vmem:[#allocation8 + $0x98] sm:$0xff]  ;;  %p5091_p2 = por %p5090_p5, %p5089_p12 }
  0xd5   : > { %1925 = vmatprep.subr.mxu0 %v576_v13  ;;  %1991 = vmatpush1.msra.mxu1 %v680_v23  ;;  %v563_v29 = vld [vmem:[#allocation8 + $0xa8] sm:$0xff]  ;;  %v560_v32 = vld [vmem:[#allocation8 + $0x90] sm:$0xff]  ;;  %v558_v33 = vld [vmem:[#allocation8 + $0x80] sm:$0xff] }
  0xd6   : > { %1926 = vmatpush1.msra.mxu0 %v575_v14  ;;  %1992 = vmatprep.subr.mxu1 %v678_v25  ;;  %v557_v34 = vld [vmem:[#allocation8 + $0x78] sm:$0xff]  ;;  %v555_v35 = vld [vmem:[#allocation8 + $0x68] sm:$0xff]  ;;  %v554_v36 = vld [vmem:[#allocation8 + $0x60] sm:$0xff]  ;;  %p5092_p7 = pnand %p5091_p2, %p5085_p0 }
  0xd7   : > { %1927 = vmatprep.subr.mxu0 %v573_v15  ;;  %1993 = vmatpush1.msra.mxu1 %v677_v27  ;;  %v552_v37 = vld [vmem:[#allocation8 + $0x50] sm:$0xff]  ;;  %v551_v38 = vld [vmem:[#allocation8 + $0x48] sm:$0xff]  ;;  %v549_v39 = vld [vmem:[#allocation8 + $0x38] sm:$0xff] }
  0xd8   : > { %1928 = vmatpush1.msra.mxu0 %v572_v16  ;;  %1994 = vmatprep.subr.mxu1 %v675_v28  ;;  %v548_v40 = vld [vmem:[#allocation8 + $0x30] sm:$0xff]  ;;  %v546_v41 = vld [vmem:[#allocation8 + $0x20] sm:$0xff]  ;;  %v545_v42 = vld [vmem:[#allocation8 + $0x18] sm:$0xff] }
  0xd9   : > { %1929 = vmatprep.subr.mxu0 %v570_v17  ;;  %1995 = vmatpush1.msra.mxu1 %v674_v30  ;;  %v543_v43 = vld [vmem:[#allocation8 + $0x8] sm:$0xff]  ;;  %v542_v44 = vld [vmem:[#allocation8] sm:$0xff]  ;;  %v636_v45 = vld [vmem:[#allocation8 + $0x2f0] sm:$0xff] }
  0xda   : > { %1930 = vmatpush1.msra.mxu0 %v569_v19  ;;  %v635_v46 = vld [vmem:[#allocation8 + $0x2e8] sm:$0xff]  ;;  %v633_v47 = vld [vmem:[#allocation8 + $0x2d8] sm:$0xff]  ;;  %v632_v48 = vld [vmem:[#allocation8 + $0x2d0] sm:$0xff] }
  0xdb   : > { %1931 = vmatprep.subr.mxu0 %v567_v21  ;;  %v630_v49 = vld [vmem:[#allocation8 + $0x2c0] sm:$0xff]  ;;  %v629_v50 = vld [vmem:[#allocation8 + $0x2b8] sm:$0xff]  ;;  %v627_v51 = vld [vmem:[#allocation8 + $0x2a8] sm:$0xff] }
  0xdc   : > { %1932 = vmatpush1.msra.mxu0 %v566_v24  ;;  %v626_v62 = vld [vmem:[#allocation8 + $0x2a0] sm:$0xff]  ;;  %v672_v63 = vld [vmem:[#allocation8 + $0x410] sm:$0xff]  ;;  %v671_v4 = vld [vmem:[#allocation8 + $0x408] sm:$0xff] }
  0xdd   : > { %1933 = vmatprep.subr.mxu0 %v564_v26  ;;  %1996 = vmatprep.subr.mxu1 %v672_v63  ;;  %v624_v3 = vld [vmem:[#allocation8 + $0x290] sm:$0xff]  ;;  %v623_v5 = vld [vmem:[#allocation8 + $0x288] sm:$0xff]  ;;  %v669_v6 = vld [vmem:[#allocation8 + $0x3f8] sm:$0xff] }
  0xde   : > { %1934 = vmatpush1.msra.mxu0 %v563_v29  ;;  %1997 = vmatpush1.msra.mxu1 %v671_v4  ;;  %v621_v7 = vld [vmem:[#allocation8 + $0x278] sm:$0xff]  ;;  %v668_v8 = vld [vmem:[#allocation8 + $0x3f0] sm:$0xff]  ;;  %v666_v10 = vld [vmem:[#allocation8 + $0x3e0] sm:$0xff] }
  0xdf   : > { %1935 = vmatprep.subr.mxu0 %v561_v31  ;;  %1998 = vmatprep.subr.mxu1 %v669_v6  ;;  %v620_v9 = vld [vmem:[#allocation8 + $0x270] sm:$0xff]  ;;  %v618_v11 = vld [vmem:[#allocation8 + $0x260] sm:$0xff]  ;;  %v665_v12 = vld [vmem:[#allocation8 + $0x3d8] sm:$0xff] }
  0xe0   : > { %1936 = vmatpush1.msra.mxu0 %v560_v32  ;;  %1999 = vmatpush1.msra.mxu1 %v668_v8  ;;  %v617_v13 = vld [vmem:[#allocation8 + $0x258] sm:$0xff]  ;;  %v663_v14 = vld [vmem:[#allocation8 + $0x3c8] sm:$0xff]  ;;  %v662_v16 = vld [vmem:[#allocation8 + $0x3c0] sm:$0xff] }
  0xe1   : > { %1937 = vmatprep.subr.mxu0 %v558_v33  ;;  %2000 = vmatprep.subr.mxu1 %v666_v10  ;;  %v615_v15 = vld [vmem:[#allocation8 + $0x248] sm:$0xff]  ;;  %v614_v17 = vld [vmem:[#allocation8 + $0x240] sm:$0xff]  ;;  %v660_v18 = vld [vmem:[#allocation8 + $0x3b0] sm:$0xff] }
  0xe2   : > { %1938 = vmatpush1.msra.mxu0 %v557_v34  ;;  %2001 = vmatpush1.msra.mxu1 %v665_v12  ;;  %v612_v19 = vld [vmem:[#allocation8 + $0x230] sm:$0xff]  ;;  %v659_v20 = vld [vmem:[#allocation8 + $0x3a8] sm:$0xff]  ;;  %v657_v22 = vld [vmem:[#allocation8 + $0x398] sm:$0xff] }
  0xe3   : > { %1939 = vmatprep.subr.mxu0 %v555_v35  ;;  %2002 = vmatprep.subr.mxu1 %v663_v14  ;;  %v611_v21 = vld [vmem:[#allocation8 + $0x228] sm:$0xff]  ;;  %v609_v23 = vld [vmem:[#allocation8 + $0x218] sm:$0xff]  ;;  %v656_v24 = vld [vmem:[#allocation8 + $0x390] sm:$0xff] }
  0xe4   : > { %1940 = vmatpush1.msra.mxu0 %v554_v36  ;;  %2003 = vmatpush1.msra.mxu1 %v662_v16  ;;  %v608_v25 = vld [vmem:[#allocation8 + $0x210] sm:$0xff]  ;;  %v654_v26 = vld [vmem:[#allocation8 + $0x380] sm:$0xff]  ;;  %v653_v28 = vld [vmem:[#allocation8 + $0x378] sm:$0xff] }
  0xe5   : > { %1941 = vmatprep.subr.mxu0 %v552_v37  ;;  %2004 = vmatprep.subr.mxu1 %v660_v18  ;;  %v606_v27 = vld [vmem:[#allocation8 + $0x200] sm:$0xff]  ;;  %v605_v29 = vld [vmem:[#allocation8 + $0x1f8] sm:$0xff]  ;;  %v651_v30 = vld [vmem:[#allocation8 + $0x368] sm:$0xff] }
  0xe6   : > { %1942 = vmatpush1.msra.mxu0 %v551_v38  ;;  %2005 = vmatpush1.msra.mxu1 %v659_v20  ;;  %v603_v31 = vld [vmem:[#allocation8 + $0x1e8] sm:$0xff]  ;;  %v650_v32 = vld [vmem:[#allocation8 + $0x360] sm:$0xff]  ;;  %v648_v34 = vld [vmem:[#allocation8 + $0x350] sm:$0xff] }
  0xe7   : > { %1943 = vmatprep.subr.mxu0 %v549_v39  ;;  %2006 = vmatprep.subr.mxu1 %v657_v22  ;;  %v602_v33 = vld [vmem:[#allocation8 + $0x1e0] sm:$0xff]  ;;  %v600_v35 = vld [vmem:[#allocation8 + $0x1d0] sm:$0xff]  ;;  %v647_v36 = vld [vmem:[#allocation8 + $0x348] sm:$0xff] }
  0xe8   : > { %1944 = vmatpush1.msra.mxu0 %v548_v40  ;;  %2007 = vmatpush1.msra.mxu1 %v656_v24  ;;  %v599_v37 = vld [vmem:[#allocation8 + $0x1c8] sm:$0xff]  ;;  %v645_v38 = vld [vmem:[#allocation8 + $0x338] sm:$0xff]  ;;  %v644_v40 = vld [vmem:[#allocation8 + $0x330] sm:$0xff] }
  0xe9   : > { %1945 = vmatprep.subr.mxu0 %v546_v41  ;;  %2008 = vmatprep.subr.mxu1 %v654_v26  ;;  %v597_v39 = vld [vmem:[#allocation8 + $0x1b8] sm:$0xff]  ;;  %v596_v41 = vld [vmem:[#allocation8 + $0x1b0] sm:$0xff]  ;;  %v586_v22 = vld [vmem:[#allocation8 + $0x160] sm:$0xff] }
  0xea   : > { %1946 = vmatpush1.msra.mxu0 %v545_v42  ;;  %2009 = vmatpush1.msra.mxu1 %v653_v28  ;;  %v642_v42 = vld [vmem:[#allocation8 + $0x320] sm:$0xff]  ;;  %v534_v63 = vld [vmem:[#allocation5] sm:$0x7]  ;;  %v628_v24 = vld [vmem:[#allocation8 + $0x2b0] sm:$0xff] }
  0xeb   : > { %1947 = vmatprep.subr.mxu0 %v543_v43  ;;  %2010 = vmatprep.subr.mxu1 %v651_v30  ;;  %v594_v43 = vld [vmem:[#allocation8 + $0x1a0] sm:$0xff]  ;;  %v580_v26 = vld [vmem:[#allocation8 + $0x130] sm:$0xff] }
  0xec   : > { %1948 = vmatpush1.msra.mxu0 %v542_v44  ;;  %2011 = vmatpush1.msra.mxu1 %v650_v32  ;;  %v641_v44 = vld [vmem:[#allocation8 + $0x318] sm:$0xff]  ;;  %v676_v28 = vld [vmem:[#allocation8 + $0x430] sm:$0xff]  ;;  %v622_v30 = vld [vmem:[#allocation8 + $0x280] sm:$0xff] }
  0xed   : > { %1949 = vmatprep.subr.mxu0 %v636_v45  ;;  %2012 = vmatprep.subr.mxu1 %v648_v34  ;;  %v593_v45 = vld [vmem:[#allocation8 + $0x198] sm:$0xff]  ;;  %v574_v32 = vld [vmem:[#allocation8 + $0x100] sm:$0xff] }
  0xee   : > { %1950 = vmatpush2.msra.mxu0 %v635_v46  ;;  %2013 = vmatpush1.msra.mxu1 %v647_v36  ;;  %v639_v46 = vld [vmem:[#allocation8 + $0x308] sm:$0xff]  ;;  %v670_v34 = vld [vmem:[#allocation8 + $0x400] sm:$0xff]  ;;  %v616_v36 = vld [vmem:[#allocation8 + $0x250] sm:$0xff] }
  0xef   : > { %1951 = vmatprep.subr.mxu0 %v633_v47  ;;  %2014 = vmatprep.subr.mxu1 %v645_v38  ;;  %v591_v47 = vld [vmem:[#allocation8 + $0x188] sm:$0xff]  ;;  %v568_v38 = vld [vmem:[#allocation8 + $0xd0] sm:$0xff] }
  0xf0   : > { %1952 = vmatpush2.msra.mxu0 %v632_v48  ;;  %2015 = vmatpush1.msra.mxu1 %v644_v40  ;;  %v638_v48 = vld [vmem:[#allocation8 + $0x300] sm:$0xff]  ;;  %v664_v40 = vld [vmem:[#allocation8 + $0x3d0] sm:$0xff] }
  0xf1   : > { %1953 = vmatprep.subr.mxu0 %v630_v49  ;;  %2016 = vmatprep.subr.mxu1 %v642_v42  ;;  %v590_v49 = vld [vmem:[#allocation8 + $0x180] sm:$0xff] }
  0xf2   : > { %1954 = vmatpush2.msra.mxu0 %v629_v50  ;;  %2017 = vmatpush1.msra.mxu1 %v641_v44  ;;  %v637_v50 = vld [vmem:[#allocation8 + $0x2f8] sm:$0xff]  ;;  %v610_v42 = vld [vmem:[#allocation8 + $0x220] sm:$0xff] }
  0xf3   : > { %1955 = vmatprep.subr.mxu0 %v627_v51  ;;  %2018 = vmatprep.subr.mxu1 %v639_v46  ;;  %v5183_v51 = vmov 0.0   ;;  %v562_v44 = vld [vmem:[#allocation8 + $0xa0] sm:$0xff] }
  0xf4   : > { %1956 = vmatpush2.msra.mxu0 %v626_v62  ;;  %2019 = vmatpush1.msra.mxu1 %v638_v48  ;;  %v658_v46 = vld [vmem:[#allocation8 + $0x3a0] sm:$0xff]  ;;  %v604_v48 = vld [vmem:[#allocation8 + $0x1f0] sm:$0xff] }
  0xf5   : > { %1957 = vmatprep.subr.mxu0 %v624_v3  ;;  %2052 = vmatprep.mubr.f32.mxu1 %v5183_v51  ;;  %v535_v3 = vld [vmem:[#allocation7] sm:$0x7] }
  0xf6   : > { %1958 = vmatpush2.msra.mxu0 %v623_v5  ;;  %4311 = vmatprep.subr.mxu1 %v637_v50  ;;  %v556_v50 = vld [vmem:[#allocation8 + $0x70] sm:$0xff] }
  0xf7   : > { %1959 = vmatprep.subr.mxu0 %v621_v7 }
  0xf8   : > { %1960 = vmatpush2.msra.mxu0 %v620_v9 }
  0xf9   : > { %1961 = vmatprep.subr.mxu0 %v618_v11 }
  0xfa   : > { %1962 = vmatpush2.msra.mxu0 %v617_v13 }
  0xfb   : > { %1963 = vmatprep.subr.mxu0 %v615_v15 }
  0xfc   : > { %1964 = vmatpush2.msra.mxu0 %v614_v17 }
  0xfd   : > { %1965 = vmatprep.subr.mxu0 %v612_v19  ;;  %v589_v19 = vld [vmem:[#allocation8 + $0x178] sm:$0xff] }
  0xfe   : > { %1966 = vmatpush2.msra.mxu0 %v611_v21  ;;  %v634_v21 = vld [vmem:[#allocation8 + $0x2e0] sm:$0xff] }
  0xff   : > { %1967 = vmatprep.subr.mxu0 %v609_v23  ;;  %v583_v23 = vld [vmem:[#allocation8 + $0x148] sm:$0xff] }
 0x100   : > { %1968 = vmatpush2.msra.mxu0 %v608_v25  ;;  %v679_v25 = vld [vmem:[#allocation8 + $0x448] sm:$0xff] }
 0x101   : > { %1969 = vmatprep.subr.mxu0 %v606_v27  ;;  %v625_v27 = vld [vmem:[#allocation8 + $0x298] sm:$0xff] }
 0x102   : > { %1970 = vmatpush2.msra.mxu0 %v605_v29  ;;  %v577_v29 = vld [vmem:[#allocation8 + $0x118] sm:$0xff] }
 0x103   : > { %1971 = vmatprep.subr.mxu0 %v603_v31  ;;  %v673_v31 = vld [vmem:[#allocation8 + $0x418] sm:$0xff] }
 0x104   : > { %1972 = vmatpush2.msra.mxu0 %v602_v33  ;;  %v619_v33 = vld [vmem:[#allocation8 + $0x268] sm:$0xff] }
 0x105   : > { %1973 = vmatprep.subr.mxu0 %v600_v35  ;;  %v571_v35 = vld [vmem:[#allocation8 + $0xe8] sm:$0xff] }
 0x106   : > { %1974 = vmatpush2.msra.mxu0 %v599_v37  ;;  %v667_v37 = vld [vmem:[#allocation8 + $0x3e8] sm:$0xff] }
 0x107   : > { %1975 = vmatprep.subr.mxu0 %v597_v39  ;;  %v613_v39 = vld [vmem:[#allocation8 + $0x238] sm:$0xff] }
 0x108   : > { %1976 = vmatpush2.msra.mxu0 %v596_v41  ;;  %v565_v41 = vld [vmem:[#allocation8 + $0xb8] sm:$0xff] }
 0x109   : > { %1977 = vmatprep.subr.mxu0 %v594_v43  ;;  %v661_v43 = vld [vmem:[#allocation8 + $0x3b8] sm:$0xff] }
 0x10a   : > { %1978 = vmatpush2.msra.mxu0 %v593_v45  ;;  %v607_v45 = vld [vmem:[#allocation8 + $0x208] sm:$0xff] }
 0x10b   : > { %1979 = vmatprep.subr.mxu0 %v591_v47  ;;  %v559_v47 = vld [vmem:[#allocation8 + $0x88] sm:$0xff] }
 0x10c   : > { %1980 = vmatpush2.msra.mxu0 %v590_v49  ;;  %v655_v49 = vld [vmem:[#allocation8 + $0x388] sm:$0xff] }
 0x10d   : > { %4573 = vmatprep.subr.mxu0 %v5183_v51 }
 0x159   : > { %v1844_v52 = vpop.xlane.xlu0 %1843 }
 0x15a   : > { %v1846_v53 = vmul.f32 0.0026041667, %v1844_v52 }
 0x15c   : > { %v5481_v54 = vsub.f32 %v5471_v0, %v1846_v53  ;;  %v5484_v55 = vsub.f32 %v5473_v1, %v1846_v53  ;;  %v5487_v56 = vsub.f32 %v5475_v2, %v1846_v53 }
 0x15e   : > { %v1850_v57 = vmul.f32 %v5481_v54, %v5481_v54  ;;  %v1851_v58 = vmul.f32 %v5484_v55, %v5484_v55  ;;  %v1852_v59 = vmul.f32 %v5487_v56, %v5487_v56 }
 0x160   : > { %v1853_v60 = vadd.f32 %v1851_v58, %v1850_v57  ;;  %v1864_v58 = vlaneseq }
 0x162   : > { %v1854_v61 = vadd.f32 %v1853_v60, %v1852_v59  ;;  %v5497_v59 = vshrl.u32 %v1864_v58, 7  ;;  %v598_v58 = vld [vmem:[#allocation8 + $0x1c0] sm:$0xff] }
 0x164   : > { %1855 = vadd.xlane.f32.xlu0 %v1854_v61  ;;  %v5500_v60 = vsub.s32 1, %v5497_v59  ;;  %v5503_v61 = vsub.s32 2, %v5497_v59  ;;  %v5506_v62 = vsub.s32 0, %v5497_v59 }
 0x166   : > { %v1871_v4 = vrot.slane %v534_v63, %v5500_v60  ;;  %v1875_v5 = vrot.slane %v534_v63, %v5503_v61  ;;  %v1867_v6 = vrot.slane %v534_v63, %v5506_v62  ;;  %v1890_v8 = vrot.slane %v535_v3, %v5500_v60  ;;  %v649_v63 = vld [vmem:[#allocation8 + $0x358] sm:$0xff] }
 0x167   : > { %v1894_v9 = vrot.slane %v535_v3, %v5503_v61  ;;  %v1886_v13 = vrot.slane %v535_v3, %v5506_v62  ;;  %v550_v3 = vld [vmem:[#allocation8 + $0x40] sm:$0xff] }
 0x1ed   : > { %v1856_v52 = vpop.xlane.xlu0 %1855 }
 0x1ee   : > { %v1857_v53 = vmul.f32 0.0026041667, %v1856_v52  ;;  %v601_v52 = vld [vmem:[#allocation8 + $0x1d8] sm:$0xff] }
 0x1f0   : > { %v1858_v57 = vadd.f32 1e-05, %v1857_v53  ;;  %v652_v53 = vld [vmem:[#allocation8 + $0x370] sm:$0xff] }
 0x1f2   : > { %4765 = vrsqrt.f32 %v1858_v57  ;;  %v553_v57 = vld [vmem:[#allocation8 + $0x58] sm:$0xff] }
 0x1ff   : > { %v4766_v7 = vpop.eup %4765 }
 0x200   : > { %v1861_v10 = vmul.f32 %v4766_v7, %v5484_v55  ;;  %v1862_v11 = vmul.f32 %v4766_v7, %v5487_v56  ;;  %v1860_v12 = vmul.f32 %v4766_v7, %v5481_v54  ;;  %v685_v55 = vld [vmem:[#allocation8 + $0x478] sm:$0xff]  ;;  %v631_v54 = vld [vmem:[#allocation8 + $0x2c8] sm:$0xff]  ;;  %v682_v56 = vld [vmem:[#allocation8 + $0x460] sm:$0xff] }
 0x201   : > { %v592_v7 = vld [vmem:[#allocation8 + $0x190] sm:$0xff] }
 0x202   : > { %v1880_v14 = vmul.f32 %v1871_v4, %v1861_v10  ;;  %v1881_v15 = vmul.f32 %v1875_v5, %v1862_v11  ;;  %v1879_v16 = vmul.f32 %v1867_v6, %v1860_v12  ;;  %v595_v4 = vld [vmem:[#allocation8 + $0x1a8] sm:$0xff]  ;;  %v646_v5 = vld [vmem:[#allocation8 + $0x340] sm:$0xff]  ;;  %v640_v10 = vld [vmem:[#allocation8 + $0x310] sm:$0xff] }
 0x203   : > { %v547_v6 = vld [vmem:[#allocation8 + $0x28] sm:$0xff]  ;;  %v536_v12 = vld [vmem:[#allocation10] sm:$0x7] }
 0x204   : > { %v1899_v17 = vadd.f32 %v1890_v8, %v1880_v14  ;;  %v5517_v18 = vadd.f32 %v1894_v9, %v1881_v15  ;;  %v5519_v20 = vadd.f32 %v1886_v13, %v1879_v16  ;;  %v643_v8 = vld [vmem:[#allocation8 + $0x328] sm:$0xff]  ;;  %v544_v9 = vld [vmem:[#allocation8 + $0x10] sm:$0xff]  ;;  %v1909_v13 = vrot.slane %v536_v12, %v5500_v60 }
 0x205   : > { %v1905_v16 = vrot.slane %v536_v12, %v5506_v62 }
 0x206   : > { %1981 = vmatprep.mubr.f32.mxu0 %v1899_v17  ;;  %2053 = vmatmul.mubr.f32.vlgmr.msra.gmra.mxu1 %v5517_v18 }
 0x207   : > { %4312 = vmatpush3.msra.mxu1 %v589_v19  ;;  %1982 = vmatmul.mubr.f32.vlgmr.msra.gmra.mxu0 %v5519_v20 }
 0x208   : > { %4313 = vmatprep.subr.mxu1 %v634_v21  ;;  %2123 = vmatprep.mubr.f32.mxu1 %v1899_v17 }
 0x209   : > { %4574 = vmatpush3.msra.mxu0 %v685_v55  ;;  %4314 = vmatpush3.msra.mxu1 %v586_v22  ;;  %v1913_v22 = vrot.slane %v536_v12, %v5503_v61  ;;  %v710_v12 = vld [vmem:[#allocation14 + $0xc0] sm:$0xff] }
 0x20a   : > { %4575 = vmatprep.subr.mxu0 %v5183_v51  ;;  %4315 = vmatprep.subr.mxu1 %v631_v54 }
 0x20b   : > { %4576 = vmatpush3.msra.mxu0 %v682_v56  ;;  %4316 = vmatpush3.msra.mxu1 %v583_v23 }
 0x20c   : > { %4577 = vmatprep.subr.mxu0 %v5183_v51  ;;  %4317 = vmatprep.subr.mxu1 %v628_v24 }
 0x20d   : > { %4578 = vmatpush3.msra.mxu0 %v679_v25  ;;  %4318 = vmatpush3.msra.mxu1 %v580_v26 }
 0x20e   : > { %4579 = vmatprep.subr.mxu0 %v5183_v51  ;;  %4319 = vmatprep.subr.mxu1 %v625_v27 }
 0x20f   : > { %4580 = vmatpush3.msra.mxu0 %v676_v28  ;;  %4320 = vmatpush3.msra.mxu1 %v577_v29 }
 0x210   : > { %4581 = vmatprep.subr.mxu0 %v5183_v51  ;;  %4321 = vmatprep.subr.mxu1 %v622_v30 }
 0x211   : > { %4582 = vmatpush3.msra.mxu0 %v673_v31  ;;  %4322 = vmatpush3.msra.mxu1 %v574_v32  ;;  %v867_v32 = vld [vmem:[#allocation14 + $0x5a8] sm:$0xff] }
 0x212   : > { %4583 = vmatprep.subr.mxu0 %v5183_v51  ;;  %4323 = vmatprep.subr.mxu1 %v619_v33  ;;  %v866_v33 = vld [vmem:[#allocation14 + $0x5a0] sm:$0xff] }
 0x213   : > { %4584 = vmatpush3.msra.mxu0 %v670_v34  ;;  %4324 = vmatpush3.msra.mxu1 %v571_v35  ;;  %v855_v34 = vld [vmem:[#allocation14 + $0x548] sm:$0xff] }
 0x214   : > { %4585 = vmatprep.subr.mxu0 %v5183_v51  ;;  %4325 = vmatprep.subr.mxu1 %v616_v36  ;;  %v843_v35 = vld [vmem:[#allocation14 + $0x4e8] sm:$0xff] }
 0x215   : > { %4586 = vmatpush3.msra.mxu0 %v667_v37  ;;  %4326 = vmatpush3.msra.mxu1 %v568_v38  ;;  %v831_v36 = vld [vmem:[#allocation14 + $0x488] sm:$0xff]  ;;  %v818_v38 = vld [vmem:[#allocation14 + $0x420] sm:$0xff] }
 0x216   : > { %4587 = vmatprep.subr.mxu0 %v5183_v51  ;;  %4327 = vmatprep.subr.mxu1 %v613_v39  ;;  %v819_v37 = vld [vmem:[#allocation14 + $0x428] sm:$0xff] }
 0x217   : > { %4588 = vmatpush3.msra.mxu0 %v664_v40  ;;  %4328 = vmatpush3.msra.mxu1 %v565_v41  ;;  %v807_v39 = vld [vmem:[#allocation14 + $0x3c8] sm:$0xff]  ;;  %v806_v40 = vld [vmem:[#allocation14 + $0x3c0] sm:$0xff] }
 0x218   : > { %4589 = vmatprep.subr.mxu0 %v5183_v51  ;;  %4329 = vmatprep.subr.mxu1 %v610_v42  ;;  %v795_v41 = vld [vmem:[#allocation14 + $0x368] sm:$0xff] }
 0x219   : > { %4590 = vmatpush3.msra.mxu0 %v661_v43  ;;  %4330 = vmatpush3.msra.mxu1 %v562_v44  ;;  %v1251_v42 = vld [vmem:[#allocation14 + $0x11a8] sm:$0xff]  ;;  %v794_v43 = vld [vmem:[#allocation14 + $0x360] sm:$0xff] }
 0x21a   : > { %4591 = vmatprep.subr.mxu0 %v5183_v51  ;;  %4331 = vmatprep.subr.mxu1 %v607_v45  ;;  %v1250_v44 = vld [vmem:[#allocation14 + $0x11a0] sm:$0xff]  ;;  %v783_v45 = vld [vmem:[#allocation14 + $0x308] sm:$0xff] }
 0x21b   : > { %4592 = vmatpush3.msra.mxu0 %v658_v46  ;;  %4332 = vmatpush3.msra.mxu1 %v559_v47  ;;  %v1239_v46 = vld [vmem:[#allocation14 + $0x1148] sm:$0xff]  ;;  %v1238_v47 = vld [vmem:[#allocation14 + $0x1140] sm:$0xff] }
 0x21c   : > { %4593 = vmatprep.subr.mxu0 %v5183_v51  ;;  %4333 = vmatprep.subr.mxu1 %v604_v48  ;;  %v782_v48 = vld [vmem:[#allocation14 + $0x300] sm:$0xff] }
 0x21d   : > { %4594 = vmatpush3.msra.mxu0 %v655_v49  ;;  %4334 = vmatpush3.msra.mxu1 %v556_v50  ;;  %v1227_v49 = vld [vmem:[#allocation14 + $0x10e8] sm:$0xff] }
 0x21e   : > { %4595 = vmatprep.subr.mxu0 %v5183_v51  ;;  %4335 = vmatprep.subr.mxu1 %v601_v52  ;;  %v771_v50 = vld [vmem:[#allocation14 + $0x2a8] sm:$0xff]  ;;  %v1226_v52 = vld [vmem:[#allocation14 + $0x10e0] sm:$0xff] }
 0x21f   : > { %4596 = vmatpush3.msra.mxu0 %v652_v53  ;;  %4336 = vmatpush3.msra.mxu1 %v553_v57  ;;  %v1215_v53 = vld [vmem:[#allocation14 + $0x1088] sm:$0xff]  ;;  %v770_v57 = vld [vmem:[#allocation14 + $0x2a0] sm:$0xff] }
 0x220   : > { %4597 = vmatprep.subr.mxu0 %v5183_v51  ;;  %4337 = vmatprep.subr.mxu1 %v598_v58  ;;  %v1214_v58 = vld [vmem:[#allocation14 + $0x1080] sm:$0xff] }
 0x221   : > { %4598 = vmatpush3.msra.mxu0 %v649_v63  ;;  %4338 = vmatpush3.msra.mxu1 %v550_v3  ;;  %v759_v63 = vld [vmem:[#allocation14 + $0x248] sm:$0xff] }
 0x222   : > { %4599 = vmatprep.subr.mxu0 %v5183_v51  ;;  %4339 = vmatprep.subr.mxu1 %v595_v4  ;;  %v1203_v3 = vld [vmem:[#allocation14 + $0x1028] sm:$0xff]  ;;  %v758_v4 = vld [vmem:[#allocation14 + $0x240] sm:$0xff] }
 0x223   : > { %4600 = vmatpush3.msra.mxu0 %v646_v5  ;;  %4340 = vmatpush3.msra.mxu1 %v547_v6  ;;  %v747_v5 = vld [vmem:[#allocation14 + $0x1e8] sm:$0xff]  ;;  %v746_v6 = vld [vmem:[#allocation14 + $0x1e0] sm:$0xff] }
 0x224   : > { %4601 = vmatprep.subr.mxu0 %v5183_v51  ;;  %4341 = vmatprep.subr.mxu1 %v592_v7  ;;  %v735_v7 = vld [vmem:[#allocation14 + $0x188] sm:$0xff] }
 0x225   : > { %4602 = vmatpush3.msra.mxu0 %v643_v8  ;;  %4342 = vmatpush3.msra.mxu1 %v544_v9  ;;  %v734_v8 = vld [vmem:[#allocation14 + $0x180] sm:$0xff]  ;;  %v723_v9 = vld [vmem:[#allocation14 + $0x128] sm:$0xff] }
 0x226   : > { %4603 = vmatprep.subr.mxu0 %v5183_v51  ;;  %2124 = vmatmul.mubr.f32.vlgmr.msra.gmra.mxu1 %v5519_v20 }
 0x227   : > { %4604 = vmatpush3.msra.mxu0 %v640_v10  ;;  %4605 = vmatprep.mubr.msk.f32.mxu0 %vm5184_vm0, %v5183_v51  ;;  %v722_v10 = vld [vmem:[#allocation14 + $0x120] sm:$0xff] }
 0x228   : > { %4606 = vmatmul.mubr.f32.vlgmr.msra.gmra.mxu0 %v5517_v18  ;;  %2323 = vmatprep.subr.mxu1 %v867_v32 }
 0x229   : > { %2458 = vmatprep.mubr.f32.mxu0 %v5183_v51  ;;  %2324 = vmatpush1.msra.mxu1 %v866_v33 }
 0x22a   : > { %2325 = vmatprep.subr.mxu1 %v855_v34  ;;  %2394 = vmatprep.subr.mxu0 %v1251_v42  ;;  %v986_v42 = vld [vmem:[#allocation14 + $0x960] sm:$0xff] }
 0x22b   : > { %2395 = vmatpush1.msra.mxu0 %v1250_v44  ;;  %v975_v44 = vld [vmem:[#allocation14 + $0x908] sm:$0xff] }
 0x22c   : > { %2396 = vmatprep.subr.mxu0 %v1239_v46  ;;  %v974_v46 = vld [vmem:[#allocation14 + $0x900] sm:$0xff] }
 0x22d   : > { %2397 = vmatpush1.msra.mxu0 %v1238_v47  ;;  %v1155_v47 = vld [vmem:[#allocation14 + $0xea8] sm:$0xff] }
 0x22e   : > { %2398 = vmatprep.subr.mxu0 %v1227_v49  ;;  %v1154_v49 = vld [vmem:[#allocation14 + $0xea0] sm:$0xff] }
 0x22f   : > { %2399 = vmatpush1.msra.mxu0 %v1226_v52  ;;  %v1143_v52 = vld [vmem:[#allocation14 + $0xe48] sm:$0xff] }
 0x230   : > { %2400 = vmatprep.subr.mxu0 %v1215_v53  ;;  %v951_v53 = vld [vmem:[#allocation14 + $0x848] sm:$0xff] }
 0x231   : > { %2401 = vmatpush1.msra.mxu0 %v1214_v58  ;;  %v950_v58 = vld [vmem:[#allocation14 + $0x840] sm:$0xff] }
 0x232   : > { %2402 = vmatprep.subr.mxu0 %v1203_v3  ;;  %v939_v3 = vld [vmem:[#allocation14 + $0x7e8] sm:$0xff] }
 0x2c6   : > { %v2054_v14 = vpop.f32.mrf.mxu1 }
 0x2c7   : > { %v1983_v11 = vpop.f32.mrf.mxu0 }
 0x2c8   : > { %v2056_v19 = vpop.f32.mrf.mxu1  ;;  %v1984_v21 = vadd.f32 %v1983_v11, %v1905_v16  ;;  %v711_v11 = vld [vmem:[#allocation14 + $0xc8] sm:$0xff]  ;;  %v686_v16 = vld [vmem:[#allocation14] sm:$0xff] }
 0x2c9   : > { %v1985_v15 = vpop.f32.mrf.mxu0 }
 0x2ca   : > { %v1986_v17 = vadd.f32 %v1985_v15, %v1909_v13  ;;  %v2055_v18 = vadd.f32 %v2054_v14, %v1984_v21  ;;  %v699_v13 = vld [vmem:[#allocation14 + $0x68] sm:$0xff]  ;;  %v698_v14 = vld [vmem:[#allocation14 + $0x60] sm:$0xff] }
 0x2cb   : > { %v687_v15 = vld [vmem:[#allocation14 + $0x8] sm:$0xff] }
 0x2cc   : > { %v2057_v55 = vadd.f32 %v2056_v19, %v1986_v17  ;;  %v5549_v27 = vadd.f32 %v2055_v18, %v5471_v0  ;;  %v842_v0 = vld [vmem:[#allocation14 + $0x4e0] sm:$0xff]  ;;  %v1059_v17 = vld [vmem:[#allocation14 + $0xba8] sm:$0xff] }
 0x2cd   : > { %v1058_v19 = vld [vmem:[#allocation14 + $0xba0] sm:$0xff]  ;;  %v1047_v21 = vld [vmem:[#allocation14 + $0xb48] sm:$0xff] }
 0x2ce   : > { %v5546_v25 = vadd.f32 %v2057_v55, %v5473_v1  ;;  %v854_v1 = vld [vmem:[#allocation14 + $0x540] sm:$0xff]  ;;  %v1035_v55 = vld [vmem:[#allocation14 + $0xae8] sm:$0xff] }
 0x2cf   : > { %2326 = vmatpush1.msra.mxu1 %v854_v1  ;;  %v1011_v1 = vld [vmem:[#allocation14 + $0xa28] sm:$0xff] }
 0x2d0   : > { %v2202_v30 = vadd.f32 %v5546_v25, %v5549_v27  ;;  %2327 = vmatprep.subr.mxu1 %v843_v35  ;;  %v1202_v35 = vld [vmem:[#allocation14 + $0x1020] sm:$0xff] }
 0x2d1   : > { %2328 = vmatpush1.msra.mxu1 %v842_v0  ;;  %2403 = vmatpush1.msra.mxu0 %v1202_v35  ;;  %v1010_v0 = vld [vmem:[#allocation14 + $0xa20] sm:$0xff] }
 0x2d2   : > { %2329 = vmatprep.subr.mxu1 %v831_v36  ;;  %v1191_v36 = vld [vmem:[#allocation14 + $0xfc8] sm:$0xff] }
 0x2d3   : > { %2404 = vmatprep.subr.mxu0 %v1191_v36 }
 0x2e6   : > { %v4343_v20 = vpop.f32.mrf.mxu1 }
 0x2e8   : > { %v2195_v54 = vpop.f32.mrf.mxu0  ;;  %v4344_v56 = vpop.f32.mrf.mxu1 }
 0x2e9   : > { %v4345_v23 = vadd.f32 %v4344_v56, %v4343_v20  ;;  %v1046_v20 = vld [vmem:[#allocation14 + $0xb40] sm:$0xff] }
 0x2ea   : > { %v4607_v24 = vpop.f32.mrf.mxu0  ;;  %v1022_v56 = vld [vmem:[#allocation14 + $0xa80] sm:$0xff] }
 0x2eb   : > { %v2126_v26 = vadd.f32 %v4345_v23, %v1913_v22  ;;  %v1034_v22 = vld [vmem:[#allocation14 + $0xae0] sm:$0xff] }
 0x2ed   : > { %v2196_v28 = vadd.f32 %v2195_v54, %v2126_v26  ;;  %v1023_v54 = vld [vmem:[#allocation14 + $0xa88] sm:$0xff] }
 0x2ef   : > { %v5552_v29 = vadd.f32 %v2196_v28, %v5475_v2  ;;  %v830_v2 = vld [vmem:[#allocation14 + $0x480] sm:$0xff] }
 0x2f0   : > { %2330 = vmatpush1.msra.mxu1 %v830_v2  ;;  %v999_v2 = vld [vmem:[#allocation14 + $0x9c8] sm:$0xff] }
 0x2f1   : > { %v2203_v31 = vadd.f32 %v2202_v30, %v5552_v29  ;;  %2331 = vmatprep.subr.mxu1 %v819_v37  ;;  %v1190_v37 = vld [vmem:[#allocation14 + $0xfc0] sm:$0xff] }
 0x2f2   : > { %2332 = vmatpush1.msra.mxu1 %v818_v38  ;;  %2405 = vmatpush1.msra.mxu0 %v1190_v37  ;;  %v998_v38 = vld [vmem:[#allocation14 + $0x9c0] sm:$0xff] }
 0x2f3   : > { %2204 = vadd.xlane.f32.xlu1 %v2203_v31  ;;  %2333 = vmatprep.subr.mxu1 %v807_v39  ;;  %v1179_v39 = vld [vmem:[#allocation14 + $0xf68] sm:$0xff] }
 0x2f4   : > { %2334 = vmatpush1.msra.mxu1 %v806_v40  ;;  %2406 = vmatprep.subr.mxu0 %v1179_v39  ;;  %v987_v40 = vld [vmem:[#allocation14 + $0x968] sm:$0xff] }
 0x2f5   : > { %2335 = vmatprep.subr.mxu1 %v795_v41  ;;  %v1178_v41 = vld [vmem:[#allocation14 + $0xf60] sm:$0xff] }
 0x2f6   : > { %2336 = vmatpush1.msra.mxu1 %v794_v43  ;;  %2407 = vmatpush1.msra.mxu0 %v1178_v41  ;;  %v1167_v43 = vld [vmem:[#allocation14 + $0xf08] sm:$0xff] }
 0x2f7   : > { %2337 = vmatprep.subr.mxu1 %v783_v45  ;;  %v1166_v45 = vld [vmem:[#allocation14 + $0xf00] sm:$0xff]  ;;  %2408 = vmatprep.subr.mxu0 %v1167_v43 }
 0x2f8   : > { %2338 = vmatpush1.msra.mxu1 %v782_v48  ;;  %v963_v48 = vld [vmem:[#allocation14 + $0x8a8] sm:$0xff]  ;;  %2409 = vmatpush1.msra.mxu0 %v1166_v45 }
 0x2f9   : > { %2339 = vmatprep.subr.mxu1 %v771_v50  ;;  %v962_v50 = vld [vmem:[#allocation14 + $0x8a0] sm:$0xff]  ;;  %2410 = vmatprep.subr.mxu0 %v1155_v47 }
 0x2fa   : > { %2340 = vmatpush1.msra.mxu1 %v770_v57  ;;  %v1142_v57 = vld [vmem:[#allocation14 + $0xe40] sm:$0xff]  ;;  %2411 = vmatpush1.msra.mxu0 %v1154_v49 }
 0x2fb   : > { %2341 = vmatprep.subr.mxu1 %v759_v63  ;;  %v1131_v63 = vld [vmem:[#allocation14 + $0xde8] sm:$0xff]  ;;  %2412 = vmatprep.subr.mxu0 %v1143_v52  ;;  %v845_v52 = vld [vmem:[#allocation14 + $0x4f8] sm:$0xff] }
 0x2fc   : > { %2342 = vmatpush1.msra.mxu1 %v758_v4  ;;  %v1130_v4 = vld [vmem:[#allocation14 + $0xde0] sm:$0xff]  ;;  %2413 = vmatpush1.msra.mxu0 %v1142_v57  ;;  %v844_v57 = vld [vmem:[#allocation14 + $0x4f0] sm:$0xff] }
 0x2fd   : > { %2343 = vmatprep.subr.mxu1 %v747_v5  ;;  %v938_v5 = vld [vmem:[#allocation14 + $0x7e0] sm:$0xff]  ;;  %2414 = vmatprep.subr.mxu0 %v1131_v63  ;;  %v833_v63 = vld [vmem:[#allocation14 + $0x498] sm:$0xff] }
 0x2fe   : > { %2344 = vmatpush1.msra.mxu1 %v746_v6  ;;  %v1119_v6 = vld [vmem:[#allocation14 + $0xd88] sm:$0xff]  ;;  %2415 = vmatpush1.msra.mxu0 %v1130_v4  ;;  %v832_v4 = vld [vmem:[#allocation14 + $0x490] sm:$0xff] }
 0x2ff   : > { %2345 = vmatprep.subr.mxu1 %v735_v7  ;;  %v927_v7 = vld [vmem:[#allocation14 + $0x788] sm:$0xff]  ;;  %2416 = vmatprep.subr.mxu0 %v1119_v6  ;;  %v821_v6 = vld [vmem:[#allocation14 + $0x438] sm:$0xff] }
 0x300   : > { %2346 = vmatpush1.msra.mxu1 %v734_v8  ;;  %v1118_v8 = vld [vmem:[#allocation14 + $0xd80] sm:$0xff] }
 0x301   : > { %2347 = vmatprep.subr.mxu1 %v723_v9  ;;  %v926_v9 = vld [vmem:[#allocation14 + $0x780] sm:$0xff]  ;;  %2417 = vmatpush1.msra.mxu0 %v1118_v8  ;;  %v820_v8 = vld [vmem:[#allocation14 + $0x430] sm:$0xff] }
 0x302   : > { %2348 = vmatpush1.msra.mxu1 %v722_v10  ;;  %v1107_v10 = vld [vmem:[#allocation14 + $0xd28] sm:$0xff] }
 0x303   : > { %2349 = vmatprep.subr.mxu1 %v711_v11  ;;  %v915_v11 = vld [vmem:[#allocation14 + $0x728] sm:$0xff]  ;;  %2418 = vmatprep.subr.mxu0 %v1107_v10  ;;  %v809_v10 = vld [vmem:[#allocation14 + $0x3d8] sm:$0xff] }
 0x304   : > { %2350 = vmatpush1.msra.mxu1 %v710_v12  ;;  %v1106_v12 = vld [vmem:[#allocation14 + $0xd20] sm:$0xff] }
 0x305   : > { %2351 = vmatprep.subr.mxu1 %v699_v13  ;;  %v914_v13 = vld [vmem:[#allocation14 + $0x720] sm:$0xff]  ;;  %2419 = vmatpush1.msra.mxu0 %v1106_v12  ;;  %v808_v12 = vld [vmem:[#allocation14 + $0x3d0] sm:$0xff] }
 0x306   : > { %2352 = vmatpush1.msra.mxu1 %v698_v14  ;;  %v1095_v14 = vld [vmem:[#allocation14 + $0xcc8] sm:$0xff] }
 0x307   : > { %2353 = vmatprep.subr.mxu1 %v687_v15  ;;  %v903_v15 = vld [vmem:[#allocation14 + $0x6c8] sm:$0xff]  ;;  %2420 = vmatprep.subr.mxu0 %v1095_v14  ;;  %v797_v14 = vld [vmem:[#allocation14 + $0x378] sm:$0xff] }
 0x308   : > { %2354 = vmatpush1.msra.mxu1 %v686_v16  ;;  %v1094_v16 = vld [vmem:[#allocation14 + $0xcc0] sm:$0xff] }
 0x309   : > { %2355 = vmatprep.subr.mxu1 %v1059_v17  ;;  %v902_v17 = vld [vmem:[#allocation14 + $0x6c0] sm:$0xff]  ;;  %2421 = vmatpush1.msra.mxu0 %v1094_v16  ;;  %v796_v16 = vld [vmem:[#allocation14 + $0x370] sm:$0xff] }
 0x30a   : > { %2356 = vmatpush2.msra.mxu1 %v1058_v19  ;;  %v1083_v19 = vld [vmem:[#allocation14 + $0xc68] sm:$0xff] }
 0x30b   : > { %2357 = vmatprep.subr.mxu1 %v1047_v21  ;;  %v891_v21 = vld [vmem:[#allocation14 + $0x668] sm:$0xff]  ;;  %2422 = vmatprep.subr.mxu0 %v1083_v19  ;;  %v785_v19 = vld [vmem:[#allocation14 + $0x318] sm:$0xff] }
 0x30c   : > { %2358 = vmatpush2.msra.mxu1 %v1046_v20  ;;  %v1082_v20 = vld [vmem:[#allocation14 + $0xc60] sm:$0xff] }
 0x30d   : > { %2359 = vmatprep.subr.mxu1 %v1035_v55  ;;  %v890_v55 = vld [vmem:[#allocation14 + $0x660] sm:$0xff]  ;;  %2423 = vmatpush1.msra.mxu0 %v1082_v20  ;;  %v784_v20 = vld [vmem:[#allocation14 + $0x310] sm:$0xff] }
 0x30e   : > { %2360 = vmatpush2.msra.mxu1 %v1034_v22  ;;  %v1071_v22 = vld [vmem:[#allocation14 + $0xc08] sm:$0xff] }
 0x30f   : > { %2361 = vmatprep.subr.mxu1 %v1023_v54  ;;  %v879_v54 = vld [vmem:[#allocation14 + $0x608] sm:$0xff]  ;;  %2424 = vmatprep.subr.mxu0 %v1071_v22  ;;  %v773_v22 = vld [vmem:[#allocation14 + $0x2b8] sm:$0xff] }
 0x310   : > { %2362 = vmatpush2.msra.mxu1 %v1022_v56  ;;  %v1070_v56 = vld [vmem:[#allocation14 + $0xc00] sm:$0xff] }
 0x311   : > { %2363 = vmatprep.subr.mxu1 %v1011_v1  ;;  %2425 = vmatpush1.msra.mxu0 %v1070_v56  ;;  %v538_v1 = vld [vmem:[#allocation13] sm:$0x7]  ;;  %v772_v56 = vld [vmem:[#allocation14 + $0x2b0] sm:$0xff] }
 0x312   : > { %2364 = vmatpush2.msra.mxu1 %v1010_v0  ;;  %v2250_v37 = vrot.slane %v538_v1, %v5500_v60 }
 0x313   : > { %2365 = vmatprep.subr.mxu1 %v999_v2 }
 0x314   : > { %2366 = vmatpush2.msra.mxu1 %v998_v38  ;;  %v2254_v38 = vrot.slane %v538_v1, %v5503_v61 }
 0x315   : > { %2367 = vmatprep.subr.mxu1 %v987_v40 }
 0x316   : > { %2368 = vmatpush2.msra.mxu1 %v986_v42  ;;  %v2246_v42 = vrot.slane %v538_v1, %v5506_v62  ;;  %v748_v1 = vld [vmem:[#allocation14 + $0x1f0] sm:$0xff] }
 0x317   : > { %2369 = vmatprep.subr.mxu1 %v975_v44 }
 0x318   : > { %2370 = vmatpush2.msra.mxu1 %v974_v46 }
 0x319   : > { %2371 = vmatprep.subr.mxu1 %v963_v48  ;;  %v868_v48 = vld [vmem:[#allocation14 + $0x5b0] sm:$0xff] }
 0x31a   : > { %2372 = vmatpush2.msra.mxu1 %v962_v50  ;;  %v857_v50 = vld [vmem:[#allocation14 + $0x558] sm:$0xff] }
 0x31b   : > { %2373 = vmatprep.subr.mxu1 %v951_v53  ;;  %v1240_v53 = vld [vmem:[#allocation14 + $0x1150] sm:$0xff] }
 0x31c   : > { %2374 = vmatpush2.msra.mxu1 %v950_v58  ;;  %v1229_v58 = vld [vmem:[#allocation14 + $0x10f8] sm:$0xff] }
 0x31d   : > { %2375 = vmatprep.subr.mxu1 %v939_v3  ;;  %v1228_v3 = vld [vmem:[#allocation14 + $0x10f0] sm:$0xff] }
 0x31e   : > { %2376 = vmatpush2.msra.mxu1 %v938_v5  ;;  %v1217_v5 = vld [vmem:[#allocation14 + $0x1098] sm:$0xff] }
 0x31f   : > { %2377 = vmatprep.subr.mxu1 %v927_v7  ;;  %v1216_v7 = vld [vmem:[#allocation14 + $0x1090] sm:$0xff] }
 0x320   : > { %2378 = vmatpush2.msra.mxu1 %v926_v9  ;;  %v1205_v9 = vld [vmem:[#allocation14 + $0x1038] sm:$0xff] }
 0x321   : > { %2379 = vmatprep.subr.mxu1 %v915_v11  ;;  %v1204_v11 = vld [vmem:[#allocation14 + $0x1030] sm:$0xff] }
 0x322   : > { %2380 = vmatpush2.msra.mxu1 %v914_v13  ;;  %v1193_v13 = vld [vmem:[#allocation14 + $0xfd8] sm:$0xff] }
 0x323   : > { %2381 = vmatprep.subr.mxu1 %v903_v15  ;;  %v1192_v15 = vld [vmem:[#allocation14 + $0xfd0] sm:$0xff] }
 0x324   : > { %2382 = vmatpush2.msra.mxu1 %v902_v17  ;;  %v1181_v17 = vld [vmem:[#allocation14 + $0xf78] sm:$0xff] }
 0x325   : > { %2383 = vmatprep.subr.mxu1 %v891_v21  ;;  %v1180_v21 = vld [vmem:[#allocation14 + $0xf70] sm:$0xff] }
 0x326   : > { %2384 = vmatpush2.msra.mxu1 %v890_v55  ;;  %v1169_v55 = vld [vmem:[#allocation14 + $0xf18] sm:$0xff] }
 0x327   : > { %2385 = vmatprep.subr.mxu1 %v879_v54  ;;  %v1168_v54 = vld [vmem:[#allocation14 + $0xf10] sm:$0xff] }
 0x37c   : > { %v2205_v18 = vpop.xlane.xlu1 %2204 }
 0x37d   : > { %v2206_v23 = vmul.f32 0.0026041667, %v2205_v18  ;;  %v878_v18 = vld [vmem:[#allocation14 + $0x600] sm:$0xff] }
 0x37e   : > { %2386 = vmatpush2.msra.mxu1 %v878_v18  ;;  %v1157_v18 = vld [vmem:[#allocation14 + $0xeb8] sm:$0xff] }
 0x37f   : > { %v5558_v24 = vsub.f32 %v5549_v27, %v2206_v23  ;;  %v5561_v26 = vsub.f32 %v5546_v25, %v2206_v23  ;;  %v5564_v28 = vsub.f32 %v5552_v29, %v2206_v23  ;;  %v869_v23 = vld [vmem:[#allocation14 + $0x5b8] sm:$0xff] }
 0x380   : > { %2465 = vmatprep.subr.mxu0 %v869_v23  ;;  %v761_v23 = vld [vmem:[#allocation14 + $0x258] sm:$0xff] }
 0x381   : > { %v2210_v30 = vmul.f32 %v5558_v24, %v5558_v24  ;;  %v2211_v31 = vmul.f32 %v5561_v26, %v5561_v26  ;;  %v2212_v32 = vmul.f32 %v5564_v28, %v5564_v28 }
 0x383   : > { %v2213_v33 = vadd.f32 %v2211_v31, %v2210_v30  ;;  %v1253_v30 = vld [vmem:[#allocation14 + $0x11b8] sm:$0xff] }
 0x384   : > { %2536 = vmatprep.subr.mxu1 %v1253_v30  ;;  %v1156_v30 = vld [vmem:[#allocation14 + $0xeb0] sm:$0xff] }
 0x385   : > { %v2214_v34 = vadd.f32 %v2213_v33, %v2212_v32 }
 0x387   : > { %2215 = vadd.xlane.f32.xlu1 %v2214_v34  ;;  %v537_v34 = vld [vmem:[#allocation11] sm:$0x7] }
 0x388   : > { %v2231_v35 = vrot.slane %v537_v34, %v5500_v60  ;;  %v2235_v0 = vrot.slane %v537_v34, %v5503_v61  ;;  %v2227_v36 = vrot.slane %v537_v34, %v5506_v62  ;;  %v1144_v34 = vld [vmem:[#allocation14 + $0xe50] sm:$0xff] }
 0x410   : > { %v2216_v31 = vpop.xlane.xlu1 %2215 }
 0x411   : > { %v2217_v32 = vmul.f32 0.0026041667, %v2216_v31  ;;  %v760_v31 = vld [vmem:[#allocation14 + $0x250] sm:$0xff] }
 0x413   : > { %v2218_v33 = vadd.f32 1e-05, %v2217_v32  ;;  %v1145_v32 = vld [vmem:[#allocation14 + $0xe58] sm:$0xff] }
 0x415   : > { %4767 = vrsqrt.f32 %v2218_v33  ;;  %v749_v33 = vld [vmem:[#allocation14 + $0x1f8] sm:$0xff] }
 0x422   : > { %v4768_v2 = vpop.eup %4767 }
 0x423   : > { %v2221_v39 = vmul.f32 %v4768_v2, %v5561_v26  ;;  %v2222_v40 = vmul.f32 %v4768_v2, %v5564_v28  ;;  %v2220_v41 = vmul.f32 %v4768_v2, %v5558_v24  ;;  %v1252_v26 = vld [vmem:[#allocation14 + $0x11b0] sm:$0xff]  ;;  %v1241_v24 = vld [vmem:[#allocation14 + $0x1158] sm:$0xff] }
 0x424   : > { %v856_v28 = vld [vmem:[#allocation14 + $0x550] sm:$0xff] }
 0x425   : > { %v2240_v43 = vmul.f32 %v2231_v35, %v2221_v39  ;;  %v2241_v44 = vmul.f32 %v2235_v0, %v2222_v40  ;;  %v2239_v45 = vmul.f32 %v2227_v36, %v2220_v41  ;;  %v1133_v35 = vld [vmem:[#allocation14 + $0xdf8] sm:$0xff]  ;;  %v1132_v36 = vld [vmem:[#allocation14 + $0xdf0] sm:$0xff] }
 0x426   : > { %v737_v0 = vld [vmem:[#allocation14 + $0x198] sm:$0xff]  ;;  %v736_v2 = vld [vmem:[#allocation14 + $0x190] sm:$0xff] }
 0x427   : > { %v5581_v46 = vadd.f32 %v2250_v37, %v2240_v43  ;;  %v5583_v47 = vadd.f32 %v2254_v38, %v2241_v44  ;;  %v5585_v49 = vadd.f32 %v2246_v42, %v2239_v45  ;;  %v1121_v37 = vld [vmem:[#allocation14 + $0xd98] sm:$0xff]  ;;  %v1120_v39 = vld [vmem:[#allocation14 + $0xd90] sm:$0xff] }
 0x428   : > { %v725_v38 = vld [vmem:[#allocation14 + $0x138] sm:$0xff]  ;;  %v724_v40 = vld [vmem:[#allocation14 + $0x130] sm:$0xff] }
 0x429   : > { %2387 = vmatprep.mubr.f32.mxu1 %v5581_v46  ;;  %2459 = vmatmul.mubr.f32.vlgmr.msra.gmra.mxu0 %v5583_v47  ;;  %v1109_v41 = vld [vmem:[#allocation14 + $0xd38] sm:$0xff]  ;;  %v1108_v43 = vld [vmem:[#allocation14 + $0xd30] sm:$0xff] }
 0x42a   : > { %2466 = vmatpush1.msra.mxu0 %v868_v48  ;;  %2388 = vmatmul.mubr.f32.vlgmr.msra.gmra.mxu1 %v5585_v49  ;;  %v713_v42 = vld [vmem:[#allocation14 + $0xd8] sm:$0xff]  ;;  %v712_v44 = vld [vmem:[#allocation14 + $0xd0] sm:$0xff] }
 0x42b   : > { %2467 = vmatprep.subr.mxu0 %v857_v50  ;;  %2529 = vmatprep.mubr.f32.mxu0 %v5581_v46  ;;  %v1097_v45 = vld [vmem:[#allocation14 + $0xcd8] sm:$0xff]  ;;  %v1096_v50 = vld [vmem:[#allocation14 + $0xcd0] sm:$0xff] }
 0x42c   : > { %2537 = vmatpush1.msra.mxu1 %v1252_v26  ;;  %2468 = vmatpush1.msra.mxu0 %v856_v28  ;;  %v701_v48 = vld [vmem:[#allocation14 + $0x78] sm:$0xff]  ;;  %v700_v26 = vld [vmem:[#allocation14 + $0x70] sm:$0xff] }
 0x42d   : > { %2538 = vmatprep.subr.mxu1 %v1241_v24  ;;  %2469 = vmatprep.subr.mxu0 %v845_v52  ;;  %v1085_v28 = vld [vmem:[#allocation14 + $0xc78] sm:$0xff]  ;;  %v1084_v52 = vld [vmem:[#allocation14 + $0xc70] sm:$0xff] }
 0x42e   : > { %2539 = vmatpush1.msra.mxu1 %v1240_v53  ;;  %2470 = vmatpush1.msra.mxu0 %v844_v57  ;;  %v689_v24 = vld [vmem:[#allocation14 + $0x18] sm:$0xff]  ;;  %v688_v53 = vld [vmem:[#allocation14 + $0x10] sm:$0xff] }
 0x42f   : > { %2540 = vmatprep.subr.mxu1 %v1229_v58  ;;  %2471 = vmatprep.subr.mxu0 %v833_v63  ;;  %v1073_v57 = vld [vmem:[#allocation14 + $0xc18] sm:$0xff]  ;;  %v1072_v63 = vld [vmem:[#allocation14 + $0xc10] sm:$0xff] }
 0x430   : > { %2541 = vmatpush1.msra.mxu1 %v1228_v3  ;;  %2472 = vmatpush1.msra.mxu0 %v832_v4  ;;  %v1061_v58 = vld [vmem:[#allocation14 + $0xbb8] sm:$0xff]  ;;  %v1060_v3 = vld [vmem:[#allocation14 + $0xbb0] sm:$0xff]  ;;  %v871_v4 = vld [vmem:[#allocation14 + $0x5c8] sm:$0xff] }
 0x431   : > { %2542 = vmatprep.subr.mxu1 %v1217_v5  ;;  %2473 = vmatprep.subr.mxu0 %v821_v6  ;;  %v1049_v5 = vld [vmem:[#allocation14 + $0xb58] sm:$0xff]  ;;  %v870_v6 = vld [vmem:[#allocation14 + $0x5c0] sm:$0xff] }
 0x432   : > { %2543 = vmatpush1.msra.mxu1 %v1216_v7  ;;  %2474 = vmatpush1.msra.mxu0 %v820_v8  ;;  %v1048_v7 = vld [vmem:[#allocation14 + $0xb50] sm:$0xff]  ;;  %v859_v8 = vld [vmem:[#allocation14 + $0x568] sm:$0xff] }
 0x433   : > { %2544 = vmatprep.subr.mxu1 %v1205_v9  ;;  %2475 = vmatprep.subr.mxu0 %v809_v10  ;;  %v1037_v9 = vld [vmem:[#allocation14 + $0xaf8] sm:$0xff]  ;;  %v858_v10 = vld [vmem:[#allocation14 + $0x560] sm:$0xff] }
 0x434   : > { %2545 = vmatpush1.msra.mxu1 %v1204_v11  ;;  %2476 = vmatpush1.msra.mxu0 %v808_v12  ;;  %v1036_v11 = vld [vmem:[#allocation14 + $0xaf0] sm:$0xff]  ;;  %v847_v12 = vld [vmem:[#allocation14 + $0x508] sm:$0xff] }
 0x435   : > { %2546 = vmatprep.subr.mxu1 %v1193_v13  ;;  %2477 = vmatprep.subr.mxu0 %v797_v14  ;;  %v1025_v13 = vld [vmem:[#allocation14 + $0xa98] sm:$0xff]  ;;  %v846_v14 = vld [vmem:[#allocation14 + $0x500] sm:$0xff] }
 0x436   : > { %2547 = vmatpush1.msra.mxu1 %v1192_v15  ;;  %2478 = vmatpush1.msra.mxu0 %v796_v16  ;;  %v1024_v15 = vld [vmem:[#allocation14 + $0xa90] sm:$0xff]  ;;  %v835_v16 = vld [vmem:[#allocation14 + $0x4a8] sm:$0xff] }
 0x437   : > { %2548 = vmatprep.subr.mxu1 %v1181_v17  ;;  %2479 = vmatprep.subr.mxu0 %v785_v19  ;;  %v1013_v17 = vld [vmem:[#allocation14 + $0xa38] sm:$0xff]  ;;  %v834_v19 = vld [vmem:[#allocation14 + $0x4a0] sm:$0xff] }
 0x438   : > { %2549 = vmatpush1.msra.mxu1 %v1180_v21  ;;  %2480 = vmatpush1.msra.mxu0 %v784_v20  ;;  %v1012_v21 = vld [vmem:[#allocation14 + $0xa30] sm:$0xff]  ;;  %v823_v20 = vld [vmem:[#allocation14 + $0x448] sm:$0xff] }
 0x439   : > { %2550 = vmatprep.subr.mxu1 %v1169_v55  ;;  %2481 = vmatprep.subr.mxu0 %v773_v22  ;;  %v1001_v55 = vld [vmem:[#allocation14 + $0x9d8] sm:$0xff]  ;;  %v822_v22 = vld [vmem:[#allocation14 + $0x440] sm:$0xff] }
 0x43a   : > { %2551 = vmatpush1.msra.mxu1 %v1168_v54  ;;  %2482 = vmatpush1.msra.mxu0 %v772_v56  ;;  %v1000_v54 = vld [vmem:[#allocation14 + $0x9d0] sm:$0xff]  ;;  %v811_v56 = vld [vmem:[#allocation14 + $0x3e8] sm:$0xff] }
 0x43b   : > { %2552 = vmatprep.subr.mxu1 %v1157_v18  ;;  %2483 = vmatprep.subr.mxu0 %v761_v23  ;;  %v989_v18 = vld [vmem:[#allocation14 + $0x978] sm:$0xff]  ;;  %v810_v23 = vld [vmem:[#allocation14 + $0x3e0] sm:$0xff] }
 0x43c   : > { %2553 = vmatpush1.msra.mxu1 %v1156_v30  ;;  %2484 = vmatpush1.msra.mxu0 %v760_v31  ;;  %v988_v30 = vld [vmem:[#allocation14 + $0x970] sm:$0xff]  ;;  %v799_v31 = vld [vmem:[#allocation14 + $0x388] sm:$0xff] }
 0x43d   : > { %2554 = vmatprep.subr.mxu1 %v1145_v32  ;;  %2485 = vmatprep.subr.mxu0 %v749_v33  ;;  %v977_v32 = vld [vmem:[#allocation14 + $0x918] sm:$0xff]  ;;  %v798_v33 = vld [vmem:[#allocation14 + $0x380] sm:$0xff] }
 0x43e   : > { %2555 = vmatpush1.msra.mxu1 %v1144_v34  ;;  %2486 = vmatpush1.msra.mxu0 %v748_v1  ;;  %v976_v34 = vld [vmem:[#allocation14 + $0x910] sm:$0xff]  ;;  %v787_v1 = vld [vmem:[#allocation14 + $0x328] sm:$0xff] }
 0x43f   : > { %2556 = vmatprep.subr.mxu1 %v1133_v35  ;;  %2487 = vmatprep.subr.mxu0 %v737_v0  ;;  %v965_v35 = vld [vmem:[#allocation14 + $0x8b8] sm:$0xff]  ;;  %v786_v0 = vld [vmem:[#allocation14 + $0x320] sm:$0xff] }
 0x440   : > { %2557 = vmatpush1.msra.mxu1 %v1132_v36  ;;  %2488 = vmatpush1.msra.mxu0 %v736_v2  ;;  %v964_v36 = vld [vmem:[#allocation14 + $0x8b0] sm:$0xff]  ;;  %v775_v2 = vld [vmem:[#allocation14 + $0x2c8] sm:$0xff] }
 0x441   : > { %2558 = vmatprep.subr.mxu1 %v1121_v37  ;;  %2489 = vmatprep.subr.mxu0 %v725_v38  ;;  %v953_v37 = vld [vmem:[#allocation14 + $0x858] sm:$0xff]  ;;  %v774_v38 = vld [vmem:[#allocation14 + $0x2c0] sm:$0xff] }
 0x442   : > { %2559 = vmatpush1.msra.mxu1 %v1120_v39  ;;  %2490 = vmatpush1.msra.mxu0 %v724_v40  ;;  %v952_v39 = vld [vmem:[#allocation14 + $0x850] sm:$0xff]  ;;  %v763_v40 = vld [vmem:[#allocation14 + $0x268] sm:$0xff] }
 0x443   : > { %2560 = vmatprep.subr.mxu1 %v1109_v41  ;;  %2491 = vmatprep.subr.mxu0 %v713_v42  ;;  %v941_v41 = vld [vmem:[#allocation14 + $0x7f8] sm:$0xff]  ;;  %v762_v42 = vld [vmem:[#allocation14 + $0x260] sm:$0xff] }
 0x444   : > { %2561 = vmatpush1.msra.mxu1 %v1108_v43  ;;  %2492 = vmatpush1.msra.mxu0 %v712_v44  ;;  %v940_v43 = vld [vmem:[#allocation14 + $0x7f0] sm:$0xff]  ;;  %v751_v44 = vld [vmem:[#allocation14 + $0x208] sm:$0xff] }
 0x445   : > { %2562 = vmatprep.subr.mxu1 %v1097_v45  ;;  %2493 = vmatprep.subr.mxu0 %v701_v48  ;;  %v929_v45 = vld [vmem:[#allocation14 + $0x798] sm:$0xff]  ;;  %v750_v48 = vld [vmem:[#allocation14 + $0x200] sm:$0xff] }
 0x446   : > { %2563 = vmatpush1.msra.mxu1 %v1096_v50  ;;  %2494 = vmatpush1.msra.mxu0 %v700_v26  ;;  %v928_v50 = vld [vmem:[#allocation14 + $0x790] sm:$0xff]  ;;  %v739_v26 = vld [vmem:[#allocation14 + $0x1a8] sm:$0xff] }
 0x447   : > { %2564 = vmatprep.subr.mxu1 %v1085_v28  ;;  %2495 = vmatprep.subr.mxu0 %v689_v24  ;;  %v917_v28 = vld [vmem:[#allocation14 + $0x738] sm:$0xff]  ;;  %v738_v24 = vld [vmem:[#allocation14 + $0x1a0] sm:$0xff] }
 0x448   : > { %2565 = vmatpush1.msra.mxu1 %v1084_v52  ;;  %2496 = vmatpush1.msra.mxu0 %v688_v53  ;;  %v916_v52 = vld [vmem:[#allocation14 + $0x730] sm:$0xff]  ;;  %v727_v53 = vld [vmem:[#allocation14 + $0x148] sm:$0xff] }
 0x449   : > { %2566 = vmatprep.subr.mxu1 %v1073_v57  ;;  %2497 = vmatprep.subr.mxu0 %v1061_v58  ;;  %v905_v57 = vld [vmem:[#allocation14 + $0x6d8] sm:$0xff]  ;;  %v726_v58 = vld [vmem:[#allocation14 + $0x140] sm:$0xff] }
 0x44a   : > { %2567 = vmatpush1.msra.mxu1 %v1072_v63  ;;  %2600 = vmatprep.mubr.f32.mxu1 %v5183_v51  ;;  %v904_v63 = vld [vmem:[#allocation14 + $0x6d0] sm:$0xff] }
 0x44b   : > { %2498 = vmatpush2.msra.mxu0 %v1060_v3  ;;  %2601 = vmatmul.mubr.f32.vlgmr.msra.gmra.mxu1 %v5583_v47  ;;  %v715_v3 = vld [vmem:[#allocation14 + $0xe8] sm:$0xff] }
 0x44c   : > { %2607 = vmatprep.subr.mxu1 %v871_v4  ;;  %2499 = vmatprep.subr.mxu0 %v1049_v5  ;;  %v893_v4 = vld [vmem:[#allocation14 + $0x678] sm:$0xff]  ;;  %v714_v5 = vld [vmem:[#allocation14 + $0xe0] sm:$0xff] }
 0x44d   : > { %2608 = vmatpush1.msra.mxu1 %v870_v6  ;;  %2671 = vmatprep.mubr.f32.mxu1 %v5581_v46  ;;  %v892_v6 = vld [vmem:[#allocation14 + $0x670] sm:$0xff] }
 0x44e   : > { %2500 = vmatpush2.msra.mxu0 %v1048_v7  ;;  %2609 = vmatprep.subr.mxu1 %v859_v8  ;;  %v703_v7 = vld [vmem:[#allocation14 + $0x88] sm:$0xff]  ;;  %v881_v8 = vld [vmem:[#allocation14 + $0x618] sm:$0xff] }
 0x44f   : > { %2501 = vmatprep.subr.mxu0 %v1037_v9  ;;  %2610 = vmatpush1.msra.mxu1 %v858_v10  ;;  %v702_v9 = vld [vmem:[#allocation14 + $0x80] sm:$0xff]  ;;  %v880_v10 = vld [vmem:[#allocation14 + $0x610] sm:$0xff] }
 0x450   : > { %2502 = vmatpush2.msra.mxu0 %v1036_v11  ;;  %2611 = vmatprep.subr.mxu1 %v847_v12  ;;  %v691_v11 = vld [vmem:[#allocation14 + $0x28] sm:$0xff]  ;;  %v690_v12 = vld [vmem:[#allocation14 + $0x20] sm:$0xff] }
 0x451   : > { %2503 = vmatprep.subr.mxu0 %v1025_v13  ;;  %2612 = vmatpush1.msra.mxu1 %v846_v14  ;;  %v1255_v13 = vld [vmem:[#allocation14 + $0x11c8] sm:$0xff] }
 0x452   : > { %2504 = vmatpush2.msra.mxu0 %v1024_v15  ;;  %2613 = vmatprep.subr.mxu1 %v835_v16  ;;  %v1063_v14 = vld [vmem:[#allocation14 + $0xbc8] sm:$0xff]  ;;  %v1254_v15 = vld [vmem:[#allocation14 + $0x11c0] sm:$0xff] }
 0x453   : > { %2505 = vmatprep.subr.mxu0 %v1013_v17  ;;  %2614 = vmatpush1.msra.mxu1 %v834_v19  ;;  %v1062_v16 = vld [vmem:[#allocation14 + $0xbc0] sm:$0xff]  ;;  %v1243_v17 = vld [vmem:[#allocation14 + $0x1168] sm:$0xff] }
 0x454   : > { %2506 = vmatpush2.msra.mxu0 %v1012_v21  ;;  %2615 = vmatprep.subr.mxu1 %v823_v20  ;;  %v1051_v19 = vld [vmem:[#allocation14 + $0xb68] sm:$0xff]  ;;  %v1242_v21 = vld [vmem:[#allocation14 + $0x1160] sm:$0xff] }
 0x455   : > { %2507 = vmatprep.subr.mxu0 %v1001_v55  ;;  %2616 = vmatpush1.msra.mxu1 %v822_v22  ;;  %v1050_v20 = vld [vmem:[#allocation14 + $0xb60] sm:$0xff]  ;;  %v1231_v55 = vld [vmem:[#allocation14 + $0x1108] sm:$0xff] }
 0x456   : > { %2508 = vmatpush2.msra.mxu0 %v1000_v54  ;;  %2617 = vmatprep.subr.mxu1 %v811_v56  ;;  %v1039_v22 = vld [vmem:[#allocation14 + $0xb08] sm:$0xff]  ;;  %v1230_v54 = vld [vmem:[#allocation14 + $0x1100] sm:$0xff] }
 0x457   : > { %2509 = vmatprep.subr.mxu0 %v989_v18  ;;  %2618 = vmatpush1.msra.mxu1 %v810_v23  ;;  %v1038_v56 = vld [vmem:[#allocation14 + $0xb00] sm:$0xff]  ;;  %v1219_v18 = vld [vmem:[#allocation14 + $0x10a8] sm:$0xff] }
 0x458   : > { %2510 = vmatpush2.msra.mxu0 %v988_v30  ;;  %2619 = vmatprep.subr.mxu1 %v799_v31  ;;  %v1027_v23 = vld [vmem:[#allocation14 + $0xaa8] sm:$0xff]  ;;  %v1218_v30 = vld [vmem:[#allocation14 + $0x10a0] sm:$0xff] }
 0x459   : > { %2511 = vmatprep.subr.mxu0 %v977_v32  ;;  %2620 = vmatpush1.msra.mxu1 %v798_v33  ;;  %v1026_v31 = vld [vmem:[#allocation14 + $0xaa0] sm:$0xff]  ;;  %v1207_v32 = vld [vmem:[#allocation14 + $0x1048] sm:$0xff] }
 0x45a   : > { %2512 = vmatpush2.msra.mxu0 %v976_v34  ;;  %2621 = vmatprep.subr.mxu1 %v787_v1  ;;  %v1015_v33 = vld [vmem:[#allocation14 + $0xa48] sm:$0xff]  ;;  %v1206_v34 = vld [vmem:[#allocation14 + $0x1040] sm:$0xff] }
 0x45b   : > { %2513 = vmatprep.subr.mxu0 %v965_v35  ;;  %2622 = vmatpush1.msra.mxu1 %v786_v0  ;;  %v1014_v1 = vld [vmem:[#allocation14 + $0xa40] sm:$0xff]  ;;  %v1195_v35 = vld [vmem:[#allocation14 + $0xfe8] sm:$0xff] }
 0x45c   : > { %2514 = vmatpush2.msra.mxu0 %v964_v36  ;;  %2623 = vmatprep.subr.mxu1 %v775_v2  ;;  %v1003_v0 = vld [vmem:[#allocation14 + $0x9e8] sm:$0xff]  ;;  %v1194_v36 = vld [vmem:[#allocation14 + $0xfe0] sm:$0xff] }
 0x45d   : > { %2515 = vmatprep.subr.mxu0 %v953_v37  ;;  %2624 = vmatpush1.msra.mxu1 %v774_v38  ;;  %v1002_v2 = vld [vmem:[#allocation14 + $0x9e0] sm:$0xff]  ;;  %v1183_v37 = vld [vmem:[#allocation14 + $0xf88] sm:$0xff] }
 0x45e   : > { %2516 = vmatpush2.msra.mxu0 %v952_v39  ;;  %2625 = vmatprep.subr.mxu1 %v763_v40  ;;  %v991_v38 = vld [vmem:[#allocation14 + $0x988] sm:$0xff]  ;;  %v1182_v39 = vld [vmem:[#allocation14 + $0xf80] sm:$0xff] }
 0x45f   : > { %2517 = vmatprep.subr.mxu0 %v941_v41  ;;  %2626 = vmatpush1.msra.mxu1 %v762_v42  ;;  %v990_v40 = vld [vmem:[#allocation14 + $0x980] sm:$0xff]  ;;  %v1171_v41 = vld [vmem:[#allocation14 + $0xf28] sm:$0xff] }
 0x460   : > { %2518 = vmatpush2.msra.mxu0 %v940_v43  ;;  %2627 = vmatprep.subr.mxu1 %v751_v44  ;;  %v979_v42 = vld [vmem:[#allocation14 + $0x928] sm:$0xff]  ;;  %v1170_v43 = vld [vmem:[#allocation14 + $0xf20] sm:$0xff] }
 0x461   : > { %2519 = vmatprep.subr.mxu0 %v929_v45  ;;  %2628 = vmatpush1.msra.mxu1 %v750_v48  ;;  %v978_v44 = vld [vmem:[#allocation14 + $0x920] sm:$0xff]  ;;  %v1159_v45 = vld [vmem:[#allocation14 + $0xec8] sm:$0xff] }
 0x462   : > { %2520 = vmatpush2.msra.mxu0 %v928_v50  ;;  %2629 = vmatprep.subr.mxu1 %v739_v26  ;;  %v967_v48 = vld [vmem:[#allocation14 + $0x8c8] sm:$0xff]  ;;  %v1158_v50 = vld [vmem:[#allocation14 + $0xec0] sm:$0xff] }
 0x463   : > { %2521 = vmatprep.subr.mxu0 %v917_v28  ;;  %2630 = vmatpush1.msra.mxu1 %v738_v24  ;;  %v966_v26 = vld [vmem:[#allocation14 + $0x8c0] sm:$0xff]  ;;  %v1147_v28 = vld [vmem:[#allocation14 + $0xe68] sm:$0xff] }
 0x464   : > { %2522 = vmatpush2.msra.mxu0 %v916_v52  ;;  %2631 = vmatprep.subr.mxu1 %v727_v53  ;;  %v955_v24 = vld [vmem:[#allocation14 + $0x868] sm:$0xff]  ;;  %v1146_v52 = vld [vmem:[#allocation14 + $0xe60] sm:$0xff] }
 0x465   : > { %2523 = vmatprep.subr.mxu0 %v905_v57  ;;  %2632 = vmatpush1.msra.mxu1 %v726_v58  ;;  %v954_v53 = vld [vmem:[#allocation14 + $0x860] sm:$0xff]  ;;  %v1135_v57 = vld [vmem:[#allocation14 + $0xe08] sm:$0xff] }
 0x466   : > { %2524 = vmatpush2.msra.mxu0 %v904_v63  ;;  %2633 = vmatprep.subr.mxu1 %v715_v3  ;;  %v943_v58 = vld [vmem:[#allocation14 + $0x808] sm:$0xff]  ;;  %v1134_v63 = vld [vmem:[#allocation14 + $0xe00] sm:$0xff] }
 0x467   : > { %2525 = vmatprep.subr.mxu0 %v893_v4  ;;  %2634 = vmatpush1.msra.mxu1 %v714_v5  ;;  %v942_v3 = vld [vmem:[#allocation14 + $0x800] sm:$0xff]  ;;  %v1123_v4 = vld [vmem:[#allocation14 + $0xda8] sm:$0xff] }
 0x468   : > { %2526 = vmatpush2.msra.mxu0 %v892_v6  ;;  %2635 = vmatprep.subr.mxu1 %v703_v7  ;;  %v931_v5 = vld [vmem:[#allocation14 + $0x7a8] sm:$0xff]  ;;  %v1122_v6 = vld [vmem:[#allocation14 + $0xda0] sm:$0xff] }
 0x469   : > { %2527 = vmatprep.subr.mxu0 %v881_v8  ;;  %2636 = vmatpush1.msra.mxu1 %v702_v9  ;;  %v930_v7 = vld [vmem:[#allocation14 + $0x7a0] sm:$0xff]  ;;  %v1111_v8 = vld [vmem:[#allocation14 + $0xd48] sm:$0xff] }
 0x46a   : > { %2528 = vmatpush2.msra.mxu0 %v880_v10  ;;  %2637 = vmatprep.subr.mxu1 %v691_v11  ;;  %v919_v9 = vld [vmem:[#allocation14 + $0x748] sm:$0xff]  ;;  %v1110_v10 = vld [vmem:[#allocation14 + $0xd40] sm:$0xff] }
 0x46b   : > { %2530 = vmatmul.mubr.f32.vlgmr.msra.gmra.mxu0 %v5585_v49  ;;  %2638 = vmatpush1.msra.mxu1 %v690_v12  ;;  %v918_v11 = vld [vmem:[#allocation14 + $0x740] sm:$0xff]  ;;  %v1099_v12 = vld [vmem:[#allocation14 + $0xce8] sm:$0xff] }
 0x46c   : > { %2678 = vmatprep.subr.mxu0 %v1255_v13  ;;  %2639 = vmatprep.subr.mxu1 %v1063_v14  ;;  %v907_v13 = vld [vmem:[#allocation14 + $0x6e8] sm:$0xff]  ;;  %v1098_v14 = vld [vmem:[#allocation14 + $0xce0] sm:$0xff] }
 0x46d   : > { %2679 = vmatpush1.msra.mxu0 %v1254_v15  ;;  %2640 = vmatpush2.msra.mxu1 %v1062_v16  ;;  %v906_v15 = vld [vmem:[#allocation14 + $0x6e0] sm:$0xff]  ;;  %v1087_v16 = vld [vmem:[#allocation14 + $0xc88] sm:$0xff] }
 0x46e   : > { %2680 = vmatprep.subr.mxu0 %v1243_v17  ;;  %2641 = vmatprep.subr.mxu1 %v1051_v19  ;;  %v895_v17 = vld [vmem:[#allocation14 + $0x688] sm:$0xff]  ;;  %v1086_v19 = vld [vmem:[#allocation14 + $0xc80] sm:$0xff] }
 0x46f   : > { %2681 = vmatpush1.msra.mxu0 %v1242_v21  ;;  %2642 = vmatpush2.msra.mxu1 %v1050_v20  ;;  %v894_v21 = vld [vmem:[#allocation14 + $0x680] sm:$0xff]  ;;  %v1075_v20 = vld [vmem:[#allocation14 + $0xc28] sm:$0xff] }
 0x470   : > { %2682 = vmatprep.subr.mxu0 %v1231_v55  ;;  %2643 = vmatprep.subr.mxu1 %v1039_v22  ;;  %v883_v55 = vld [vmem:[#allocation14 + $0x628] sm:$0xff]  ;;  %v1074_v22 = vld [vmem:[#allocation14 + $0xc20] sm:$0xff] }
 0x471   : > { %2683 = vmatpush1.msra.mxu0 %v1230_v54  ;;  %2644 = vmatpush2.msra.mxu1 %v1038_v56  ;;  %v882_v54 = vld [vmem:[#allocation14 + $0x620] sm:$0xff]  ;;  %v873_v56 = vld [vmem:[#allocation14 + $0x5d8] sm:$0xff] }
 0x472   : > { %2684 = vmatprep.subr.mxu0 %v1219_v18  ;;  %2645 = vmatprep.subr.mxu1 %v1027_v23  ;;  %v872_v18 = vld [vmem:[#allocation14 + $0x5d0] sm:$0xff]  ;;  %v1257_v23 = vld [vmem:[#allocation14 + $0x11d8] sm:$0xff] }
 0x473   : > { %2685 = vmatpush1.msra.mxu0 %v1218_v30  ;;  %2646 = vmatpush2.msra.mxu1 %v1026_v31  ;;  %v861_v30 = vld [vmem:[#allocation14 + $0x578] sm:$0xff]  ;;  %v1256_v31 = vld [vmem:[#allocation14 + $0x11d0] sm:$0xff] }
 0x474   : > { %2686 = vmatprep.subr.mxu0 %v1207_v32  ;;  %2647 = vmatprep.subr.mxu1 %v1015_v33  ;;  %v860_v32 = vld [vmem:[#allocation14 + $0x570] sm:$0xff]  ;;  %v1245_v33 = vld [vmem:[#allocation14 + $0x1178] sm:$0xff] }
 0x475   : > { %2687 = vmatpush1.msra.mxu0 %v1206_v34  ;;  %2648 = vmatpush2.msra.mxu1 %v1014_v1  ;;  %v849_v34 = vld [vmem:[#allocation14 + $0x518] sm:$0xff]  ;;  %v1244_v1 = vld [vmem:[#allocation14 + $0x1170] sm:$0xff] }
 0x476   : > { %2688 = vmatprep.subr.mxu0 %v1195_v35  ;;  %2649 = vmatprep.subr.mxu1 %v1003_v0  ;;  %v848_v35 = vld [vmem:[#allocation14 + $0x510] sm:$0xff]  ;;  %v1233_v0 = vld [vmem:[#allocation14 + $0x1118] sm:$0xff] }
 0x477   : > { %2689 = vmatpush1.msra.mxu0 %v1194_v36  ;;  %2650 = vmatpush2.msra.mxu1 %v1002_v2  ;;  %v837_v36 = vld [vmem:[#allocation14 + $0x4b8] sm:$0xff]  ;;  %v1232_v2 = vld [vmem:[#allocation14 + $0x1110] sm:$0xff] }
 0x478   : > { %2690 = vmatprep.subr.mxu0 %v1183_v37  ;;  %2651 = vmatprep.subr.mxu1 %v991_v38  ;;  %v836_v37 = vld [vmem:[#allocation14 + $0x4b0] sm:$0xff]  ;;  %v1221_v38 = vld [vmem:[#allocation14 + $0x10b8] sm:$0xff] }
 0x479   : > { %2691 = vmatpush1.msra.mxu0 %v1182_v39  ;;  %2652 = vmatpush2.msra.mxu1 %v990_v40  ;;  %v825_v39 = vld [vmem:[#allocation14 + $0x458] sm:$0xff]  ;;  %v1220_v40 = vld [vmem:[#allocation14 + $0x10b0] sm:$0xff] }
 0x47a   : > { %2692 = vmatprep.subr.mxu0 %v1171_v41  ;;  %2653 = vmatprep.subr.mxu1 %v979_v42  ;;  %v824_v41 = vld [vmem:[#allocation14 + $0x450] sm:$0xff]  ;;  %v1209_v42 = vld [vmem:[#allocation14 + $0x1058] sm:$0xff] }
 0x47b   : > { %2693 = vmatpush1.msra.mxu0 %v1170_v43  ;;  %2654 = vmatpush2.msra.mxu1 %v978_v44  ;;  %v813_v43 = vld [vmem:[#allocation14 + $0x3f8] sm:$0xff]  ;;  %v1208_v44 = vld [vmem:[#allocation14 + $0x1050] sm:$0xff] }
 0x47c   : > { %2694 = vmatprep.subr.mxu0 %v1159_v45  ;;  %2655 = vmatprep.subr.mxu1 %v967_v48  ;;  %v812_v45 = vld [vmem:[#allocation14 + $0x3f0] sm:$0xff]  ;;  %v1197_v48 = vld [vmem:[#allocation14 + $0xff8] sm:$0xff] }
 0x47d   : > { %2695 = vmatpush1.msra.mxu0 %v1158_v50  ;;  %2656 = vmatpush2.msra.mxu1 %v966_v26  ;;  %v801_v50 = vld [vmem:[#allocation14 + $0x398] sm:$0xff]  ;;  %v1196_v26 = vld [vmem:[#allocation14 + $0xff0] sm:$0xff] }
 0x47e   : > { %2696 = vmatprep.subr.mxu0 %v1147_v28  ;;  %2657 = vmatprep.subr.mxu1 %v955_v24  ;;  %v800_v28 = vld [vmem:[#allocation14 + $0x390] sm:$0xff]  ;;  %v1185_v24 = vld [vmem:[#allocation14 + $0xf98] sm:$0xff] }
 0x47f   : > { %2697 = vmatpush1.msra.mxu0 %v1146_v52  ;;  %2658 = vmatpush2.msra.mxu1 %v954_v53  ;;  %v789_v52 = vld [vmem:[#allocation14 + $0x338] sm:$0xff]  ;;  %v1184_v53 = vld [vmem:[#allocation14 + $0xf90] sm:$0xff] }
 0x480   : > { %2698 = vmatprep.subr.mxu0 %v1135_v57  ;;  %2659 = vmatprep.subr.mxu1 %v943_v58  ;;  %v788_v57 = vld [vmem:[#allocation14 + $0x330] sm:$0xff]  ;;  %v1173_v58 = vld [vmem:[#allocation14 + $0xf38] sm:$0xff] }
 0x481   : > { %2699 = vmatpush1.msra.mxu0 %v1134_v63  ;;  %2660 = vmatpush2.msra.mxu1 %v942_v3  ;;  %v777_v63 = vld [vmem:[#allocation14 + $0x2d8] sm:$0xff]  ;;  %v1172_v3 = vld [vmem:[#allocation14 + $0xf30] sm:$0xff] }
 0x482   : > { %2700 = vmatprep.subr.mxu0 %v1123_v4  ;;  %2661 = vmatprep.subr.mxu1 %v931_v5  ;;  %v776_v4 = vld [vmem:[#allocation14 + $0x2d0] sm:$0xff]  ;;  %v1161_v5 = vld [vmem:[#allocation14 + $0xed8] sm:$0xff] }
 0x483   : > { %2701 = vmatpush1.msra.mxu0 %v1122_v6  ;;  %2662 = vmatpush2.msra.mxu1 %v930_v7  ;;  %v765_v6 = vld [vmem:[#allocation14 + $0x278] sm:$0xff]  ;;  %v1160_v7 = vld [vmem:[#allocation14 + $0xed0] sm:$0xff] }
 0x484   : > { %2702 = vmatprep.subr.mxu0 %v1111_v8  ;;  %2663 = vmatprep.subr.mxu1 %v919_v9  ;;  %v764_v8 = vld [vmem:[#allocation14 + $0x270] sm:$0xff]  ;;  %v1149_v9 = vld [vmem:[#allocation14 + $0xe78] sm:$0xff] }
 0x485   : > { %2703 = vmatpush1.msra.mxu0 %v1110_v10  ;;  %2664 = vmatpush2.msra.mxu1 %v918_v11  ;;  %v753_v10 = vld [vmem:[#allocation14 + $0x218] sm:$0xff]  ;;  %v1148_v11 = vld [vmem:[#allocation14 + $0xe70] sm:$0xff] }
 0x486   : > { %2704 = vmatprep.subr.mxu0 %v1099_v12  ;;  %2665 = vmatprep.subr.mxu1 %v907_v13  ;;  %v752_v12 = vld [vmem:[#allocation14 + $0x210] sm:$0xff]  ;;  %v1137_v13 = vld [vmem:[#allocation14 + $0xe18] sm:$0xff] }
 0x487   : > { %2705 = vmatpush1.msra.mxu0 %v1098_v14  ;;  %2666 = vmatpush2.msra.mxu1 %v906_v15  ;;  %v741_v14 = vld [vmem:[#allocation14 + $0x1b8] sm:$0xff]  ;;  %v1136_v15 = vld [vmem:[#allocation14 + $0xe10] sm:$0xff] }
 0x488   : > { %2706 = vmatprep.subr.mxu0 %v1087_v16  ;;  %2667 = vmatprep.subr.mxu1 %v895_v17  ;;  %v740_v16 = vld [vmem:[#allocation14 + $0x1b0] sm:$0xff]  ;;  %v1125_v17 = vld [vmem:[#allocation14 + $0xdb8] sm:$0xff] }
 0x489   : > { %2707 = vmatpush1.msra.mxu0 %v1086_v19  ;;  %2668 = vmatpush2.msra.mxu1 %v894_v21  ;;  %v729_v19 = vld [vmem:[#allocation14 + $0x158] sm:$0xff]  ;;  %v1124_v21 = vld [vmem:[#allocation14 + $0xdb0] sm:$0xff] }
 0x48a   : > { %2708 = vmatprep.subr.mxu0 %v1075_v20  ;;  %2669 = vmatprep.subr.mxu1 %v883_v55  ;;  %v728_v20 = vld [vmem:[#allocation14 + $0x150] sm:$0xff]  ;;  %v1113_v55 = vld [vmem:[#allocation14 + $0xd58] sm:$0xff] }
 0x48b   : > { %2709 = vmatpush1.msra.mxu0 %v1074_v22  ;;  %2742 = vmatprep.mubr.f32.mxu0 %v5183_v51  ;;  %v717_v22 = vld [vmem:[#allocation14 + $0xf8] sm:$0xff] }
 0x48c   : > { %2670 = vmatpush2.msra.mxu1 %v882_v54  ;;  %2743 = vmatmul.mubr.f32.vlgmr.msra.gmra.mxu0 %v5583_v47  ;;  %v1112_v54 = vld [vmem:[#allocation14 + $0xd50] sm:$0xff] }
 0x48d   : > { %2749 = vmatprep.subr.mxu0 %v873_v56  ;;  %2672 = vmatmul.mubr.f32.vlgmr.msra.gmra.mxu1 %v5585_v49  ;;  %v716_v56 = vld [vmem:[#allocation14 + $0xf0] sm:$0xff] }
 0x48e   : > { %2750 = vmatpush1.msra.mxu0 %v872_v18  ;;  %2813 = vmatprep.mubr.f32.mxu0 %v5581_v46  ;;  %v1101_v18 = vld [vmem:[#allocation14 + $0xcf8] sm:$0xff] }
 0x48f   : > { %2820 = vmatprep.subr.mxu1 %v1257_v23  ;;  %2751 = vmatprep.subr.mxu0 %v861_v30  ;;  %v705_v23 = vld [vmem:[#allocation14 + $0x98] sm:$0xff]  ;;  %v1100_v30 = vld [vmem:[#allocation14 + $0xcf0] sm:$0xff] }
 0x490   : > { %2821 = vmatpush1.msra.mxu1 %v1256_v31  ;;  %2752 = vmatpush1.msra.mxu0 %v860_v32  ;;  %v704_v31 = vld [vmem:[#allocation14 + $0x90] sm:$0xff]  ;;  %v1089_v32 = vld [vmem:[#allocation14 + $0xc98] sm:$0xff] }
 0x491   : > { %2822 = vmatprep.subr.mxu1 %v1245_v33  ;;  %2753 = vmatprep.subr.mxu0 %v849_v34  ;;  %v693_v33 = vld [vmem:[#allocation14 + $0x38] sm:$0xff]  ;;  %v1088_v34 = vld [vmem:[#allocation14 + $0xc90] sm:$0xff] }
 0x492   : > { %2823 = vmatpush1.msra.mxu1 %v1244_v1  ;;  %2754 = vmatpush1.msra.mxu0 %v848_v35  ;;  %v692_v1 = vld [vmem:[#allocation14 + $0x30] sm:$0xff]  ;;  %v1077_v35 = vld [vmem:[#allocation14 + $0xc38] sm:$0xff] }
 0x493   : > { %2824 = vmatprep.subr.mxu1 %v1233_v0  ;;  %2755 = vmatprep.subr.mxu0 %v837_v36  ;;  %v1065_v0 = vld [vmem:[#allocation14 + $0xbd8] sm:$0xff]  ;;  %v1076_v36 = vld [vmem:[#allocation14 + $0xc30] sm:$0xff] }
 0x494   : > { %2825 = vmatpush1.msra.mxu1 %v1232_v2  ;;  %2756 = vmatpush1.msra.mxu0 %v836_v37  ;;  %v1064_v2 = vld [vmem:[#allocation14 + $0xbd0] sm:$0xff]  ;;  %v875_v37 = vld [vmem:[#allocation14 + $0x5e8] sm:$0xff] }
 0x495   : > { %2826 = vmatprep.subr.mxu1 %v1221_v38  ;;  %2757 = vmatprep.subr.mxu0 %v825_v39  ;;  %v1053_v38 = vld [vmem:[#allocation14 + $0xb78] sm:$0xff]  ;;  %v874_v39 = vld [vmem:[#allocation14 + $0x5e0] sm:$0xff] }
 0x496   : > { %2827 = vmatpush1.msra.mxu1 %v1220_v40  ;;  %2758 = vmatpush1.msra.mxu0 %v824_v41  ;;  %v1052_v40 = vld [vmem:[#allocation14 + $0xb70] sm:$0xff]  ;;  %v863_v41 = vld [vmem:[#allocation14 + $0x588] sm:$0xff] }
 0x497   : > { %2828 = vmatprep.subr.mxu1 %v1209_v42  ;;  %2759 = vmatprep.subr.mxu0 %v813_v43  ;;  %v1041_v42 = vld [vmem:[#allocation14 + $0xb18] sm:$0xff]  ;;  %v862_v43 = vld [vmem:[#allocation14 + $0x580] sm:$0xff] }
 0x498   : > { %2829 = vmatpush1.msra.mxu1 %v1208_v44  ;;  %2760 = vmatpush1.msra.mxu0 %v812_v45  ;;  %v1040_v44 = vld [vmem:[#allocation14 + $0xb10] sm:$0xff]  ;;  %v851_v45 = vld [vmem:[#allocation14 + $0x528] sm:$0xff] }
 0x499   : > { %2830 = vmatprep.subr.mxu1 %v1197_v48  ;;  %2761 = vmatprep.subr.mxu0 %v801_v50  ;;  %v1029_v48 = vld [vmem:[#allocation14 + $0xab8] sm:$0xff]  ;;  %v850_v50 = vld [vmem:[#allocation14 + $0x520] sm:$0xff] }
 0x49a   : > { %2831 = vmatpush1.msra.mxu1 %v1196_v26  ;;  %2762 = vmatpush1.msra.mxu0 %v800_v28  ;;  %v1028_v26 = vld [vmem:[#allocation14 + $0xab0] sm:$0xff]  ;;  %v839_v28 = vld [vmem:[#allocation14 + $0x4c8] sm:$0xff] }
 0x49b   : > { %2832 = vmatprep.subr.mxu1 %v1185_v24  ;;  %2763 = vmatprep.subr.mxu0 %v789_v52  ;;  %v1017_v24 = vld [vmem:[#allocation14 + $0xa58] sm:$0xff]  ;;  %v838_v52 = vld [vmem:[#allocation14 + $0x4c0] sm:$0xff] }
 0x49c   : > { %2833 = vmatpush1.msra.mxu1 %v1184_v53  ;;  %2764 = vmatpush1.msra.mxu0 %v788_v57  ;;  %v1016_v53 = vld [vmem:[#allocation14 + $0xa50] sm:$0xff]  ;;  %v827_v57 = vld [vmem:[#allocation14 + $0x468] sm:$0xff] }
 0x49d   : > { %2834 = vmatprep.subr.mxu1 %v1173_v58  ;;  %2765 = vmatprep.subr.mxu0 %v777_v63  ;;  %v1005_v58 = vld [vmem:[#allocation14 + $0x9f8] sm:$0xff]  ;;  %v826_v63 = vld [vmem:[#allocation14 + $0x460] sm:$0xff] }
 0x49e   : > { %2835 = vmatpush1.msra.mxu1 %v1172_v3  ;;  %2766 = vmatpush1.msra.mxu0 %v776_v4  ;;  %v1004_v3 = vld [vmem:[#allocation14 + $0x9f0] sm:$0xff]  ;;  %v815_v4 = vld [vmem:[#allocation14 + $0x408] sm:$0xff] }
 0x49f   : > { %2836 = vmatprep.subr.mxu1 %v1161_v5  ;;  %2767 = vmatprep.subr.mxu0 %v765_v6  ;;  %v993_v5 = vld [vmem:[#allocation14 + $0x998] sm:$0xff]  ;;  %v814_v6 = vld [vmem:[#allocation14 + $0x400] sm:$0xff] }
 0x4a0   : > { %2837 = vmatpush1.msra.mxu1 %v1160_v7  ;;  %2768 = vmatpush1.msra.mxu0 %v764_v8  ;;  %v992_v7 = vld [vmem:[#allocation14 + $0x990] sm:$0xff]  ;;  %v803_v8 = vld [vmem:[#allocation14 + $0x3a8] sm:$0xff] }
 0x4a1   : > { %2838 = vmatprep.subr.mxu1 %v1149_v9  ;;  %2769 = vmatprep.subr.mxu0 %v753_v10  ;;  %v981_v9 = vld [vmem:[#allocation14 + $0x938] sm:$0xff]  ;;  %v802_v10 = vld [vmem:[#allocation14 + $0x3a0] sm:$0xff] }
 0x4a2   : > { %2839 = vmatpush1.msra.mxu1 %v1148_v11  ;;  %2770 = vmatpush1.msra.mxu0 %v752_v12  ;;  %v980_v11 = vld [vmem:[#allocation14 + $0x930] sm:$0xff]  ;;  %v791_v12 = vld [vmem:[#allocation14 + $0x348] sm:$0xff] }
 0x4a3   : > { %2840 = vmatprep.subr.mxu1 %v1137_v13  ;;  %2771 = vmatprep.subr.mxu0 %v741_v14  ;;  %v969_v13 = vld [vmem:[#allocation14 + $0x8d8] sm:$0xff]  ;;  %v790_v14 = vld [vmem:[#allocation14 + $0x340] sm:$0xff] }
 0x4a4   : > { %2841 = vmatpush1.msra.mxu1 %v1136_v15  ;;  %2772 = vmatpush1.msra.mxu0 %v740_v16  ;;  %v968_v15 = vld [vmem:[#allocation14 + $0x8d0] sm:$0xff]  ;;  %v779_v16 = vld [vmem:[#allocation14 + $0x2e8] sm:$0xff] }
 0x4a5   : > { %2842 = vmatprep.subr.mxu1 %v1125_v17  ;;  %2773 = vmatprep.subr.mxu0 %v729_v19  ;;  %v957_v17 = vld [vmem:[#allocation14 + $0x878] sm:$0xff]  ;;  %v778_v19 = vld [vmem:[#allocation14 + $0x2e0] sm:$0xff] }
 0x4a6   : > { %2843 = vmatpush1.msra.mxu1 %v1124_v21  ;;  %2774 = vmatpush1.msra.mxu0 %v728_v20  ;;  %v956_v21 = vld [vmem:[#allocation14 + $0x870] sm:$0xff]  ;;  %v767_v20 = vld [vmem:[#allocation14 + $0x288] sm:$0xff] }
 0x4a7   : > { %2844 = vmatprep.subr.mxu1 %v1113_v55  ;;  %2775 = vmatprep.subr.mxu0 %v717_v22  ;;  %v945_v55 = vld [vmem:[#allocation14 + $0x818] sm:$0xff]  ;;  %v766_v22 = vld [vmem:[#allocation14 + $0x280] sm:$0xff] }
 0x4a8   : > { %2845 = vmatpush1.msra.mxu1 %v1112_v54  ;;  %2776 = vmatpush1.msra.mxu0 %v716_v56  ;;  %v944_v54 = vld [vmem:[#allocation14 + $0x810] sm:$0xff]  ;;  %v755_v56 = vld [vmem:[#allocation14 + $0x228] sm:$0xff] }
 0x4a9   : > { %2846 = vmatprep.subr.mxu1 %v1101_v18  ;;  %2777 = vmatprep.subr.mxu0 %v705_v23  ;;  %v933_v18 = vld [vmem:[#allocation14 + $0x7b8] sm:$0xff]  ;;  %v754_v23 = vld [vmem:[#allocation14 + $0x220] sm:$0xff] }
 0x4aa   : > { %2847 = vmatpush1.msra.mxu1 %v1100_v30  ;;  %2778 = vmatpush1.msra.mxu0 %v704_v31  ;;  %v932_v30 = vld [vmem:[#allocation14 + $0x7b0] sm:$0xff]  ;;  %v743_v31 = vld [vmem:[#allocation14 + $0x1c8] sm:$0xff] }
 0x4ab   : > { %2848 = vmatprep.subr.mxu1 %v1089_v32  ;;  %2779 = vmatprep.subr.mxu0 %v693_v33  ;;  %v921_v32 = vld [vmem:[#allocation14 + $0x758] sm:$0xff]  ;;  %v742_v33 = vld [vmem:[#allocation14 + $0x1c0] sm:$0xff] }
 0x4ac   : > { %2849 = vmatpush1.msra.mxu1 %v1088_v34  ;;  %2780 = vmatpush1.msra.mxu0 %v692_v1  ;;  %v920_v34 = vld [vmem:[#allocation14 + $0x750] sm:$0xff]  ;;  %v731_v1 = vld [vmem:[#allocation14 + $0x168] sm:$0xff] }
 0x4ad   : > { %2850 = vmatprep.subr.mxu1 %v1077_v35  ;;  %2781 = vmatprep.subr.mxu0 %v1065_v0  ;;  %v909_v35 = vld [vmem:[#allocation14 + $0x6f8] sm:$0xff]  ;;  %v730_v0 = vld [vmem:[#allocation14 + $0x160] sm:$0xff] }
 0x4ae   : > { %2851 = vmatpush1.msra.mxu1 %v1076_v36  ;;  %2884 = vmatprep.mubr.f32.mxu1 %v5183_v51  ;;  %v908_v36 = vld [vmem:[#allocation14 + $0x6f0] sm:$0xff] }
 0x4af   : > { %2782 = vmatpush2.msra.mxu0 %v1064_v2  ;;  %2885 = vmatmul.mubr.f32.vlgmr.msra.gmra.mxu1 %v5583_v47  ;;  %v719_v2 = vld [vmem:[#allocation14 + $0x108] sm:$0xff] }
 0x4b0   : > { %2891 = vmatprep.subr.mxu1 %v875_v37  ;;  %2783 = vmatprep.subr.mxu0 %v1053_v38  ;;  %v897_v37 = vld [vmem:[#allocation14 + $0x698] sm:$0xff]  ;;  %v718_v38 = vld [vmem:[#allocation14 + $0x100] sm:$0xff] }
 0x4b1   : > { %2892 = vmatpush1.msra.mxu1 %v874_v39  ;;  %2955 = vmatprep.mubr.f32.mxu1 %v5581_v46  ;;  %v896_v39 = vld [vmem:[#allocation14 + $0x690] sm:$0xff] }
 0x4b2   : > { %2784 = vmatpush2.msra.mxu0 %v1052_v40  ;;  %2893 = vmatprep.subr.mxu1 %v863_v41  ;;  %v707_v40 = vld [vmem:[#allocation14 + $0xa8] sm:$0xff]  ;;  %v885_v41 = vld [vmem:[#allocation14 + $0x638] sm:$0xff] }
 0x4b3   : > { %2785 = vmatprep.subr.mxu0 %v1041_v42  ;;  %2894 = vmatpush1.msra.mxu1 %v862_v43  ;;  %v706_v42 = vld [vmem:[#allocation14 + $0xa0] sm:$0xff]  ;;  %v884_v43 = vld [vmem:[#allocation14 + $0x630] sm:$0xff] }
 0x4b4   : > { %2786 = vmatpush2.msra.mxu0 %v1040_v44  ;;  %2895 = vmatprep.subr.mxu1 %v851_v45  ;;  %v695_v44 = vld [vmem:[#allocation14 + $0x48] sm:$0xff]  ;;  %v694_v45 = vld [vmem:[#allocation14 + $0x40] sm:$0xff] }
 0x4b5   : > { %2787 = vmatprep.subr.mxu0 %v1029_v48  ;;  %2896 = vmatpush1.msra.mxu1 %v850_v50  ;;  %v1259_v48 = vld [vmem:[#allocation14 + $0x11e8] sm:$0xff] }
 0x4b6   : > { %2788 = vmatpush2.msra.mxu0 %v1028_v26  ;;  %2897 = vmatprep.subr.mxu1 %v839_v28  ;;  %v1067_v50 = vld [vmem:[#allocation14 + $0xbe8] sm:$0xff]  ;;  %v1258_v26 = vld [vmem:[#allocation14 + $0x11e0] sm:$0xff] }
 0x4b7   : > { %2789 = vmatprep.subr.mxu0 %v1017_v24  ;;  %2898 = vmatpush1.msra.mxu1 %v838_v52  ;;  %v1066_v28 = vld [vmem:[#allocation14 + $0xbe0] sm:$0xff]  ;;  %v1247_v24 = vld [vmem:[#allocation14 + $0x1188] sm:$0xff] }
 0x4b8   : > { %2790 = vmatpush2.msra.mxu0 %v1016_v53  ;;  %2899 = vmatprep.subr.mxu1 %v827_v57  ;;  %v1055_v52 = vld [vmem:[#allocation14 + $0xb88] sm:$0xff]  ;;  %v1246_v53 = vld [vmem:[#allocation14 + $0x1180] sm:$0xff] }
 0x4b9   : > { %2791 = vmatprep.subr.mxu0 %v1005_v58  ;;  %2900 = vmatpush1.msra.mxu1 %v826_v63  ;;  %v1054_v57 = vld [vmem:[#allocation14 + $0xb80] sm:$0xff]  ;;  %v1235_v58 = vld [vmem:[#allocation14 + $0x1128] sm:$0xff] }
 0x4ba   : > { %2792 = vmatpush2.msra.mxu0 %v1004_v3  ;;  %2901 = vmatprep.subr.mxu1 %v815_v4  ;;  %v1043_v63 = vld [vmem:[#allocation14 + $0xb28] sm:$0xff]  ;;  %v1234_v3 = vld [vmem:[#allocation14 + $0x1120] sm:$0xff] }
 0x4bb   : > { %2793 = vmatprep.subr.mxu0 %v993_v5  ;;  %2902 = vmatpush1.msra.mxu1 %v814_v6  ;;  %v1042_v4 = vld [vmem:[#allocation14 + $0xb20] sm:$0xff]  ;;  %v1223_v5 = vld [vmem:[#allocation14 + $0x10c8] sm:$0xff] }
 0x4bc   : > { %2794 = vmatpush2.msra.mxu0 %v992_v7  ;;  %2903 = vmatprep.subr.mxu1 %v803_v8  ;;  %v1031_v6 = vld [vmem:[#allocation14 + $0xac8] sm:$0xff]  ;;  %v1222_v7 = vld [vmem:[#allocation14 + $0x10c0] sm:$0xff] }
 0x4bd   : > { %2795 = vmatprep.subr.mxu0 %v981_v9  ;;  %2904 = vmatpush1.msra.mxu1 %v802_v10  ;;  %v1030_v8 = vld [vmem:[#allocation14 + $0xac0] sm:$0xff]  ;;  %v1211_v9 = vld [vmem:[#allocation14 + $0x1068] sm:$0xff] }
 0x4be   : > { %2796 = vmatpush2.msra.mxu0 %v980_v11  ;;  %2905 = vmatprep.subr.mxu1 %v791_v12  ;;  %v1019_v10 = vld [vmem:[#allocation14 + $0xa68] sm:$0xff]  ;;  %v1210_v11 = vld [vmem:[#allocation14 + $0x1060] sm:$0xff] }
 0x4bf   : > { %2797 = vmatprep.subr.mxu0 %v969_v13  ;;  %2906 = vmatpush1.msra.mxu1 %v790_v14  ;;  %v1018_v12 = vld [vmem:[#allocation14 + $0xa60] sm:$0xff]  ;;  %v1199_v13 = vld [vmem:[#allocation14 + $0x1008] sm:$0xff] }
 0x4c0   : > { %2798 = vmatpush2.msra.mxu0 %v968_v15  ;;  %2907 = vmatprep.subr.mxu1 %v779_v16  ;;  %v1007_v14 = vld [vmem:[#allocation14 + $0xa08] sm:$0xff]  ;;  %v1198_v15 = vld [vmem:[#allocation14 + $0x1000] sm:$0xff] }
 0x4c1   : > { %2799 = vmatprep.subr.mxu0 %v957_v17  ;;  %2908 = vmatpush1.msra.mxu1 %v778_v19  ;;  %v1006_v16 = vld [vmem:[#allocation14 + $0xa00] sm:$0xff]  ;;  %v1187_v17 = vld [vmem:[#allocation14 + $0xfa8] sm:$0xff] }
 0x4c2   : > { %2800 = vmatpush2.msra.mxu0 %v956_v21  ;;  %2909 = vmatprep.subr.mxu1 %v767_v20  ;;  %v995_v19 = vld [vmem:[#allocation14 + $0x9a8] sm:$0xff]  ;;  %v1186_v21 = vld [vmem:[#allocation14 + $0xfa0] sm:$0xff] }
 0x4c3   : > { %2801 = vmatprep.subr.mxu0 %v945_v55  ;;  %2910 = vmatpush1.msra.mxu1 %v766_v22  ;;  %v994_v20 = vld [vmem:[#allocation14 + $0x9a0] sm:$0xff]  ;;  %v1175_v55 = vld [vmem:[#allocation14 + $0xf48] sm:$0xff] }
 0x4c4   : > { %2802 = vmatpush2.msra.mxu0 %v944_v54  ;;  %2911 = vmatprep.subr.mxu1 %v755_v56  ;;  %v983_v22 = vld [vmem:[#allocation14 + $0x948] sm:$0xff]  ;;  %v1174_v54 = vld [vmem:[#allocation14 + $0xf40] sm:$0xff] }
 0x4c5   : > { %2803 = vmatprep.subr.mxu0 %v933_v18  ;;  %2912 = vmatpush1.msra.mxu1 %v754_v23  ;;  %v982_v56 = vld [vmem:[#allocation14 + $0x940] sm:$0xff]  ;;  %v1163_v18 = vld [vmem:[#allocation14 + $0xee8] sm:$0xff] }
 0x4c6   : > { %2804 = vmatpush2.msra.mxu0 %v932_v30  ;;  %2913 = vmatprep.subr.mxu1 %v743_v31  ;;  %v971_v23 = vld [vmem:[#allocation14 + $0x8e8] sm:$0xff]  ;;  %v1162_v30 = vld [vmem:[#allocation14 + $0xee0] sm:$0xff] }
 0x4c7   : > { %2805 = vmatprep.subr.mxu0 %v921_v32  ;;  %2914 = vmatpush1.msra.mxu1 %v742_v33  ;;  %v970_v31 = vld [vmem:[#allocation14 + $0x8e0] sm:$0xff]  ;;  %v1151_v32 = vld [vmem:[#allocation14 + $0xe88] sm:$0xff] }
 0x4c8   : > { %2806 = vmatpush2.msra.mxu0 %v920_v34  ;;  %2915 = vmatprep.subr.mxu1 %v731_v1  ;;  %v959_v33 = vld [vmem:[#allocation14 + $0x888] sm:$0xff]  ;;  %v1150_v34 = vld [vmem:[#allocation14 + $0xe80] sm:$0xff] }
 0x4c9   : > { %2807 = vmatprep.subr.mxu0 %v909_v35  ;;  %2916 = vmatpush1.msra.mxu1 %v730_v0  ;;  %v958_v1 = vld [vmem:[#allocation14 + $0x880] sm:$0xff]  ;;  %v1139_v35 = vld [vmem:[#allocation14 + $0xe28] sm:$0xff] }
 0x4ca   : > { %2808 = vmatpush2.msra.mxu0 %v908_v36  ;;  %2917 = vmatprep.subr.mxu1 %v719_v2  ;;  %v947_v0 = vld [vmem:[#allocation14 + $0x828] sm:$0xff]  ;;  %v1138_v36 = vld [vmem:[#allocation14 + $0xe20] sm:$0xff] }
 0x4cb   : > { %2809 = vmatprep.subr.mxu0 %v897_v37  ;;  %2918 = vmatpush1.msra.mxu1 %v718_v38  ;;  %v946_v2 = vld [vmem:[#allocation14 + $0x820] sm:$0xff]  ;;  %v1127_v37 = vld [vmem:[#allocation14 + $0xdc8] sm:$0xff] }
 0x4cc   : > { %2810 = vmatpush2.msra.mxu0 %v896_v39  ;;  %2919 = vmatprep.subr.mxu1 %v707_v40  ;;  %v935_v38 = vld [vmem:[#allocation14 + $0x7c8] sm:$0xff]  ;;  %v1126_v39 = vld [vmem:[#allocation14 + $0xdc0] sm:$0xff] }
 0x4cd   : > { %2811 = vmatprep.subr.mxu0 %v885_v41  ;;  %2920 = vmatpush1.msra.mxu1 %v706_v42  ;;  %v934_v40 = vld [vmem:[#allocation14 + $0x7c0] sm:$0xff]  ;;  %v1115_v42 = vld [vmem:[#allocation14 + $0xd68] sm:$0xff] }
 0x4ce   : > { %2812 = vmatpush2.msra.mxu0 %v884_v43  ;;  %2921 = vmatprep.subr.mxu1 %v695_v44  ;;  %v5603_v41 = vld [vmem:[#allocation16] sm:$0xff]  ;;  %v923_v43 = vld [vmem:[#allocation14 + $0x768] sm:$0xff] }
 0x4cf   : > { %2814 = vmatmul.mubr.f32.vlgmr.msra.gmra.mxu0 %v5585_v49  ;;  %2922 = vmatpush1.msra.mxu1 %v694_v45  ;;  %v1114_v44 = vld [vmem:[#allocation14 + $0xd60] sm:$0xff] }
 0x4d0   : > { %2962 = vmatprep.subr.mxu0 %v1259_v48  ;;  %2923 = vmatprep.subr.mxu1 %v1067_v50  ;;  %v922_v45 = vld [vmem:[#allocation14 + $0x760] sm:$0xff]  ;;  %v1103_v48 = vld [vmem:[#allocation14 + $0xd08] sm:$0xff] }
 0x4d1   : > { %2963 = vmatpush1.msra.mxu0 %v1258_v26  ;;  %2924 = vmatpush2.msra.mxu1 %v1066_v28  ;;  %v911_v50 = vld [vmem:[#allocation14 + $0x708] sm:$0xff]  ;;  %v2266_v26 = vrot.slane %v5603_v41, %v5506_v62  ;;  %v1102_v28 = vld [vmem:[#allocation14 + $0xd00] sm:$0xff] }
 0x4d2   : > { %2964 = vmatprep.subr.mxu0 %v1247_v24  ;;  %2925 = vmatprep.subr.mxu1 %v1055_v52  ;;  %v910_v24 = vld [vmem:[#allocation14 + $0x700] sm:$0xff]  ;;  %v1091_v52 = vld [vmem:[#allocation14 + $0xca8] sm:$0xff] }
 0x4d3   : > { %2965 = vmatpush1.msra.mxu0 %v1246_v53  ;;  %2926 = vmatpush2.msra.mxu1 %v1054_v57  ;;  %v899_v53 = vld [vmem:[#allocation14 + $0x6a8] sm:$0xff]  ;;  %v1090_v57 = vld [vmem:[#allocation14 + $0xca0] sm:$0xff] }
 0x4d4   : > { %2966 = vmatprep.subr.mxu0 %v1235_v58  ;;  %2927 = vmatprep.subr.mxu1 %v1043_v63  ;;  %v898_v58 = vld [vmem:[#allocation14 + $0x6a0] sm:$0xff] }
 0x4d5   : > { %2967 = vmatpush1.msra.mxu0 %v1234_v3  ;;  %2928 = vmatpush2.msra.mxu1 %v1042_v4  ;;  %v1079_v3 = vld [vmem:[#allocation14 + $0xc48] sm:$0xff] }
 0x4d6   : > { %2968 = vmatprep.subr.mxu0 %v1223_v5  ;;  %2929 = vmatprep.subr.mxu1 %v1031_v6  ;;  %v887_v4 = vld [vmem:[#allocation14 + $0x648] sm:$0xff]  ;;  %v1078_v6 = vld [vmem:[#allocation14 + $0xc40] sm:$0xff] }
 0x4d7   : > { %2969 = vmatpush1.msra.mxu0 %v1222_v7  ;;  %2930 = vmatpush2.msra.mxu1 %v1030_v8  ;;  %v886_v8 = vld [vmem:[#allocation14 + $0x640] sm:$0xff] }
 0x4d8   : > { %2970 = vmatprep.subr.mxu0 %v1211_v9  ;;  %2931 = vmatprep.subr.mxu1 %v1019_v10  ;;  %v877_v10 = vld [vmem:[#allocation14 + $0x5f8] sm:$0xff] }
 0x4d9   : > { %2971 = vmatpush1.msra.mxu0 %v1210_v11  ;;  %2932 = vmatpush2.msra.mxu1 %v1018_v12  ;;  %v876_v11 = vld [vmem:[#allocation14 + $0x5f0] sm:$0xff]  ;;  %v2270_v12 = vrot.slane %v5603_v41, %v5500_v60 }
 0x4da   : > { %2972 = vmatprep.subr.mxu0 %v1199_v13  ;;  %2933 = vmatprep.subr.mxu1 %v1007_v14  ;;  %v1261_v13 = vld [vmem:[#allocation14 + $0x11f8] sm:$0xff] }
 0x4db   : > { %2973 = vmatpush1.msra.mxu0 %v1198_v15  ;;  %2934 = vmatpush2.msra.mxu1 %v1006_v16  ;;  %v865_v14 = vld [vmem:[#allocation14 + $0x598] sm:$0xff]  ;;  %v1260_v16 = vld [vmem:[#allocation14 + $0x11f0] sm:$0xff] }
 0x4dc   : > { %2974 = vmatprep.subr.mxu0 %v1187_v17  ;;  %2935 = vmatprep.subr.mxu1 %v995_v19  ;;  %v864_v17 = vld [vmem:[#allocation14 + $0x590] sm:$0xff]  ;;  %v1249_v19 = vld [vmem:[#allocation14 + $0x1198] sm:$0xff] }
 0x4dd   : > { %2975 = vmatpush1.msra.mxu0 %v1186_v21  ;;  %2936 = vmatpush2.msra.mxu1 %v994_v20  ;;  %v853_v21 = vld [vmem:[#allocation14 + $0x538] sm:$0xff] }
 0x4de   : > { %2976 = vmatprep.subr.mxu0 %v1175_v55  ;;  %2937 = vmatprep.subr.mxu1 %v983_v22  ;;  %v1248_v55 = vld [vmem:[#allocation14 + $0x1190] sm:$0xff] }
 0x4df   : > { %2977 = vmatpush1.msra.mxu0 %v1174_v54  ;;  %2938 = vmatpush2.msra.mxu1 %v982_v56  ;;  %v852_v22 = vld [vmem:[#allocation14 + $0x530] sm:$0xff]  ;;  %v1237_v54 = vld [vmem:[#allocation14 + $0x1138] sm:$0xff] }
 0x4e0   : > { %2978 = vmatprep.subr.mxu0 %v1163_v18  ;;  %2939 = vmatprep.subr.mxu1 %v971_v23  ;;  %v841_v56 = vld [vmem:[#allocation14 + $0x4d8] sm:$0xff]  ;;  %v1236_v18 = vld [vmem:[#allocation14 + $0x1130] sm:$0xff] }
 0x4e1   : > { %2979 = vmatpush1.msra.mxu0 %v1162_v30  ;;  %2940 = vmatpush2.msra.mxu1 %v970_v31  ;;  %v840_v23 = vld [vmem:[#allocation14 + $0x4d0] sm:$0xff]  ;;  %v1225_v31 = vld [vmem:[#allocation14 + $0x10d8] sm:$0xff] }
 0x4e2   : > { %2980 = vmatprep.subr.mxu0 %v1151_v32  ;;  %2941 = vmatprep.subr.mxu1 %v959_v33  ;;  %v1224_v33 = vld [vmem:[#allocation14 + $0x10d0] sm:$0xff] }
 0x4e3   : > { %2981 = vmatpush1.msra.mxu0 %v1150_v34  ;;  %2942 = vmatpush2.msra.mxu1 %v958_v1  ;;  %v828_v34 = vld [vmem:[#allocation14 + $0x470] sm:$0xff]  ;;  %v1213_v1 = vld [vmem:[#allocation14 + $0x1078] sm:$0xff] }
 0x4e4   : > { %2982 = vmatprep.subr.mxu0 %v1139_v35  ;;  %2943 = vmatprep.subr.mxu1 %v947_v0  ;;  %v817_v35 = vld [vmem:[#allocation14 + $0x418] sm:$0xff]  ;;  %v1212_v0 = vld [vmem:[#allocation14 + $0x1070] sm:$0xff] }
 0x4e5   : > { %2983 = vmatpush1.msra.mxu0 %v1138_v36  ;;  %2944 = vmatpush2.msra.mxu1 %v946_v2  ;;  %v816_v36 = vld [vmem:[#allocation14 + $0x410] sm:$0xff]  ;;  %v1201_v2 = vld [vmem:[#allocation14 + $0x1018] sm:$0xff] }
 0x4e6   : > { %2984 = vmatprep.subr.mxu0 %v1127_v37  ;;  %2945 = vmatprep.subr.mxu1 %v935_v38  ;;  %v805_v37 = vld [vmem:[#allocation14 + $0x3b8] sm:$0xff] }
 0x4e7   : > { %2985 = vmatpush1.msra.mxu0 %v1126_v39  ;;  %2946 = vmatpush2.msra.mxu1 %v934_v40  ;;  %v1200_v39 = vld [vmem:[#allocation14 + $0x1010] sm:$0xff] }
 0x4e8   : > { %2986 = vmatprep.subr.mxu0 %v1115_v42  ;;  %2947 = vmatprep.subr.mxu1 %v923_v43  ;;  %v804_v40 = vld [vmem:[#allocation14 + $0x3b0] sm:$0xff]  ;;  %v1189_v42 = vld [vmem:[#allocation14 + $0xfb8] sm:$0xff] }
 0x4e9   : > { %2987 = vmatpush1.msra.mxu0 %v1114_v44  ;;  %2948 = vmatpush2.msra.mxu1 %v922_v45  ;;  %v2460_v7 = vpop.f32.mrf.mxu0  ;;  %v793_v43 = vld [vmem:[#allocation14 + $0x358] sm:$0xff]  ;;  %v1188_v44 = vld [vmem:[#allocation14 + $0xfb0] sm:$0xff] }
 0x4ea   : > { %2988 = vmatprep.subr.mxu0 %v1103_v48  ;;  %2949 = vmatprep.subr.mxu1 %v911_v50  ;;  %v2389_v63 = vpop.f32.mrf.mxu1  ;;  %v792_v45 = vld [vmem:[#allocation14 + $0x350] sm:$0xff]  ;;  %v1177_v48 = vld [vmem:[#allocation14 + $0xf58] sm:$0xff] }
 0x4eb   : > { %2989 = vmatpush1.msra.mxu0 %v1102_v28  ;;  %2950 = vmatpush2.msra.mxu1 %v910_v24  ;;  %v2390_v5 = vadd.f32 %v2389_v63, %v2266_v26  ;;  %v2462_v30 = vpop.f32.mrf.mxu0  ;;  %v781_v50 = vld [vmem:[#allocation14 + $0x2f8] sm:$0xff]  ;;  %v1176_v26 = vld [vmem:[#allocation14 + $0xf50] sm:$0xff] }
 0x4ec   : > { %2990 = vmatprep.subr.mxu0 %v1091_v52  ;;  %2951 = vmatprep.subr.mxu1 %v899_v53  ;;  %v2391_v15 = vpop.f32.mrf.mxu1  ;;  %v780_v28 = vld [vmem:[#allocation14 + $0x2f0] sm:$0xff]  ;;  %v1165_v24 = vld [vmem:[#allocation14 + $0xef8] sm:$0xff] }
 0x4ed   : > { %2991 = vmatpush1.msra.mxu0 %v1090_v57  ;;  %2952 = vmatpush2.msra.mxu1 %v898_v58  ;;  %v5607_v9 = vadd.f32 %v2460_v7, %v2390_v5  ;;  %v2392_v20 = vadd.f32 %v2391_v15, %v2270_v12  ;;  %v769_v52 = vld [vmem:[#allocation14 + $0x298] sm:$0xff]  ;;  %v1164_v53 = vld [vmem:[#allocation14 + $0xef0] sm:$0xff] }
 0x4ee   : > { %2992 = vmatprep.subr.mxu0 %v1079_v3  ;;  %2953 = vmatprep.subr.mxu1 %v887_v4  ;;  %v768_v57 = vld [vmem:[#allocation14 + $0x290] sm:$0xff]  ;;  %v1153_v58 = vld [vmem:[#allocation14 + $0xe98] sm:$0xff] }
 0x4ef   : > { %2993 = vmatpush1.msra.mxu0 %v1078_v6  ;;  %3026 = vmatprep.mubr.f32.mxu0 %v5183_v51  ;;  %v5615_v32 = vadd.f32 %v2462_v30, %v2392_v20  ;;  %v757_v63 = vld [vmem:[#allocation14 + $0x238] sm:$0xff]  ;;  %v1152_v3 = vld [vmem:[#allocation14 + $0xe90] sm:$0xff] }
 0x4f0   : > { %2954 = vmatpush2.msra.mxu1 %v886_v8  ;;  %3027 = vmatmul.mubr.f32.vlgmr.msra.gmra.mxu0 %v5583_v47  ;;  %v756_v4 = vld [vmem:[#allocation14 + $0x230] sm:$0xff]  ;;  %v1141_v5 = vld [vmem:[#allocation14 + $0xe38] sm:$0xff] }
 0x4f1   : > { %3033 = vmatprep.subr.mxu0 %v877_v10  ;;  %2956 = vmatmul.mubr.f32.vlgmr.msra.gmra.mxu1 %v5585_v49  ;;  %v3188_v38 = vmul.f32 0.70710677, %v5615_v32  ;;  %v745_v6 = vld [vmem:[#allocation14 + $0x1d8] sm:$0xff]  ;;  %v1140_v7 = vld [vmem:[#allocation14 + $0xe30] sm:$0xff] }
 0x4f2   : > { %3034 = vmatpush1.msra.mxu0 %v876_v11  ;;  %3097 = vmatprep.mubr.f32.mxu0 %v5581_v46  ;;  %v829_v46 = vld [vmem:[#allocation14 + $0x478] sm:$0xff]  ;;  %v744_v8 = vld [vmem:[#allocation14 + $0x1d0] sm:$0xff] }
 0x4f3   : > { %3104 = vmatprep.subr.mxu1 %v1261_v13  ;;  %3035 = vmatprep.subr.mxu0 %v865_v14  ;;  %4769 = verf.f32 %v3188_v38  ;;  %v1129_v10 = vld [vmem:[#allocation14 + $0xdd8] sm:$0xff]  ;;  %v1128_v12 = vld [vmem:[#allocation14 + $0xdd0] sm:$0xff]  ;;  %v1305_v38 = vld [vmem:[#allocation17 + $0x158] sm:$0xff] }
 0x4f4   : > { %3105 = vmatpush1.msra.mxu1 %v1260_v16  ;;  %3036 = vmatpush1.msra.mxu0 %v864_v17  ;;  %v733_v11 = vld [vmem:[#allocation14 + $0x178] sm:$0xff]  ;;  %v732_v13 = vld [vmem:[#allocation14 + $0x170] sm:$0xff] }
 0x4f5   : > { %3106 = vmatprep.subr.mxu1 %v1249_v19  ;;  %3037 = vmatprep.subr.mxu0 %v853_v21  ;;  %v1117_v14 = vld [vmem:[#allocation14 + $0xd78] sm:$0xff]  ;;  %v1116_v16 = vld [vmem:[#allocation14 + $0xd70] sm:$0xff] }
 0x4f6   : > { %3107 = vmatpush1.msra.mxu1 %v1248_v55  ;;  %3038 = vmatpush1.msra.mxu0 %v852_v22  ;;  %v721_v15 = vld [vmem:[#allocation14 + $0x118] sm:$0xff]  ;;  %v720_v17 = vld [vmem:[#allocation14 + $0x110] sm:$0xff] }
 0x4f7   : > { %3108 = vmatprep.subr.mxu1 %v1237_v54  ;;  %3039 = vmatprep.subr.mxu0 %v841_v56  ;;  %v1105_v19 = vld [vmem:[#allocation14 + $0xd18] sm:$0xff]  ;;  %v1104_v20 = vld [vmem:[#allocation14 + $0xd10] sm:$0xff] }
 0x4f8   : > { %3109 = vmatpush1.msra.mxu1 %v1236_v18  ;;  %3040 = vmatpush1.msra.mxu0 %v840_v23  ;;  %v709_v21 = vld [vmem:[#allocation14 + $0xb8] sm:$0xff]  ;;  %v708_v55 = vld [vmem:[#allocation14 + $0xb0] sm:$0xff] }
 0x4f9   : > { %3110 = vmatprep.subr.mxu1 %v1225_v31  ;;  %3041 = vmatprep.subr.mxu0 %v829_v46  ;;  %v1093_v54 = vld [vmem:[#allocation14 + $0xcb8] sm:$0xff]  ;;  %v1092_v18 = vld [vmem:[#allocation14 + $0xcb0] sm:$0xff] }
 0x4fa   : > { %3111 = vmatpush1.msra.mxu1 %v1224_v33  ;;  %3042 = vmatpush1.msra.mxu0 %v828_v34  ;;  %v697_v56 = vld [vmem:[#allocation14 + $0x58] sm:$0xff]  ;;  %v696_v23 = vld [vmem:[#allocation14 + $0x50] sm:$0xff] }
 0x4fb   : > { %3112 = vmatprep.subr.mxu1 %v1213_v1  ;;  %3043 = vmatprep.subr.mxu0 %v817_v35  ;;  %v1081_v30 = vld [vmem:[#allocation14 + $0xc58] sm:$0xff]  ;;  %v1080_v46 = vld [vmem:[#allocation14 + $0xc50] sm:$0xff]  ;;  %v3176_v1 = vmul.f32 0.5, %v5615_v32 }
 0x4fc   : > { %3113 = vmatpush1.msra.mxu1 %v1212_v0  ;;  %3044 = vmatpush1.msra.mxu0 %v816_v36  ;;  %v1069_v31 = vld [vmem:[#allocation14 + $0xbf8] sm:$0xff]  ;;  %v1068_v34 = vld [vmem:[#allocation14 + $0xbf0] sm:$0xff] }
 0x4fd   : > { %3114 = vmatprep.subr.mxu1 %v1201_v2  ;;  %3045 = vmatprep.subr.mxu0 %v805_v37  ;;  %v1308_v35 = vld [vmem:[#allocation17 + $0x170] sm:$0xff]  ;;  %v1307_v36 = vld [vmem:[#allocation17 + $0x168] sm:$0xff] }
 0x4fe   : > { %3115 = vmatpush1.msra.mxu1 %v1200_v39  ;;  %3046 = vmatpush1.msra.mxu0 %v804_v40  ;;  %v1057_v0 = vld [vmem:[#allocation14 + $0xb98] sm:$0xff]  ;;  %v1056_v37 = vld [vmem:[#allocation14 + $0xb90] sm:$0xff] }
 0x4ff   : > { %3116 = vmatprep.subr.mxu1 %v1189_v42  ;;  %3047 = vmatprep.subr.mxu0 %v793_v43  ;;  %v1045_v39 = vld [vmem:[#allocation14 + $0xb38] sm:$0xff]  ;;  %v1044_v32 = vld [vmem:[#allocation14 + $0xb30] sm:$0xff]  ;;  %v1301_v43 = vld [vmem:[#allocation17 + $0x138] sm:$0xff] }
 0x500   : > { %3117 = vmatpush1.msra.mxu1 %v1188_v44  ;;  %3048 = vmatpush1.msra.mxu0 %v792_v45  ;;  %v4770_v22 = vpop.eup %4769  ;;  %v1304_v40 = vld [vmem:[#allocation17 + $0x150] sm:$0xff]  ;;  %v1302_v42 = vld [vmem:[#allocation17 + $0x140] sm:$0xff]  ;;  %v1299_v44 = vld [vmem:[#allocation17 + $0x128] sm:$0xff] }
 0x501   : > { %3118 = vmatprep.subr.mxu1 %v1177_v48  ;;  %3049 = vmatprep.subr.mxu0 %v781_v50  ;;  %v3212_v33 = vadd.f32 1.0, %v4770_v22  ;;  %v1021_v45 = vld [vmem:[#allocation14 + $0xa78] sm:$0xff]  ;;  %v1298_v48 = vld [vmem:[#allocation17 + $0x120] sm:$0xff]  ;;  %v1277_v22 = vld [vmem:[#allocation17 + $0x78] sm:$0xff] }
 0x502   : > { %3119 = vmatpush1.msra.mxu1 %v1176_v26  ;;  %3050 = vmatpush1.msra.mxu0 %v780_v28  ;;  %v1020_v50 = vld [vmem:[#allocation14 + $0xa70] sm:$0xff]  ;;  %v1296_v26 = vld [vmem:[#allocation17 + $0x110] sm:$0xff] }
 0x503   : > { %3120 = vmatprep.subr.mxu1 %v1165_v24  ;;  %3051 = vmatprep.subr.mxu0 %v769_v52  ;;  %v5621_v2 = vmul.f32 %v3212_v33, %v3176_v1  ;;  %v1009_v28 = vld [vmem:[#allocation14 + $0xa18] sm:$0xff]  ;;  %v1008_v52 = vld [vmem:[#allocation14 + $0xa10] sm:$0xff] }
 0x504   : > { %3121 = vmatpush1.msra.mxu1 %v1164_v53  ;;  %3052 = vmatpush1.msra.mxu0 %v768_v57  ;;  %v1295_v24 = vld [vmem:[#allocation17 + $0x108] sm:$0xff]  ;;  %v1293_v53 = vld [vmem:[#allocation17 + $0xf8] sm:$0xff] }
 0x505   : > { %3122 = vmatprep.subr.mxu1 %v1153_v58  ;;  %3053 = vmatprep.subr.mxu0 %v757_v63  ;;  %v997_v57 = vld [vmem:[#allocation14 + $0x9b8] sm:$0xff]  ;;  %v996_v63 = vld [vmem:[#allocation14 + $0x9b0] sm:$0xff] }
 0x506   : > { %3123 = vmatpush1.msra.mxu1 %v1152_v3  ;;  %3054 = vmatpush1.msra.mxu0 %v756_v4  ;;  %v1292_v58 = vld [vmem:[#allocation17 + $0xf0] sm:$0xff]  ;;  %v1290_v3 = vld [vmem:[#allocation17 + $0xe0] sm:$0xff] }
 0x507   : > { %3124 = vmatprep.subr.mxu1 %v1141_v5  ;;  %3055 = vmatprep.subr.mxu0 %v745_v6  ;;  %v985_v4 = vld [vmem:[#allocation14 + $0x958] sm:$0xff]  ;;  %v1289_v5 = vld [vmem:[#allocation17 + $0xd8] sm:$0xff]  ;;  %v984_v6 = vld [vmem:[#allocation14 + $0x950] sm:$0xff] }
 0x508   : > { %3125 = vmatpush1.msra.mxu1 %v1140_v7  ;;  %3056 = vmatpush1.msra.mxu0 %v744_v8  ;;  %v1287_v7 = vld [vmem:[#allocation17 + $0xc8] sm:$0xff] }
 0x509   : > { %3126 = vmatprep.subr.mxu1 %v1129_v10  ;;  %3057 = vmatprep.subr.mxu0 %v733_v11  ;;  %v973_v8 = vld [vmem:[#allocation14 + $0x8f8] sm:$0xff]  ;;  %v1286_v10 = vld [vmem:[#allocation17 + $0xc0] sm:$0xff] }
 0x50a   : > { %3127 = vmatpush1.msra.mxu1 %v1128_v12  ;;  %3058 = vmatpush1.msra.mxu0 %v732_v13  ;;  %v972_v11 = vld [vmem:[#allocation14 + $0x8f0] sm:$0xff]  ;;  %v1284_v12 = vld [vmem:[#allocation17 + $0xb0] sm:$0xff] }
 0x50b   : > { %3128 = vmatprep.subr.mxu1 %v1117_v14  ;;  %3059 = vmatprep.subr.mxu0 %v721_v15  ;;  %v961_v13 = vld [vmem:[#allocation14 + $0x898] sm:$0xff]  ;;  %v960_v15 = vld [vmem:[#allocation14 + $0x890] sm:$0xff] }
 0x50c   : > { %3129 = vmatpush1.msra.mxu1 %v1116_v16  ;;  %3060 = vmatpush1.msra.mxu0 %v720_v17  ;;  %v1283_v14 = vld [vmem:[#allocation17 + $0xa8] sm:$0xff]  ;;  %v1281_v16 = vld [vmem:[#allocation17 + $0x98] sm:$0xff] }
 0x50d   : > { %3130 = vmatprep.subr.mxu1 %v1105_v19  ;;  %3061 = vmatprep.subr.mxu0 %v709_v21  ;;  %v949_v17 = vld [vmem:[#allocation14 + $0x838] sm:$0xff]  ;;  %v948_v21 = vld [vmem:[#allocation14 + $0x830] sm:$0xff] }
 0x50e   : > { %3131 = vmatpush1.msra.mxu1 %v1104_v20  ;;  %3062 = vmatpush1.msra.mxu0 %v708_v55  ;;  %v1280_v19 = vld [vmem:[#allocation17 + $0x90] sm:$0xff]  ;;  %v1278_v20 = vld [vmem:[#allocation17 + $0x80] sm:$0xff] }
 0x50f   : > { %3132 = vmatprep.subr.mxu1 %v1093_v54  ;;  %3063 = vmatprep.subr.mxu0 %v697_v56  ;;  %v937_v55 = vld [vmem:[#allocation14 + $0x7d8] sm:$0xff]  ;;  %v2277_v54 = vsub.s32 3, %v5497_v59  ;;  %v936_v56 = vld [vmem:[#allocation14 + $0x7d0] sm:$0xff] }
 0x510   : > { %3133 = vmatpush1.msra.mxu1 %v1092_v18  ;;  %3064 = vmatpush1.msra.mxu0 %v696_v23  ;;  %v1275_v18 = vld [vmem:[#allocation17 + $0x68] sm:$0xff] }
 0x511   : > { %3134 = vmatprep.subr.mxu1 %v1081_v30  ;;  %3065 = vmatprep.subr.mxu0 %v1069_v31  ;;  %v925_v23 = vld [vmem:[#allocation14 + $0x778] sm:$0xff]  ;;  %v1274_v30 = vld [vmem:[#allocation17 + $0x60] sm:$0xff]  ;;  %v2278_v1 = vrot.slane %v5603_v41, %v2277_v54 }
 0x512   : > { %3135 = vmatpush1.msra.mxu1 %v1080_v46  ;;  %3168 = vmatprep.mubr.f32.mxu1 %v5183_v51  ;;  %v1033_v51 = vld [vmem:[#allocation14 + $0xad8] sm:$0xff]  ;;  %v924_v31 = vld [vmem:[#allocation14 + $0x770] sm:$0xff] }
 0x513   : > { %3066 = vmatpush2.msra.mxu0 %v1068_v34  ;;  %3169 = vmatmul.mubr.f32.vlgmr.msra.gmra.mxu1 %v5583_v47  ;;  %v1032_v47 = vld [vmem:[#allocation14 + $0xad0] sm:$0xff]  ;;  %v1272_v46 = vld [vmem:[#allocation17 + $0x50] sm:$0xff] }
 0x514   : > { %3251 = vmatprep.subr.mxu1 %v1308_v35  ;;  %3067 = vmatprep.subr.mxu0 %v1057_v0  ;;  %v913_v33 = vld [vmem:[#allocation14 + $0x718] sm:$0xff]  ;;  %v5628_v35 = vpop.f32.mrf.mxu1  ;;  %v912_v0 = vld [vmem:[#allocation14 + $0x710] sm:$0xff] }
 0x515   : > { %3252 = vmatpush1.msra.mxu1 %v1307_v36  ;;  %3315 = vmatprep.mubr.f32.mxu1 %v5621_v2  ;;  %v1271_v34 = vld [vmem:[#allocation17 + $0x48] sm:$0xff]  ;;  %v1269_v36 = vld [vmem:[#allocation17 + $0x38] sm:$0xff] }
 0x516   : > { %3068 = vmatpush2.msra.mxu0 %v1056_v37  ;;  %3253 = vmatprep.subr.mxu1 %v1305_v38  ;;  %v901_v38 = vld [vmem:[#allocation14 + $0x6b8] sm:$0xff] }
 0x517   : > { %3069 = vmatprep.subr.mxu0 %v1045_v39  ;;  %3254 = vmatpush1.msra.mxu1 %v1304_v40  ;;  %v1268_v39 = vld [vmem:[#allocation17 + $0x30] sm:$0xff]  ;;  %v900_v40 = vld [vmem:[#allocation14 + $0x6b0] sm:$0xff] }
 0x518   : > { %3070 = vmatpush2.msra.mxu0 %v1044_v32  ;;  %3255 = vmatprep.subr.mxu1 %v1302_v42  ;;  %v1266_v32 = vld [vmem:[#allocation17 + $0x20] sm:$0xff] }
 0x519   : > { %3071 = vmatprep.subr.mxu0 %v1033_v51  ;;  %3256 = vmatpush1.msra.mxu1 %v1301_v43  ;;  %v889_v51 = vld [vmem:[#allocation14 + $0x658] sm:$0xff]  ;;  %v1265_v43 = vld [vmem:[#allocation17 + $0x18] sm:$0xff] }
 0x51a   : > { %3072 = vmatpush2.msra.mxu0 %v1032_v47  ;;  %3257 = vmatprep.subr.mxu1 %v1299_v44  ;;  %v2604_v44 = vpop.f32.mrf.mxu1 }
 0x51b   : > { %3073 = vmatprep.subr.mxu0 %v1021_v45  ;;  %3258 = vmatpush1.msra.mxu1 %v1298_v48  ;;  %v888_v45 = vld [vmem:[#allocation14 + $0x650] sm:$0xff] }
 0x51c   : > { %3074 = vmatpush2.msra.mxu0 %v1020_v50  ;;  %3259 = vmatprep.subr.mxu1 %v1296_v26  ;;  %v1263_v48 = vld [vmem:[#allocation17 + $0x8] sm:$0xff]  ;;  %v1262_v50 = vld [vmem:[#allocation17] sm:$0xff] }
 0x51d   : > { %3075 = vmatprep.subr.mxu0 %v1009_v28  ;;  %3260 = vmatpush1.msra.mxu1 %v1295_v24  ;;  %v1404_v28 = vld [vmem:[#allocation17 + $0x470] sm:$0xff] }
 0x51e   : > { %3076 = vmatpush2.msra.mxu0 %v1008_v52  ;;  %3261 = vmatprep.subr.mxu1 %v1293_v53  ;;  %v1356_v24 = vld [vmem:[#allocation17 + $0x2f0] sm:$0xff]  ;;  %v1403_v52 = vld [vmem:[#allocation17 + $0x468] sm:$0xff] }
 0x51f   : > { %3077 = vmatprep.subr.mxu0 %v997_v57  ;;  %3262 = vmatpush1.msra.mxu1 %v1292_v58  ;;  %v1355_v53 = vld [vmem:[#allocation17 + $0x2e8] sm:$0xff]  ;;  %v1401_v58 = vld [vmem:[#allocation17 + $0x458] sm:$0xff] }
 0x520   : > { %3078 = vmatpush2.msra.mxu0 %v996_v63  ;;  %3263 = vmatprep.subr.mxu1 %v1290_v3  ;;  %v1353_v63 = vld [vmem:[#allocation17 + $0x2d8] sm:$0xff]  ;;  %v1400_v3 = vld [vmem:[#allocation17 + $0x450] sm:$0xff] }
 0x521   : > { %3079 = vmatprep.subr.mxu0 %v985_v4  ;;  %3264 = vmatpush1.msra.mxu1 %v1289_v5  ;;  %v1352_v4 = vld [vmem:[#allocation17 + $0x2d0] sm:$0xff]  ;;  %v1398_v5 = vld [vmem:[#allocation17 + $0x440] sm:$0xff] }
 0x522   : > { %3080 = vmatpush2.msra.mxu0 %v984_v6  ;;  %3265 = vmatprep.subr.mxu1 %v1287_v7  ;;  %v1350_v6 = vld [vmem:[#allocation17 + $0x2c0] sm:$0xff]  ;;  %v1397_v7 = vld [vmem:[#allocation17 + $0x438] sm:$0xff] }
 0x523   : > { %3081 = vmatprep.subr.mxu0 %v973_v8  ;;  %3266 = vmatpush1.msra.mxu1 %v1286_v10  ;;  %v1349_v8 = vld [vmem:[#allocation17 + $0x2b8] sm:$0xff]  ;;  %v1347_v10 = vld [vmem:[#allocation17 + $0x2a8] sm:$0xff] }
 0x524   : > { %3082 = vmatpush2.msra.mxu0 %v972_v11  ;;  %3267 = vmatprep.subr.mxu1 %v1284_v12  ;;  %v1394_v11 = vld [vmem:[#allocation17 + $0x420] sm:$0xff] }
 0x525   : > { %3083 = vmatprep.subr.mxu0 %v961_v13  ;;  %3268 = vmatpush1.msra.mxu1 %v1283_v14  ;;  %v1346_v12 = vld [vmem:[#allocation17 + $0x2a0] sm:$0xff]  ;;  %v1392_v13 = vld [vmem:[#allocation17 + $0x410] sm:$0xff] }
 0x526   : > { %3084 = vmatpush2.msra.mxu0 %v960_v15  ;;  %3269 = vmatprep.subr.mxu1 %v1281_v16  ;;  %v1344_v14 = vld [vmem:[#allocation17 + $0x290] sm:$0xff]  ;;  %v1391_v15 = vld [vmem:[#allocation17 + $0x408] sm:$0xff] }
 0x527   : > { %3085 = vmatprep.subr.mxu0 %v949_v17  ;;  %3270 = vmatpush1.msra.mxu1 %v1280_v19  ;;  %v1343_v16 = vld [vmem:[#allocation17 + $0x288] sm:$0xff]  ;;  %v3187_v17 = vmul.f32 0.70710677, %v5607_v9  ;;  %v1389_v19 = vld [vmem:[#allocation17 + $0x3f8] sm:$0xff] }
 0x528   : > { %3086 = vmatpush2.msra.mxu0 %v948_v21  ;;  %3271 = vmatprep.subr.mxu1 %v1278_v20  ;;  %v1341_v21 = vld [vmem:[#allocation17 + $0x278] sm:$0xff]  ;;  %v1388_v20 = vld [vmem:[#allocation17 + $0x3f0] sm:$0xff] }
 0x529   : > { %3087 = vmatprep.subr.mxu0 %v937_v55  ;;  %3272 = vmatpush1.msra.mxu1 %v1277_v22  ;;  %v1340_v55 = vld [vmem:[#allocation17 + $0x270] sm:$0xff]  ;;  %v1386_v22 = vld [vmem:[#allocation17 + $0x3e0] sm:$0xff] }
 0x52a   : > { %3088 = vmatpush2.msra.mxu0 %v936_v56  ;;  %3273 = vmatprep.subr.mxu1 %v1275_v18  ;;  %v1338_v56 = vld [vmem:[#allocation17 + $0x260] sm:$0xff]  ;;  %v1385_v18 = vld [vmem:[#allocation17 + $0x3d8] sm:$0xff] }
 0x52b   : > { %3089 = vmatprep.subr.mxu0 %v925_v23  ;;  %3274 = vmatpush1.msra.mxu1 %v1274_v30  ;;  %v5630_v37 = vpop.f32.mrf.mxu0  ;;  %v1337_v23 = vld [vmem:[#allocation17 + $0x258] sm:$0xff]  ;;  %v1383_v30 = vld [vmem:[#allocation17 + $0x3c8] sm:$0xff] }
 0x52c   : > { %3090 = vmatpush2.msra.mxu0 %v924_v31  ;;  %3275 = vmatprep.subr.mxu1 %v1272_v46  ;;  %v1335_v31 = vld [vmem:[#allocation17 + $0x248] sm:$0xff]  ;;  %v1382_v46 = vld [vmem:[#allocation17 + $0x3c0] sm:$0xff] }
 0x52d   : > { %3091 = vmatprep.subr.mxu0 %v913_v33  ;;  %3276 = vmatpush1.msra.mxu1 %v1271_v34  ;;  %v2533_v42 = vpop.f32.mrf.mxu0  ;;  %v1334_v33 = vld [vmem:[#allocation17 + $0x240] sm:$0xff]  ;;  %v1380_v34 = vld [vmem:[#allocation17 + $0x3b0] sm:$0xff] }
 0x52e   : > { %3092 = vmatpush2.msra.mxu0 %v912_v0  ;;  %3277 = vmatprep.subr.mxu1 %v1269_v36  ;;  %v2534_v47 = vadd.f32 %v2533_v42, %v2278_v1  ;;  %v1332_v1 = vld [vmem:[#allocation17 + $0x230] sm:$0xff]  ;;  %v1379_v0 = vld [vmem:[#allocation17 + $0x3a8] sm:$0xff] }
 0x52f   : > { %3093 = vmatprep.subr.mxu0 %v901_v38  ;;  %3278 = vmatpush1.msra.mxu1 %v1268_v39  ;;  %v1331_v36 = vld [vmem:[#allocation17 + $0x228] sm:$0xff]  ;;  %v1377_v38 = vld [vmem:[#allocation17 + $0x398] sm:$0xff]  ;;  %v1328_v42 = vld [vmem:[#allocation17 + $0x210] sm:$0xff] }
 0x530   : > { %3094 = vmatpush2.msra.mxu0 %v900_v40  ;;  %3279 = vmatprep.subr.mxu1 %v1266_v32  ;;  %v5632_v26 = vadd.f32 %v2604_v44, %v2534_v47  ;;  %v1329_v39 = vld [vmem:[#allocation17 + $0x218] sm:$0xff]  ;;  %v1376_v32 = vld [vmem:[#allocation17 + $0x390] sm:$0xff] }
 0x531   : > { %3095 = vmatprep.subr.mxu0 %v889_v51  ;;  %3280 = vmatpush1.msra.mxu1 %v1265_v43  ;;  %v1374_v51 = vld [vmem:[#allocation17 + $0x380] sm:$0xff]  ;;  %v1373_v47 = vld [vmem:[#allocation17 + $0x378] sm:$0xff] }
 0x532   : > { %3096 = vmatpush2.msra.mxu0 %v888_v45  ;;  %3281 = vmatprep.subr.mxu1 %v1263_v48  ;;  %v3190_v57 = vmul.f32 0.70710677, %v5632_v26  ;;  %v1326_v43 = vld [vmem:[#allocation17 + $0x200] sm:$0xff]  ;;  %v1325_v44 = vld [vmem:[#allocation17 + $0x1f8] sm:$0xff]  ;;  %v1371_v45 = vld [vmem:[#allocation17 + $0x368] sm:$0xff] }
 0x533   : > { %3098 = vmatmul.mubr.f32.vlgmr.msra.gmra.mxu0 %v5585_v49  ;;  %3282 = vmatpush1.msra.mxu1 %v1262_v50  ;;  %v1395_v49 = vld [vmem:[#allocation17 + $0x428] sm:$0xff] }
 0x534   : > { %3322 = vmatprep.subr.mxu0 %v1404_v28  ;;  %3283 = vmatprep.subr.mxu1 %v1356_v24  ;;  %4771 = verf.f32 %v3190_v57  ;;  %v1323_v48 = vld [vmem:[#allocation17 + $0x1e8] sm:$0xff]  ;;  %v1370_v28 = vld [vmem:[#allocation17 + $0x360] sm:$0xff]  ;;  %v1368_v57 = vld [vmem:[#allocation17 + $0x350] sm:$0xff] }
 0x535   : > { %3323 = vmatpush1.msra.mxu0 %v1403_v52  ;;  %3284 = vmatpush2.msra.mxu1 %v1355_v53  ;;  %4773 = verf.f32 %v3187_v17  ;;  %v1322_v24 = vld [vmem:[#allocation17 + $0x1e0] sm:$0xff]  ;;  %v2285_v52 = vsub.s32 5, %v5497_v59  ;;  %v3178_v53 = vmul.f32 0.5, %v5632_v26  ;;  %v1313_v17 = vld [vmem:[#allocation17 + $0x198] sm:$0xff] }
 0x536   : > { %3324 = vmatprep.subr.mxu0 %v1401_v58  ;;  %3285 = vmatprep.subr.mxu1 %v1353_v63  ;;  %v1320_v58 = vld [vmem:[#allocation17 + $0x1d0] sm:$0xff]  ;;  %v1367_v63 = vld [vmem:[#allocation17 + $0x348] sm:$0xff] }
 0x537   : > { %3325 = vmatpush1.msra.mxu0 %v1400_v3  ;;  %3286 = vmatpush2.msra.mxu1 %v1352_v4  ;;  %v1319_v3 = vld [vmem:[#allocation17 + $0x1c8] sm:$0xff]  ;;  %v1365_v4 = vld [vmem:[#allocation17 + $0x338] sm:$0xff]  ;;  %v2286_v26 = vrot.slane %v5603_v41, %v2285_v52 }
 0x538   : > { %3326 = vmatprep.subr.mxu0 %v1398_v5  ;;  %3287 = vmatprep.subr.mxu1 %v1350_v6  ;;  %v1317_v5 = vld [vmem:[#allocation17 + $0x1b8] sm:$0xff]  ;;  %v1487_v52 = vld [vmem:[#allocation17 + $0x708] sm:$0xff] }
 0x539   : > { %3327 = vmatpush1.msra.mxu0 %v1397_v7  ;;  %3288 = vmatpush2.msra.mxu1 %v1349_v8  ;;  %v1364_v8 = vld [vmem:[#allocation17 + $0x330] sm:$0xff] }
 0x53a   : > { %3328 = vmatprep.subr.mxu0 %v1395_v49  ;;  %3289 = vmatprep.subr.mxu1 %v1347_v10  ;;  %v1316_v49 = vld [vmem:[#allocation17 + $0x1b0] sm:$0xff]  ;;  %v1362_v10 = vld [vmem:[#allocation17 + $0x320] sm:$0xff] }
 0x53b   : > { %3329 = vmatpush1.msra.mxu0 %v1394_v11  ;;  %3290 = vmatpush2.msra.mxu1 %v1346_v12 }
 0x53c   : > { %3330 = vmatprep.subr.mxu0 %v1392_v13  ;;  %3291 = vmatprep.subr.mxu1 %v1344_v14  ;;  %v1314_v13 = vld [vmem:[#allocation17 + $0x1a0] sm:$0xff]  ;;  %v1361_v14 = vld [vmem:[#allocation17 + $0x318] sm:$0xff] }
 0x53d   : > { %3331 = vmatpush1.msra.mxu0 %v1391_v15  ;;  %3292 = vmatpush2.msra.mxu1 %v1343_v16  ;;  %v2274_v16 = vrot.slane %v5603_v41, %v5503_v61  ;;  %v1451_v41 = vld [vmem:[#allocation17 + $0x5e8] sm:$0xff] }
 0x53e   : > { %3332 = vmatprep.subr.mxu0 %v1389_v19  ;;  %3293 = vmatprep.subr.mxu1 %v1341_v21  ;;  %v1359_v19 = vld [vmem:[#allocation17 + $0x308] sm:$0xff] }
 0x53f   : > { %3333 = vmatpush1.msra.mxu0 %v1388_v20  ;;  %3294 = vmatpush2.msra.mxu1 %v1340_v55  ;;  %v1311_v20 = vld [vmem:[#allocation17 + $0x188] sm:$0xff]  ;;  %v1358_v55 = vld [vmem:[#allocation17 + $0x300] sm:$0xff] }
 0x540   : > { %3334 = vmatprep.subr.mxu0 %v1386_v22  ;;  %3295 = vmatprep.subr.mxu1 %v1338_v56  ;;  %v3175_v56 = vmul.f32 0.5, %v5607_v9  ;;  %v1499_v9 = vld [vmem:[#allocation17 + $0x768] sm:$0xff] }
 0x541   : > { %3335 = vmatpush1.msra.mxu0 %v1385_v18  ;;  %3296 = vmatpush2.msra.mxu1 %v1337_v23  ;;  %v4772_v40 = vpop.eup %4771  ;;  %v1310_v18 = vld [vmem:[#allocation17 + $0x180] sm:$0xff]  ;;  %v1452_v23 = vld [vmem:[#allocation17 + $0x5f0] sm:$0xff] }
 0x542   : > { %3336 = vmatprep.subr.mxu0 %v1383_v30  ;;  %3297 = vmatprep.subr.mxu1 %v1335_v31  ;;  %v3214_v50 = vadd.f32 1.0, %v4772_v40  ;;  %v4774_v7 = vpop.eup %4773  ;;  %v1496_v40 = vld [vmem:[#allocation17 + $0x750] sm:$0xff] }
 0x543   : > { %3337 = vmatpush1.msra.mxu0 %v1382_v46  ;;  %3298 = vmatpush2.msra.mxu1 %v1334_v33  ;;  %v3211_v15 = vadd.f32 1.0, %v4774_v7  ;;  %v2532_v33 = vadd.f32 %v5630_v37, %v2274_v16  ;;  %v1481_v7 = vld [vmem:[#allocation17 + $0x6d8] sm:$0xff]  ;;  %v1475_v16 = vld [vmem:[#allocation17 + $0x6a8] sm:$0xff] }
 0x544   : > { %3338 = vmatprep.subr.mxu0 %v1380_v34  ;;  %3299 = vmatprep.subr.mxu1 %v1332_v1  ;;  %v5639_v6 = vmul.f32 %v3214_v50, %v3178_v53  ;;  %v1500_v34 = vld [vmem:[#allocation17 + $0x770] sm:$0xff]  ;;  %v1449_v1 = vld [vmem:[#allocation17 + $0x5d8] sm:$0xff]  ;;  %v1439_v50 = vld [vmem:[#allocation17 + $0x588] sm:$0xff] }
 0x545   : > { %3339 = vmatpush1.msra.mxu0 %v1379_v0  ;;  %3300 = vmatpush2.msra.mxu1 %v1331_v36  ;;  %v5652_v46 = vmul.f32 %v3211_v15, %v3175_v56  ;;  %v1448_v0 = vld [vmem:[#allocation17 + $0x5d0] sm:$0xff]  ;;  %v5658_v37 = vadd.f32 %v5628_v35, %v2532_v33  ;;  %v1425_v15 = vld [vmem:[#allocation17 + $0x518] sm:$0xff]  ;;  %v1470_v56 = vld [vmem:[#allocation17 + $0x680] sm:$0xff] }
 0x546   : > { %3340 = vmatprep.subr.mxu0 %v1377_v38  ;;  %3301 = vmatprep.subr.mxu1 %v1329_v39  ;;  %v1497_v38 = vld [vmem:[#allocation17 + $0x758] sm:$0xff]  ;;  %v1446_v39 = vld [vmem:[#allocation17 + $0x5c0] sm:$0xff]  ;;  %v1436_v53 = vld [vmem:[#allocation17 + $0x570] sm:$0xff] }
 0x547   : > { %3341 = vmatpush1.msra.mxu0 %v1376_v32  ;;  %3302 = vmatpush2.msra.mxu1 %v1328_v42  ;;  %v1445_v32 = vld [vmem:[#allocation17 + $0x5b8] sm:$0xff]  ;;  %v1494_v42 = vld [vmem:[#allocation17 + $0x740] sm:$0xff]  ;;  %v3189_v35 = vmul.f32 0.70710677, %v5658_v37  ;;  %v1416_v33 = vld [vmem:[#allocation17 + $0x4d0] sm:$0xff] }
 0x548   : > { %3342 = vmatprep.subr.mxu0 %v1374_v51  ;;  %3303 = vmatprep.subr.mxu1 %v1326_v43  ;;  %v1443_v51 = vld [vmem:[#allocation17 + $0x5a8] sm:$0xff]  ;;  %v1493_v43 = vld [vmem:[#allocation17 + $0x738] sm:$0xff] }
 0x549   : > { %3343 = vmatpush1.msra.mxu0 %v1373_v47  ;;  %3304 = vmatpush2.msra.mxu1 %v1325_v44  ;;  %v1442_v47 = vld [vmem:[#allocation17 + $0x5a0] sm:$0xff]  ;;  %v1491_v44 = vld [vmem:[#allocation17 + $0x728] sm:$0xff] }
 0x54a   : > { %3344 = vmatprep.subr.mxu0 %v1371_v45  ;;  %3305 = vmatprep.subr.mxu1 %v1323_v48  ;;  %v1440_v45 = vld [vmem:[#allocation17 + $0x590] sm:$0xff]  ;;  %v1490_v48 = vld [vmem:[#allocation17 + $0x720] sm:$0xff] }
 0x54b   : > { %3345 = vmatpush1.msra.mxu0 %v1370_v28  ;;  %3306 = vmatpush2.msra.mxu1 %v1322_v24  ;;  %v1488_v28 = vld [vmem:[#allocation17 + $0x710] sm:$0xff]  ;;  %v1437_v24 = vld [vmem:[#allocation17 + $0x578] sm:$0xff] }
 0x54c   : > { %3346 = vmatprep.subr.mxu0 %v1368_v57  ;;  %3307 = vmatprep.subr.mxu1 %v1320_v58  ;;  %v5642_v11 = vpop.f32.mrf.mxu0  ;;  %v1485_v57 = vld [vmem:[#allocation17 + $0x6f8] sm:$0xff]  ;;  %v1434_v58 = vld [vmem:[#allocation17 + $0x560] sm:$0xff] }
 0x54d   : > { %3347 = vmatpush1.msra.mxu0 %v1367_v63  ;;  %3308 = vmatpush2.msra.mxu1 %v1319_v3  ;;  %v5644_v12 = vpop.f32.mrf.mxu1  ;;  %v1484_v63 = vld [vmem:[#allocation17 + $0x6f0] sm:$0xff]  ;;  %v1433_v3 = vld [vmem:[#allocation17 + $0x558] sm:$0xff] }
 0x54e   : > { %3348 = vmatprep.subr.mxu0 %v1365_v4  ;;  %3309 = vmatprep.subr.mxu1 %v1317_v5  ;;  %v2746_v30 = vpop.f32.mrf.mxu0  ;;  %v1482_v4 = vld [vmem:[#allocation17 + $0x6e0] sm:$0xff]  ;;  %v1431_v5 = vld [vmem:[#allocation17 + $0x548] sm:$0xff] }
 0x54f   : > { %3349 = vmatpush1.msra.mxu0 %v1364_v8  ;;  %3386 = vmatprep.mubr.f32.mxu0 %v5639_v6  ;;  %v2675_v21 = vpop.f32.mrf.mxu1  ;;  %v1430_v8 = vld [vmem:[#allocation17 + $0x540] sm:$0xff] }
 0x550   : > { %3310 = vmatpush2.msra.mxu1 %v1316_v49  ;;  %3350 = vmatprep.subr.mxu0 %v1362_v10  ;;  %v2676_v22 = vadd.f32 %v2675_v21, %v2286_v26  ;;  %v1479_v26 = vld [vmem:[#allocation17 + $0x6c8] sm:$0xff]  ;;  %v1428_v49 = vld [vmem:[#allocation17 + $0x530] sm:$0xff]  ;;  %v1478_v10 = vld [vmem:[#allocation17 + $0x6c0] sm:$0xff] }
 0x551   : > { %3311 = vmatprep.subr.mxu1 %v1314_v13  ;;  %3351 = vmatpush1.msra.mxu0 %v1361_v14  ;;  %v1427_v13 = vld [vmem:[#allocation17 + $0x528] sm:$0xff]  ;;  %v1476_v14 = vld [vmem:[#allocation17 + $0x6b0] sm:$0xff]  ;;  %v1422_v21 = vld [vmem:[#allocation17 + $0x500] sm:$0xff] }
 0x552   : > { %3312 = vmatpush2.msra.mxu1 %v1313_v17  ;;  %3352 = vmatprep.subr.mxu0 %v1359_v19  ;;  %v5650_v31 = vadd.f32 %v2746_v30, %v2676_v22  ;;  %v1424_v17 = vld [vmem:[#allocation17 + $0x510] sm:$0xff]  ;;  %v1473_v19 = vld [vmem:[#allocation17 + $0x698] sm:$0xff]  ;;  %v1418_v30 = vld [vmem:[#allocation17 + $0x4e0] sm:$0xff] }
 0x553   : > { %3313 = vmatprep.subr.mxu1 %v1311_v20  ;;  %3353 = vmatpush1.msra.mxu0 %v1358_v55  ;;  %v1472_v55 = vld [vmem:[#allocation17 + $0x690] sm:$0xff]  ;;  %v1421_v22 = vld [vmem:[#allocation17 + $0x4f8] sm:$0xff] }
 0x554   : > { %3314 = vmatpush2.msra.mxu1 %v1310_v18  ;;  %3354 = vmatprep.subr.mxu0 %v1452_v23  ;;  %v3192_v36 = vmul.f32 0.70710677, %v5650_v31  ;;  %v1419_v18 = vld [vmem:[#allocation17 + $0x4e8] sm:$0xff]  ;;  %v1469_v23 = vld [vmem:[#allocation17 + $0x678] sm:$0xff] }
 0x555   : > { %3316 = vmatmul.mubr.f32.vlgmr.msra.gmra.mxu1 %v5652_v46  ;;  %3355 = vmatpush2.msra.mxu0 %v1451_v41  ;;  %v1467_v41 = vld [vmem:[#allocation17 + $0x668] sm:$0xff] }
 0x556   : > { %3393 = vmatprep.subr.mxu1 %v1500_v34  ;;  %3356 = vmatprep.subr.mxu0 %v1449_v1  ;;  %4775 = verf.f32 %v3192_v36  ;;  %v1466_v1 = vld [vmem:[#allocation17 + $0x660] sm:$0xff]  ;;  %v1464_v36 = vld [vmem:[#allocation17 + $0x650] sm:$0xff] }
 0x557   : > { %3394 = vmatpush1.msra.mxu1 %v1499_v9  ;;  %3357 = vmatpush2.msra.mxu0 %v1448_v0  ;;  %4777 = verf.f32 %v3189_v35  ;;  %v1415_v9 = vld [vmem:[#allocation17 + $0x4c8] sm:$0xff]  ;;  %v3180_v0 = vmul.f32 0.5, %v5650_v31  ;;  %v1460_v31 = vld [vmem:[#allocation17 + $0x630] sm:$0xff] }
 0x558   : > { %3395 = vmatprep.subr.mxu1 %v1497_v38  ;;  %3358 = vmatprep.subr.mxu0 %v1446_v39  ;;  %v1413_v38 = vld [vmem:[#allocation17 + $0x4b8] sm:$0xff] }
 0x559   : > { %3396 = vmatpush1.msra.mxu1 %v1496_v40  ;;  %3359 = vmatpush2.msra.mxu0 %v1445_v32  ;;  %v2281_v40 = vsub.s32 4, %v5497_v59  ;;  %v1463_v32 = vld [vmem:[#allocation17 + $0x648] sm:$0xff] }
 0x55a   : > { %3397 = vmatprep.subr.mxu1 %v1494_v42  ;;  %3360 = vmatprep.subr.mxu0 %v1443_v51  ;;  %v1412_v42 = vld [vmem:[#allocation17 + $0x4b0] sm:$0xff]  ;;  %v1461_v51 = vld [vmem:[#allocation17 + $0x638] sm:$0xff] }
 0x55b   : > { %3398 = vmatpush1.msra.mxu1 %v1493_v43  ;;  %3361 = vmatpush2.msra.mxu0 %v1442_v47  ;;  %v1410_v43 = vld [vmem:[#allocation17 + $0x4a0] sm:$0xff] }
 0x55c   : > { %3399 = vmatprep.subr.mxu1 %v1491_v44  ;;  %3362 = vmatprep.subr.mxu0 %v1440_v45  ;;  %v1409_v45 = vld [vmem:[#allocation17 + $0x498] sm:$0xff] }
 0x55d   : > { %3400 = vmatpush1.msra.mxu1 %v1490_v48  ;;  %3363 = vmatpush2.msra.mxu0 %v1439_v50  ;;  %v1458_v48 = vld [vmem:[#allocation17 + $0x620] sm:$0xff]  ;;  %v5665_v50 = vld [vmem:[#allocation16] sm:$0xff] }
 0x55e   : > { %3401 = vmatprep.subr.mxu1 %v1488_v28  ;;  %3364 = vmatprep.subr.mxu0 %v1437_v24  ;;  %v2282_v35 = vrot.slane %v5665_v50, %v2281_v40  ;;  %v1407_v28 = vld [vmem:[#allocation17 + $0x488] sm:$0xff]  ;;  %v1457_v24 = vld [vmem:[#allocation17 + $0x618] sm:$0xff]  ;;  %v1526_v40 = vld [vmem:[#allocation17 + $0x840] sm:$0xff] }
 0x55f   : > { %3402 = vmatpush1.msra.mxu1 %v1487_v52  ;;  %3365 = vmatpush2.msra.mxu0 %v1436_v53  ;;  %v3177_v52 = vmul.f32 0.5, %v5658_v37  ;;  %v1406_v53 = vld [vmem:[#allocation17 + $0x480] sm:$0xff]  ;;  %v1547_v37 = vld [vmem:[#allocation17 + $0x8e8] sm:$0xff] }
 0x560   : > { %3403 = vmatprep.subr.mxu1 %v1485_v57  ;;  %3366 = vmatprep.subr.mxu0 %v1434_v58  ;;  %v1455_v57 = vld [vmem:[#allocation17 + $0x608] sm:$0xff]  ;;  %v1454_v58 = vld [vmem:[#allocation17 + $0x600] sm:$0xff] }
 0x561   : > { %3404 = vmatpush1.msra.mxu1 %v1484_v63  ;;  %3367 = vmatpush2.msra.mxu0 %v1433_v3  ;;  %v1596_v3 = vld [vmem:[#allocation17 + $0xa70] sm:$0xff] }
 0x562   : > { %3405 = vmatprep.subr.mxu1 %v1482_v4  ;;  %3368 = vmatprep.subr.mxu0 %v1431_v5  ;;  %v1548_v4 = vld [vmem:[#allocation17 + $0x8f0] sm:$0xff]  ;;  %v2674_v5 = vadd.f32 %v5644_v12, %v2282_v35  ;;  %v1589_v12 = vld [vmem:[#allocation17 + $0xa38] sm:$0xff]  ;;  %v1566_v35 = vld [vmem:[#allocation17 + $0x980] sm:$0xff] }
 0x563   : > { %3406 = vmatpush1.msra.mxu1 %v1481_v7  ;;  %3369 = vmatpush2.msra.mxu0 %v1430_v8  ;;  %v4776_v20 = vpop.eup %4775  ;;  %v1595_v7 = vld [vmem:[#allocation17 + $0xa68] sm:$0xff]  ;;  %v1593_v8 = vld [vmem:[#allocation17 + $0xa58] sm:$0xff] }
 0x564   : > { %3407 = vmatprep.subr.mxu1 %v1479_v26  ;;  %3370 = vmatprep.subr.mxu0 %v1428_v49  ;;  %v3216_v34 = vadd.f32 1.0, %v4776_v20  ;;  %v4778_v39 = vpop.eup %4777  ;;  %v1545_v26 = vld [vmem:[#allocation17 + $0x8d8] sm:$0xff]  ;;  %v1592_v49 = vld [vmem:[#allocation17 + $0xa50] sm:$0xff]  ;;  %v1538_v20 = vld [vmem:[#allocation17 + $0x8a0] sm:$0xff] }
 0x565   : > { %3408 = vmatpush1.msra.mxu1 %v1478_v10  ;;  %3371 = vmatpush2.msra.mxu0 %v1427_v13  ;;  %v3213_v44 = vadd.f32 1.0, %v4778_v39  ;;  %v1544_v10 = vld [vmem:[#allocation17 + $0x8d0] sm:$0xff]  ;;  %v1590_v13 = vld [vmem:[#allocation17 + $0xa40] sm:$0xff] }
 0x566   : > { %3409 = vmatprep.subr.mxu1 %v1476_v14  ;;  %3372 = vmatprep.subr.mxu0 %v1425_v15  ;;  %v5663_v47 = vmul.f32 %v3216_v34, %v3180_v0  ;;  %v1542_v14 = vld [vmem:[#allocation17 + $0x8c0] sm:$0xff]  ;;  %v5675_v15 = vadd.f32 %v5642_v11, %v2674_v5  ;;  %v1583_v11 = vld [vmem:[#allocation17 + $0xa08] sm:$0xff]  ;;  %v1529_v0 = vld [vmem:[#allocation17 + $0x858] sm:$0xff] }
 0x567   : > { %3410 = vmatpush1.msra.mxu1 %v1475_v16  ;;  %3373 = vmatpush2.msra.mxu0 %v1424_v17  ;;  %v5670_v63 = vmul.f32 %v3213_v44, %v3177_v52  ;;  %v1541_v16 = vld [vmem:[#allocation17 + $0x8b8] sm:$0xff]  ;;  %v1587_v17 = vld [vmem:[#allocation17 + $0xa28] sm:$0xff]  ;;  %v1578_v34 = vld [vmem:[#allocation17 + $0x9e0] sm:$0xff] }
 0x568   : > { %3411 = vmatprep.subr.mxu1 %v1473_v19  ;;  %3374 = vmatprep.subr.mxu0 %v1422_v21  ;;  %v1539_v19 = vld [vmem:[#allocation17 + $0x8a8] sm:$0xff]  ;;  %v1586_v21 = vld [vmem:[#allocation17 + $0xa20] sm:$0xff]  ;;  %v1521_v44 = vld [vmem:[#allocation17 + $0x818] sm:$0xff] }
 0x569   : > { %3412 = vmatpush1.msra.mxu1 %v1472_v55  ;;  %3375 = vmatpush2.msra.mxu0 %v1421_v22  ;;  %v1584_v55 = vld [vmem:[#allocation17 + $0xa10] sm:$0xff]  ;;  %v1574_v39 = vld [vmem:[#allocation17 + $0x9c0] sm:$0xff]  ;;  %v1517_v52 = vld [vmem:[#allocation17 + $0x7f8] sm:$0xff] }
 0x56a   : > { %3413 = vmatprep.subr.mxu1 %v1470_v56  ;;  %3376 = vmatprep.subr.mxu0 %v1419_v18  ;;  %v1536_v22 = vld [vmem:[#allocation17 + $0x890] sm:$0xff]  ;;  %v3191_v56 = vmul.f32 0.70710677, %v5675_v15  ;;  %v1535_v18 = vld [vmem:[#allocation17 + $0x888] sm:$0xff] }
 0x56b   : > { %3414 = vmatpush1.msra.mxu1 %v1469_v23  ;;  %3377 = vmatpush2.msra.mxu0 %v1418_v30  ;;  %v1581_v23 = vld [vmem:[#allocation17 + $0x9f8] sm:$0xff]  ;;  %v1560_v5 = vld [vmem:[#allocation17 + $0x950] sm:$0xff] }
 0x56c   : > { %3415 = vmatprep.subr.mxu1 %v1467_v41  ;;  %3378 = vmatprep.subr.mxu0 %v1416_v33  ;;  %v1533_v30 = vld [vmem:[#allocation17 + $0x878] sm:$0xff]  ;;  %v1580_v41 = vld [vmem:[#allocation17 + $0x9f0] sm:$0xff]  ;;  %4779 = verf.f32 %v3191_v56 }
 0x56d   : > { %3416 = vmatpush1.msra.mxu1 %v1466_v1  ;;  %3379 = vmatpush2.msra.mxu0 %v1415_v9  ;;  %v1532_v33 = vld [vmem:[#allocation17 + $0x870] sm:$0xff]  ;;  %v1530_v1 = vld [vmem:[#allocation17 + $0x860] sm:$0xff]  ;;  %v1577_v9 = vld [vmem:[#allocation17 + $0x9d8] sm:$0xff] }
 0x56e   : > { %3417 = vmatprep.subr.mxu1 %v1464_v36  ;;  %3380 = vmatprep.subr.mxu0 %v1413_v38  ;;  %v1575_v36 = vld [vmem:[#allocation17 + $0x9c8] sm:$0xff]  ;;  %v1505_v56 = vld [vmem:[#allocation17 + $0x798] sm:$0xff] }
 0x56f   : > { %3418 = vmatpush1.msra.mxu1 %v1463_v32  ;;  %3381 = vmatpush2.msra.mxu0 %v1412_v42  ;;  %v1527_v38 = vld [vmem:[#allocation17 + $0x848] sm:$0xff]  ;;  %v1572_v32 = vld [vmem:[#allocation17 + $0x9b0] sm:$0xff] }
 0x570   : > { %3419 = vmatprep.subr.mxu1 %v1461_v51  ;;  %3382 = vmatprep.subr.mxu0 %v1410_v43  ;;  %v1524_v42 = vld [vmem:[#allocation17 + $0x830] sm:$0xff]  ;;  %v1571_v51 = vld [vmem:[#allocation17 + $0x9a8] sm:$0xff] }
 0x571   : > { %3420 = vmatpush1.msra.mxu1 %v1460_v31  ;;  %3457 = vmatprep.mubr.f32.mxu1 %v5663_v47  ;;  %v1523_v43 = vld [vmem:[#allocation17 + $0x828] sm:$0xff]  ;;  %v1569_v31 = vld [vmem:[#allocation17 + $0x998] sm:$0xff] }
 0x572   : > { %3383 = vmatpush2.msra.mxu0 %v1409_v45  ;;  %3421 = vmatprep.subr.mxu1 %v1458_v48  ;;  %v1568_v45 = vld [vmem:[#allocation17 + $0x990] sm:$0xff] }
 0x573   : > { %3384 = vmatprep.subr.mxu0 %v1407_v28  ;;  %3422 = vmatpush1.msra.mxu1 %v1457_v24  ;;  %v1520_v48 = vld [vmem:[#allocation17 + $0x810] sm:$0xff]  ;;  %v1518_v28 = vld [vmem:[#allocation17 + $0x800] sm:$0xff]  ;;  %v1565_v24 = vld [vmem:[#allocation17 + $0x978] sm:$0xff] }
 0x574   : > { %3385 = vmatpush2.msra.mxu0 %v1406_v53  ;;  %3423 = vmatprep.subr.mxu1 %v1455_v57  ;;  %v1563_v53 = vld [vmem:[#allocation17 + $0x968] sm:$0xff] }
 0x575   : > { %3387 = vmatmul.mubr.f32.vlgmr.msra.gmra.mxu0 %v5670_v63  ;;  %3424 = vmatpush1.msra.mxu1 %v1454_v58  ;;  %v1515_v57 = vld [vmem:[#allocation17 + $0x7e8] sm:$0xff]  ;;  %v1562_v58 = vld [vmem:[#allocation17 + $0x960] sm:$0xff] }
 0x576   : > { %3464 = vmatprep.subr.mxu0 %v1596_v3  ;;  %3425 = vmatprep.subr.mxu1 %v1548_v4  ;;  %v1514_v3 = vld [vmem:[#allocation17 + $0x7e0] sm:$0xff]  ;;  %v2293_v4 = vsub.s32 7, %v5497_v59 }
 0x577   : > { %3465 = vmatpush1.msra.mxu0 %v1595_v7  ;;  %3426 = vmatpush2.msra.mxu1 %v1547_v37  ;;  %v1512_v7 = vld [vmem:[#allocation17 + $0x7d0] sm:$0xff]  ;;  %v1559_v37 = vld [vmem:[#allocation17 + $0x948] sm:$0xff] }
 0x578   : > { %3466 = vmatprep.subr.mxu0 %v1593_v8  ;;  %3427 = vmatprep.subr.mxu1 %v1545_v26  ;;  %v1511_v8 = vld [vmem:[#allocation17 + $0x7c8] sm:$0xff]  ;;  %v2289_v26 = vsub.s32 6, %v5497_v59 }
 0x579   : > { %3467 = vmatpush1.msra.mxu0 %v1592_v49  ;;  %3428 = vmatpush2.msra.mxu1 %v1544_v10  ;;  %v4780_v49 = vpop.eup %4779  ;;  %v1557_v10 = vld [vmem:[#allocation17 + $0x938] sm:$0xff] }
 0x57a   : > { %3468 = vmatprep.subr.mxu0 %v1590_v13  ;;  %3429 = vmatprep.subr.mxu1 %v1542_v14  ;;  %v1509_v13 = vld [vmem:[#allocation17 + $0x7b8] sm:$0xff]  ;;  %v1556_v14 = vld [vmem:[#allocation17 + $0x930] sm:$0xff] }
 0x57b   : > { %3469 = vmatpush1.msra.mxu0 %v1589_v12  ;;  %3430 = vmatpush2.msra.mxu1 %v1541_v16  ;;  %v1508_v12 = vld [vmem:[#allocation17 + $0x7b0] sm:$0xff]  ;;  %v2294_v16 = vrot.slane %v5665_v50, %v2293_v4  ;;  %v1631_v4 = vld [vmem:[#allocation17 + $0xb88] sm:$0xff] }
 0x57c   : > { %3470 = vmatprep.subr.mxu0 %v1587_v17  ;;  %3431 = vmatprep.subr.mxu1 %v1539_v19  ;;  %v2886_v17 = vpop.f32.mrf.mxu1  ;;  %v1554_v19 = vld [vmem:[#allocation17 + $0x920] sm:$0xff] }
 0x57d   : > { %3471 = vmatpush1.msra.mxu0 %v1586_v21  ;;  %3432 = vmatpush2.msra.mxu1 %v1538_v20  ;;  %v1506_v21 = vld [vmem:[#allocation17 + $0x7a0] sm:$0xff] }
 0x57e   : > { %3472 = vmatprep.subr.mxu0 %v1584_v55  ;;  %3433 = vmatprep.subr.mxu1 %v1536_v22  ;;  %v3215_v55 = vadd.f32 1.0, %v4780_v49  ;;  %v1553_v22 = vld [vmem:[#allocation17 + $0x918] sm:$0xff]  ;;  %v1626_v49 = vld [vmem:[#allocation17 + $0xb60] sm:$0xff] }
 0x57f   : > { %3473 = vmatpush1.msra.mxu0 %v1583_v11  ;;  %3434 = vmatpush2.msra.mxu1 %v1535_v18  ;;  %v2290_v11 = vrot.slane %v5665_v50, %v2289_v26  ;;  %v1551_v18 = vld [vmem:[#allocation17 + $0x908] sm:$0xff]  ;;  %v1677_v26 = vld [vmem:[#allocation17 + $0xcf8] sm:$0xff] }
 0x580   : > { %3474 = vmatprep.subr.mxu0 %v1581_v23  ;;  %3435 = vmatprep.subr.mxu1 %v1533_v30  ;;  %v1503_v23 = vld [vmem:[#allocation17 + $0x788] sm:$0xff] }
 0x581   : > { %3475 = vmatpush1.msra.mxu0 %v1580_v41  ;;  %3436 = vmatpush2.msra.mxu1 %v1532_v33  ;;  %v3179_v41 = vmul.f32 0.5, %v5675_v15  ;;  %v1550_v33 = vld [vmem:[#allocation17 + $0x900] sm:$0xff]  ;;  %v1641_v15 = vld [vmem:[#allocation17 + $0xbd8] sm:$0xff] }
 0x582   : > { %3476 = vmatprep.subr.mxu0 %v1578_v34  ;;  %3437 = vmatprep.subr.mxu1 %v1530_v1  ;;  %v1502_v34 = vld [vmem:[#allocation17 + $0x780] sm:$0xff] }
 0x583   : > { %3477 = vmatpush1.msra.mxu0 %v1577_v9  ;;  %3438 = vmatpush2.msra.mxu1 %v1529_v0  ;;  %v2888_v9 = vpop.f32.mrf.mxu1  ;;  %v1644_v0 = vld [vmem:[#allocation17 + $0xbf0] sm:$0xff] }
 0x584   : > { %3478 = vmatprep.subr.mxu0 %v1575_v36  ;;  %3439 = vmatprep.subr.mxu1 %v1527_v38  ;;  %v5683_v36 = vmul.f32 %v3215_v55, %v3179_v41  ;;  %v1643_v38 = vld [vmem:[#allocation17 + $0xbe8] sm:$0xff]  ;;  %v1614_v41 = vld [vmem:[#allocation17 + $0xb00] sm:$0xff] }
 0x585   : > { %3479 = vmatpush1.msra.mxu0 %v1574_v39  ;;  %3440 = vmatpush2.msra.mxu1 %v1526_v40  ;;  %v1692_v39 = vld [vmem:[#allocation17 + $0xd70] sm:$0xff]  ;;  %v1619_v55 = vld [vmem:[#allocation17 + $0xb28] sm:$0xff] }
 0x586   : > { %3480 = vmatprep.subr.mxu0 %v1572_v32  ;;  %3441 = vmatprep.subr.mxu1 %v1524_v42  ;;  %v1691_v32 = vld [vmem:[#allocation17 + $0xd68] sm:$0xff] }
 0x587   : > { %3481 = vmatpush1.msra.mxu0 %v1571_v51  ;;  %3442 = vmatpush2.msra.mxu1 %v1523_v43  ;;  %v1640_v51 = vld [vmem:[#allocation17 + $0xbd0] sm:$0xff]  ;;  %v1689_v43 = vld [vmem:[#allocation17 + $0xd58] sm:$0xff] }
 0x588   : > { %3482 = vmatprep.subr.mxu0 %v1569_v31  ;;  %3443 = vmatprep.subr.mxu1 %v1521_v44  ;;  %v1638_v31 = vld [vmem:[#allocation17 + $0xbc0] sm:$0xff]  ;;  %v1688_v44 = vld [vmem:[#allocation17 + $0xd50] sm:$0xff] }
 0x589   : > { %3483 = vmatpush1.msra.mxu0 %v1568_v45  ;;  %3444 = vmatpush2.msra.mxu1 %v1520_v48  ;;  %v1637_v48 = vld [vmem:[#allocation17 + $0xbb8] sm:$0xff] }
 0x58a   : > { %3484 = vmatprep.subr.mxu0 %v1566_v35  ;;  %3445 = vmatprep.subr.mxu1 %v1518_v28  ;;  %v1686_v35 = vld [vmem:[#allocation17 + $0xd40] sm:$0xff]  ;;  %v1635_v28 = vld [vmem:[#allocation17 + $0xba8] sm:$0xff] }
 0x58b   : > { %3485 = vmatpush1.msra.mxu0 %v1565_v24  ;;  %3446 = vmatpush2.msra.mxu1 %v1517_v52  ;;  %v1685_v24 = vld [vmem:[#allocation17 + $0xd38] sm:$0xff]  ;;  %v1634_v52 = vld [vmem:[#allocation17 + $0xba0] sm:$0xff] }
 0x58c   : > { %3486 = vmatprep.subr.mxu0 %v1563_v53  ;;  %3447 = vmatprep.subr.mxu1 %v1515_v57  ;;  %v1683_v53 = vld [vmem:[#allocation17 + $0xd28] sm:$0xff]  ;;  %v1632_v57 = vld [vmem:[#allocation17 + $0xb90] sm:$0xff] }
 0x58d   : > { %3487 = vmatpush1.msra.mxu0 %v1562_v58  ;;  %3448 = vmatpush2.msra.mxu1 %v1514_v3  ;;  %v1682_v58 = vld [vmem:[#allocation17 + $0xd20] sm:$0xff] }
 0x58e   : > { %3488 = vmatprep.subr.mxu0 %v1560_v5  ;;  %3449 = vmatprep.subr.mxu1 %v1512_v7  ;;  %v1680_v5 = vld [vmem:[#allocation17 + $0xd10] sm:$0xff]  ;;  %v1629_v7 = vld [vmem:[#allocation17 + $0xb78] sm:$0xff] }
 0x58f   : > { %3489 = vmatpush1.msra.mxu0 %v1559_v37  ;;  %3450 = vmatpush2.msra.mxu1 %v1511_v8  ;;  %v2815_v20 = vpop.f32.mrf.mxu0  ;;  %v1679_v37 = vld [vmem:[#allocation17 + $0xd08] sm:$0xff]  ;;  %v1628_v8 = vld [vmem:[#allocation17 + $0xb70] sm:$0xff] }
 0x590   : > { %3490 = vmatprep.subr.mxu0 %v1557_v10  ;;  %3451 = vmatprep.subr.mxu1 %v1509_v13  ;;  %v2816_v50 = vadd.f32 %v2815_v20, %v2290_v11  ;;  %v1676_v10 = vld [vmem:[#allocation17 + $0xcf0] sm:$0xff]  ;;  %v1625_v13 = vld [vmem:[#allocation17 + $0xb58] sm:$0xff]  ;;  %v1670_v20 = vld [vmem:[#allocation17 + $0xcc0] sm:$0xff] }
 0x591   : > { %3491 = vmatpush1.msra.mxu0 %v1556_v14  ;;  %3452 = vmatpush2.msra.mxu1 %v1508_v12  ;;  %v2817_v30 = vpop.f32.mrf.mxu0  ;;  %v1674_v14 = vld [vmem:[#allocation17 + $0xce0] sm:$0xff]  ;;  %v1623_v12 = vld [vmem:[#allocation17 + $0xb48] sm:$0xff] }
 0x592   : > { %3492 = vmatprep.subr.mxu0 %v1554_v19  ;;  %3453 = vmatprep.subr.mxu1 %v1506_v21  ;;  %v2818_v1 = vadd.f32 %v2817_v30, %v2294_v16  ;;  %v5689_v45 = vadd.f32 %v2886_v17, %v2816_v50  ;;  %v1673_v16 = vld [vmem:[#allocation17 + $0xcd8] sm:$0xff]  ;;  %v1622_v17 = vld [vmem:[#allocation17 + $0xb40] sm:$0xff]  ;;  %v1671_v19 = vld [vmem:[#allocation17 + $0xcc8] sm:$0xff] }
 0x593   : > { %3493 = vmatpush1.msra.mxu0 %v1553_v22  ;;  %3454 = vmatpush2.msra.mxu1 %v1505_v56  ;;  %v1620_v21 = vld [vmem:[#allocation17 + $0xb30] sm:$0xff]  ;;  %v1617_v56 = vld [vmem:[#allocation17 + $0xb18] sm:$0xff]  ;;  %v1667_v11 = vld [vmem:[#allocation17 + $0xca8] sm:$0xff] }
 0x594   : > { %3494 = vmatprep.subr.mxu0 %v1551_v18  ;;  %3455 = vmatprep.subr.mxu1 %v1503_v23  ;;  %v5685_v40 = vadd.f32 %v2888_v9, %v2818_v1  ;;  %v3193_v3 = vmul.f32 0.70710677, %v5689_v45  ;;  %v1668_v22 = vld [vmem:[#allocation17 + $0xcb0] sm:$0xff]  ;;  %v1665_v30 = vld [vmem:[#allocation17 + $0xc98] sm:$0xff]  ;;  %v1662_v1 = vld [vmem:[#allocation17 + $0xc80] sm:$0xff] }
 0x595   : > { %3495 = vmatpush1.msra.mxu0 %v1550_v33  ;;  %3456 = vmatpush2.msra.mxu1 %v1502_v34  ;;  %v1616_v23 = vld [vmem:[#allocation17 + $0xb10] sm:$0xff]  ;;  %v1613_v34 = vld [vmem:[#allocation17 + $0xaf8] sm:$0xff]  ;;  %v1611_v9 = vld [vmem:[#allocation17 + $0xae8] sm:$0xff] }
 0x596   : > { %3496 = vmatprep.subr.mxu0 %v1644_v0  ;;  %3458 = vmatmul.mubr.f32.vlgmr.msra.gmra.mxu1 %v5683_v36  ;;  %v3194_v42 = vmul.f32 0.70710677, %v5685_v40  ;;  %v1664_v33 = vld [vmem:[#allocation17 + $0xc90] sm:$0xff]  ;;  %v1661_v0 = vld [vmem:[#allocation17 + $0xc78] sm:$0xff] }
 0x597   : > { %3497 = vmatpush2.msra.mxu0 %v1643_v38  ;;  %3535 = vmatprep.subr.mxu1 %v1692_v39  ;;  %v1610_v38 = vld [vmem:[#allocation17 + $0xae0] sm:$0xff]  ;;  %v1659_v39 = vld [vmem:[#allocation17 + $0xc68] sm:$0xff] }
 0x598   : > { %3498 = vmatprep.subr.mxu0 %v1641_v15  ;;  %3536 = vmatpush1.msra.mxu1 %v1691_v32  ;;  %4781 = verf.f32 %v3194_v42  ;;  %v3182_v15 = vmul.f32 0.5, %v5685_v40  ;;  %v1608_v32 = vld [vmem:[#allocation17 + $0xad0] sm:$0xff]  ;;  %v1658_v42 = vld [vmem:[#allocation17 + $0xc60] sm:$0xff]  ;;  %v1653_v40 = vld [vmem:[#allocation17 + $0xc38] sm:$0xff] }
 0x599   : > { %3499 = vmatpush2.msra.mxu0 %v1640_v51  ;;  %3537 = vmatprep.subr.mxu1 %v1689_v43  ;;  %4783 = verf.f32 %v3193_v3  ;;  %v1607_v51 = vld [vmem:[#allocation17 + $0xac8] sm:$0xff]  ;;  %v1656_v43 = vld [vmem:[#allocation17 + $0xc50] sm:$0xff] }
 0x59a   : > { %3500 = vmatprep.subr.mxu0 %v1638_v31  ;;  %3538 = vmatpush1.msra.mxu1 %v1688_v44  ;;  %v1605_v44 = vld [vmem:[#allocation17 + $0xab8] sm:$0xff] }
 0x59b   : > { %3501 = vmatpush2.msra.mxu0 %v1637_v48  ;;  %3539 = vmatprep.subr.mxu1 %v1686_v35  ;;  %v1655_v48 = vld [vmem:[#allocation17 + $0xc48] sm:$0xff] }
 0x59c   : > { %3502 = vmatprep.subr.mxu0 %v1635_v28  ;;  %3540 = vmatpush1.msra.mxu1 %v1685_v24  ;;  %v1604_v28 = vld [vmem:[#allocation17 + $0xab0] sm:$0xff]  ;;  %v1602_v24 = vld [vmem:[#allocation17 + $0xaa0] sm:$0xff] }
 0x59d   : > { %3503 = vmatpush2.msra.mxu0 %v1634_v52  ;;  %3541 = vmatprep.subr.mxu1 %v1683_v53  ;;  %v5695_v52 = vld [vmem:[#allocation16 + $0x8] sm:$0xf] }
 0x59e   : > { %3504 = vmatprep.subr.mxu0 %v1632_v57  ;;  %3542 = vmatpush1.msra.mxu1 %v1682_v58  ;;  %v1652_v57 = vld [vmem:[#allocation17 + $0xc30] sm:$0xff]  ;;  %v1601_v58 = vld [vmem:[#allocation17 + $0xa98] sm:$0xff]  ;;  %v2302_v3 = vrot.slane %v5695_v52, %v5500_v60 }
 0x59f   : > { %3505 = vmatpush2.msra.mxu0 %v1631_v4  ;;  %3543 = vmatprep.subr.mxu1 %v1680_v5  ;;  %v1650_v4 = vld [vmem:[#allocation17 + $0xc20] sm:$0xff]  ;;  %v1599_v5 = vld [vmem:[#allocation17 + $0xa88] sm:$0xff] }
 0x5a0   : > { %3506 = vmatprep.subr.mxu0 %v1629_v7  ;;  %3544 = vmatpush1.msra.mxu1 %v1679_v37 }
 0x5a1   : > { %3507 = vmatpush2.msra.mxu0 %v1628_v8  ;;  %3545 = vmatprep.subr.mxu1 %v1677_v26  ;;  %v3181_v8 = vmul.f32 0.5, %v5689_v45  ;;  %v1649_v26 = vld [vmem:[#allocation17 + $0xc18] sm:$0xff]  ;;  %v1740_v45 = vld [vmem:[#allocation17 + $0xef0] sm:$0xff] }
 0x5a2   : > { %3508 = vmatprep.subr.mxu0 %v1626_v49  ;;  %3546 = vmatpush1.msra.mxu1 %v1676_v10  ;;  %v1598_v49 = vld [vmem:[#allocation17 + $0xa80] sm:$0xff]  ;;  %v2298_v10 = vrot.slane %v5695_v52, %v5506_v62 }
 0x5a3   : > { %3509 = vmatpush2.msra.mxu0 %v1625_v13  ;;  %3547 = vmatprep.subr.mxu1 %v1674_v14  ;;  %v1647_v13 = vld [vmem:[#allocation17 + $0xc08] sm:$0xff] }
 0x5a4   : > { %3510 = vmatprep.subr.mxu0 %v1623_v12  ;;  %3548 = vmatpush1.msra.mxu1 %v1673_v16  ;;  %v1646_v16 = vld [vmem:[#allocation17 + $0xc00] sm:$0xff] }
 0x5a5   : > { %3511 = vmatpush2.msra.mxu0 %v1622_v17  ;;  %3549 = vmatprep.subr.mxu1 %v1671_v19  ;;  %v4782_v18 = vpop.eup %4781  ;;  %v1788_v19 = vld [vmem:[#allocation17 + $0x1070] sm:$0xff] }
 0x5a6   : > { %3512 = vmatprep.subr.mxu0 %v1620_v21  ;;  %3550 = vmatpush1.msra.mxu1 %v1670_v20  ;;  %v3218_v50 = vadd.f32 1.0, %v4782_v18  ;;  %v4784_v31 = vpop.eup %4783  ;;  %v1787_v20 = vld [vmem:[#allocation17 + $0x1068] sm:$0xff]  ;;  %v1737_v18 = vld [vmem:[#allocation17 + $0xed8] sm:$0xff] }
 0x5a7   : > { %3513 = vmatpush2.msra.mxu0 %v1619_v55  ;;  %3551 = vmatprep.subr.mxu1 %v1668_v22  ;;  %v3217_v53 = vadd.f32 1.0, %v4784_v31  ;;  %v1739_v22 = vld [vmem:[#allocation17 + $0xee8] sm:$0xff] }
 0x5a8   : > { %3514 = vmatprep.subr.mxu0 %v1617_v56  ;;  %3552 = vmatpush1.msra.mxu1 %v1667_v11  ;;  %v5693_v35 = vmul.f32 %v3218_v50, %v3182_v15  ;;  %v1785_v11 = vld [vmem:[#allocation17 + $0x1058] sm:$0xff]  ;;  %v1779_v50 = vld [vmem:[#allocation17 + $0x1028] sm:$0xff]  ;;  %v1730_v15 = vld [vmem:[#allocation17 + $0xea0] sm:$0xff] }
 0x5a9   : > { %3515 = vmatpush2.msra.mxu0 %v1616_v23  ;;  %3553 = vmatprep.subr.mxu1 %v1665_v30  ;;  %v5703_v12 = vmul.f32 %v3217_v53, %v3181_v8  ;;  %v1784_v23 = vld [vmem:[#allocation17 + $0x1050] sm:$0xff]  ;;  %v1727_v31 = vld [vmem:[#allocation17 + $0xe88] sm:$0xff]  ;;  %v1722_v53 = vld [vmem:[#allocation17 + $0xe60] sm:$0xff] }
 0x5aa   : > { %3516 = vmatprep.subr.mxu0 %v1614_v41  ;;  %3554 = vmatpush1.msra.mxu1 %v1664_v33  ;;  %v1736_v41 = vld [vmem:[#allocation17 + $0xed0] sm:$0xff]  ;;  %v1782_v33 = vld [vmem:[#allocation17 + $0x1040] sm:$0xff] }
 0x5ab   : > { %3517 = vmatpush2.msra.mxu0 %v1613_v34  ;;  %3555 = vmatprep.subr.mxu1 %v1662_v1  ;;  %v1734_v34 = vld [vmem:[#allocation17 + $0xec0] sm:$0xff]  ;;  %v1781_v1 = vld [vmem:[#allocation17 + $0x1038] sm:$0xff]  ;;  %v1716_v8 = vld [vmem:[#allocation17 + $0xe30] sm:$0xff] }
 0x5ac   : > { %3518 = vmatprep.subr.mxu0 %v1611_v9  ;;  %3556 = vmatpush1.msra.mxu1 %v1661_v0  ;;  %v1733_v0 = vld [vmem:[#allocation17 + $0xeb8] sm:$0xff] }
 0x5ad   : > { %3519 = vmatpush2.msra.mxu0 %v1610_v38  ;;  %3557 = vmatprep.subr.mxu1 %v1659_v39  ;;  %v1731_v38 = vld [vmem:[#allocation17 + $0xea8] sm:$0xff]  ;;  %v1778_v39 = vld [vmem:[#allocation17 + $0x1020] sm:$0xff] }
 0x5ae   : > { %3520 = vmatprep.subr.mxu0 %v1608_v32  ;;  %3558 = vmatpush1.msra.mxu1 %v1658_v42  ;;  %v1776_v32 = vld [vmem:[#allocation17 + $0x1010] sm:$0xff] }
 0x5af   : > { %3521 = vmatpush2.msra.mxu0 %v1607_v51  ;;  %3559 = vmatprep.subr.mxu1 %v1656_v43  ;;  %v1728_v42 = vld [vmem:[#allocation17 + $0xe90] sm:$0xff]  ;;  %v1775_v51 = vld [vmem:[#allocation17 + $0x1008] sm:$0xff] }
 0x5b0   : > { %3522 = vmatprep.subr.mxu0 %v1605_v44  ;;  %3560 = vmatpush1.msra.mxu1 %v1655_v48  ;;  %v3028_v7 = vpop.f32.mrf.mxu0  ;;  %v1773_v44 = vld [vmem:[#allocation17 + $0xff8] sm:$0xff] }
 0x5b1   : > { %3523 = vmatpush2.msra.mxu0 %v1604_v28  ;;  %3528 = vmatprep.mubr.f32.mxu0 %v5693_v35  ;;  %v2957_v37 = vpop.f32.mrf.mxu1  ;;  %v1725_v48 = vld [vmem:[#allocation17 + $0xe78] sm:$0xff]  ;;  %v1772_v28 = vld [vmem:[#allocation17 + $0xff0] sm:$0xff] }
 0x5b2   : > { %3561 = vmatprep.subr.mxu1 %v1653_v40  ;;  %3524 = vmatprep.subr.mxu0 %v1602_v24  ;;  %v3030_v21 = vpop.f32.mrf.mxu0  ;;  %v2958_v55 = vadd.f32 %v2957_v37, %v2298_v10  ;;  %v1724_v40 = vld [vmem:[#allocation17 + $0xe70] sm:$0xff]  ;;  %v1770_v24 = vld [vmem:[#allocation17 + $0xfe0] sm:$0xff]  ;;  %v1761_v10 = vld [vmem:[#allocation17 + $0xf98] sm:$0xff] }
 0x5b3   : > { %3562 = vmatpush1.msra.mxu1 %v1652_v57  ;;  %3525 = vmatpush2.msra.mxu0 %v1601_v58  ;;  %v2959_v14 = vpop.f32.mrf.mxu1  ;;  %v1769_v57 = vld [vmem:[#allocation17 + $0xfd8] sm:$0xff]  ;;  %v1764_v37 = vld [vmem:[#allocation17 + $0xfb0] sm:$0xff] }
 0x5b4   : > { %3563 = vmatprep.subr.mxu1 %v1650_v4  ;;  %3526 = vmatprep.subr.mxu0 %v1599_v5  ;;  %v2960_v17 = vadd.f32 %v2959_v14, %v2302_v3  ;;  %v5709_v9 = vadd.f32 %v3028_v7, %v2958_v55  ;;  %v1721_v58 = vld [vmem:[#allocation17 + $0xe58] sm:$0xff]  ;;  %v1767_v3 = vld [vmem:[#allocation17 + $0xfc8] sm:$0xff]  ;;  %v1766_v5 = vld [vmem:[#allocation17 + $0xfc0] sm:$0xff] }
 0x5b5   : > { %3564 = vmatpush1.msra.mxu1 %v1649_v26  ;;  %3527 = vmatpush2.msra.mxu0 %v1598_v49  ;;  %v1719_v4 = vld [vmem:[#allocation17 + $0xe48] sm:$0xff]  ;;  %v1718_v7 = vld [vmem:[#allocation17 + $0xe40] sm:$0xff]  ;;  %v1713_v14 = vld [vmem:[#allocation17 + $0xe18] sm:$0xff] }
 0x5b6   : > { %3565 = vmatprep.subr.mxu1 %v1647_v13  ;;  %3529 = vmatmul.mubr.f32.vlgmr.msra.gmra.mxu0 %v5703_v12  ;;  %v5706_v56 = vadd.f32 %v3030_v21, %v2960_v17  ;;  %v3195_v43 = vmul.f32 0.70710677, %v5709_v9  ;;  %v1763_v26 = vld [vmem:[#allocation17 + $0xfa8] sm:$0xff]  ;;  %v1758_v21 = vld [vmem:[#allocation17 + $0xf80] sm:$0xff]  ;;  %v1709_v55 = vld [vmem:[#allocation17 + $0xdf8] sm:$0xff] }
 0x5b7   : > { %3566 = vmatpush1.msra.mxu1 %v1646_v16  ;;  %3606 = vmatprep.subr.mxu0 %v1788_v19  ;;  %v1715_v49 = vld [vmem:[#allocation17 + $0xe28] sm:$0xff]  ;;  %v1760_v16 = vld [vmem:[#allocation17 + $0xf90] sm:$0xff] }
 0x5b8   : > { %3567 = vmatprep.subr.mxu1 %v1740_v45  ;;  %v3196_v30 = vmul.f32 0.70710677, %v5706_v56  ;;  %3607 = vmatpush1.msra.mxu0 %v1787_v20  ;;  %v3184_v17 = vmul.f32 0.5, %v5706_v56  ;;  %v1712_v19 = vld [vmem:[#allocation17 + $0xe10] sm:$0xff]  ;;  %v1710_v20 = vld [vmem:[#allocation17 + $0xe00] sm:$0xff] }
 0x5b9   : > { %3568 = vmatpush2.msra.mxu1 %v1739_v22  ;;  %3608 = vmatprep.subr.mxu0 %v1785_v11  ;;  %v1757_v11 = vld [vmem:[#allocation17 + $0xf78] sm:$0xff]  ;;  %v1706_v56 = vld [vmem:[#allocation17 + $0xde0] sm:$0xff] }
 0x5ba   : > { %4785 = verf.f32 %v3196_v30  ;;  %3569 = vmatprep.subr.mxu1 %v1737_v18  ;;  %3609 = vmatpush1.msra.mxu0 %v1784_v23  ;;  %v1707_v18 = vld [vmem:[#allocation17 + $0xde8] sm:$0xff]  ;;  %v1754_v30 = vld [vmem:[#allocation17 + $0xf60] sm:$0xff] }
 0x5bb   : > { %3570 = vmatpush2.msra.mxu1 %v1736_v41  ;;  %3610 = vmatprep.subr.mxu0 %v1782_v33  ;;  %4787 = verf.f32 %v3195_v43  ;;  %v1755_v23 = vld [vmem:[#allocation17 + $0xf68] sm:$0xff]  ;;  %v1704_v41 = vld [vmem:[#allocation17 + $0xdd0] sm:$0xff]  ;;  %v1697_v43 = vld [vmem:[#allocation17 + $0xd98] sm:$0xff] }
 0x5bc   : > { %3571 = vmatprep.subr.mxu1 %v1734_v34  ;;  %3611 = vmatpush1.msra.mxu0 %v1781_v1  ;;  %v1752_v33 = vld [vmem:[#allocation17 + $0xf50] sm:$0xff]  ;;  %v1703_v34 = vld [vmem:[#allocation17 + $0xdc8] sm:$0xff] }
 0x5bd   : > { %3572 = vmatpush2.msra.mxu1 %v1733_v0  ;;  %3612 = vmatprep.subr.mxu0 %v1779_v50  ;;  %v1751_v1 = vld [vmem:[#allocation17 + $0xf48] sm:$0xff]  ;;  %v1701_v50 = vld [vmem:[#allocation17 + $0xdb8] sm:$0xff] }
 0x5be   : > { %3573 = vmatprep.subr.mxu1 %v1731_v38  ;;  %3613 = vmatpush1.msra.mxu0 %v1778_v39  ;;  %v1749_v38 = vld [vmem:[#allocation17 + $0xf38] sm:$0xff]  ;;  %v1700_v39 = vld [vmem:[#allocation17 + $0xdb0] sm:$0xff] }
 0x5bf   : > { %3574 = vmatpush2.msra.mxu1 %v1730_v15  ;;  %3614 = vmatprep.subr.mxu0 %v1776_v32  ;;  %v1748_v15 = vld [vmem:[#allocation17 + $0xf30] sm:$0xff]  ;;  %v1698_v32 = vld [vmem:[#allocation17 + $0xda0] sm:$0xff] }
 0x5c0   : > { %3575 = vmatprep.subr.mxu1 %v1728_v42  ;;  %3615 = vmatpush1.msra.mxu0 %v1775_v51  ;;  %v1746_v42 = vld [vmem:[#allocation17 + $0xf20] sm:$0xff] }
 0x5c1   : > { %3576 = vmatpush2.msra.mxu1 %v1727_v31  ;;  %3616 = vmatprep.subr.mxu0 %v1773_v44  ;;  %v1745_v31 = vld [vmem:[#allocation17 + $0xf18] sm:$0xff]  ;;  %v1695_v44 = vld [vmem:[#allocation17 + $0xd88] sm:$0xff] }
 0x5c2   : > { %3577 = vmatprep.subr.mxu1 %v1725_v48  ;;  %3617 = vmatpush1.msra.mxu0 %v1772_v28  ;;  %v1743_v48 = vld [vmem:[#allocation17 + $0xf08] sm:$0xff]  ;;  %v3183_v28 = vmul.f32 0.5, %v5709_v9  ;;  %v1306_v9 = vld [vmem:[#allocation17 + $0x160] sm:$0xff] }
 0x5c3   : > { %3578 = vmatpush2.msra.mxu1 %v1724_v40  ;;  %3618 = vmatprep.subr.mxu0 %v1770_v24  ;;  %v1694_v40 = vld [vmem:[#allocation17 + $0xd80] sm:$0xff] }
 0x5c4   : > { %3579 = vmatprep.subr.mxu1 %v1722_v53  ;;  %3619 = vmatpush1.msra.mxu0 %v1769_v57  ;;  %v1742_v24 = vld [vmem:[#allocation17 + $0xf00] sm:$0xff]  ;;  %v1357_v53 = vld [vmem:[#allocation17 + $0x2f8] sm:$0xff] }
 0x5c5   : > { %3580 = vmatpush2.msra.mxu1 %v1721_v58  ;;  %3620 = vmatprep.subr.mxu0 %v1767_v3  ;;  %v1309_v58 = vld [vmem:[#allocation17 + $0x178] sm:$0xff]  ;;  %v1354_v3 = vld [vmem:[#allocation17 + $0x2e0] sm:$0xff] }
 0x5c6   : > { %3581 = vmatprep.subr.mxu1 %v1719_v4  ;;  %3621 = vmatpush1.msra.mxu0 %v1766_v5  ;;  %v1836_v4 = vld [vmem:[#allocation17 + $0x11f0] sm:$0xff]  ;;  %v1835_v5 = vld [vmem:[#allocation17 + $0x11e8] sm:$0xff] }
 0x5c7   : > { %v4786_v13 = vpop.eup %4785  ;;  %3582 = vmatpush2.msra.mxu1 %v1718_v7  ;;  %3622 = vmatprep.subr.mxu0 %v1764_v37  ;;  %v1351_v7 = vld [vmem:[#allocation17 + $0x2c8] sm:$0xff]  ;;  %v1833_v37 = vld [vmem:[#allocation17 + $0x11d8] sm:$0xff] }
 0x5c8   : > { %3583 = vmatprep.subr.mxu1 %v1716_v8  ;;  %v3220_v45 = vadd.f32 1.0, %v4786_v13  ;;  %3623 = vmatpush1.msra.mxu0 %v1763_v26  ;;  %v4788_v0 = vpop.eup %4787  ;;  %v1303_v8 = vld [vmem:[#allocation17 + $0x148] sm:$0xff]  ;;  %v1832_v26 = vld [vmem:[#allocation17 + $0x11d0] sm:$0xff] }
 0x5c9   : > { %3584 = vmatpush2.msra.mxu1 %v1715_v49  ;;  %3624 = vmatprep.subr.mxu0 %v1761_v10  ;;  %v3219_v51 = vadd.f32 1.0, %v4788_v0  ;;  %v1348_v49 = vld [vmem:[#allocation17 + $0x2b0] sm:$0xff]  ;;  %v1830_v10 = vld [vmem:[#allocation17 + $0x11c0] sm:$0xff]  ;;  %v1815_v0 = vld [vmem:[#allocation17 + $0x1148] sm:$0xff] }
 0x5ca   : > { %3585 = vmatprep.subr.mxu1 %v1713_v14  ;;  %v5713_v22 = vmul.f32 %v3220_v45, %v3184_v17  ;;  %3625 = vmatpush1.msra.mxu0 %v1760_v16  ;;  %v1300_v13 = vld [vmem:[#allocation17 + $0x130] sm:$0xff]  ;;  %v1829_v14 = vld [vmem:[#allocation17 + $0x11b8] sm:$0xff]  ;;  %v1827_v17 = vld [vmem:[#allocation17 + $0x11a8] sm:$0xff] }
 0x5cb   : > { %3586 = vmatpush2.msra.mxu1 %v1712_v19  ;;  %3626 = vmatprep.subr.mxu0 %v1758_v21  ;;  %v5717_v57 = vmul.f32 %v3219_v51, %v3183_v28  ;;  %v1345_v16 = vld [vmem:[#allocation17 + $0x298] sm:$0xff]  ;;  %v1826_v19 = vld [vmem:[#allocation17 + $0x11a0] sm:$0xff]  ;;  %v1824_v21 = vld [vmem:[#allocation17 + $0x1190] sm:$0xff] }
 0x5cc   : > { %3587 = vmatprep.subr.mxu1 %v1710_v20  ;;  %3599 = vmatprep.mubr.f32.mxu1 %v5713_v22  ;;  %v1342_v45 = vld [vmem:[#allocation17 + $0x280] sm:$0xff]  ;;  %v1327_v51 = vld [vmem:[#allocation17 + $0x208] sm:$0xff] }
 0x5cd   : > { %3588 = vmatpush2.msra.mxu1 %v1709_v55  ;;  %3627 = vmatpush1.msra.mxu0 %v1757_v11  ;;  %v1294_v20 = vld [vmem:[#allocation17 + $0x100] sm:$0xff]  ;;  %v1823_v55 = vld [vmem:[#allocation17 + $0x1188] sm:$0xff] }
 0x5ce   : > { %3589 = vmatprep.subr.mxu1 %v1707_v18  ;;  %3628 = vmatprep.subr.mxu0 %v1755_v23  ;;  %v1339_v11 = vld [vmem:[#allocation17 + $0x268] sm:$0xff]  ;;  %v1821_v18 = vld [vmem:[#allocation17 + $0x1178] sm:$0xff]  ;;  %v1806_v28 = vld [vmem:[#allocation17 + $0x1100] sm:$0xff] }
 0x5cf   : > { %3590 = vmatpush2.msra.mxu1 %v1706_v56  ;;  %3629 = vmatpush1.msra.mxu0 %v1754_v30  ;;  %v1291_v23 = vld [vmem:[#allocation17 + $0xe8] sm:$0xff]  ;;  %v1820_v56 = vld [vmem:[#allocation17 + $0x1170] sm:$0xff] }
 0x5d0   : > { %3591 = vmatprep.subr.mxu1 %v1704_v41  ;;  %3630 = vmatprep.subr.mxu0 %v1752_v33  ;;  %v1336_v30 = vld [vmem:[#allocation17 + $0x250] sm:$0xff]  ;;  %v1818_v41 = vld [vmem:[#allocation17 + $0x1160] sm:$0xff] }
 0x5d1   : > { %3592 = vmatpush2.msra.mxu1 %v1703_v34  ;;  %3631 = vmatpush1.msra.mxu0 %v1751_v1  ;;  %v1288_v33 = vld [vmem:[#allocation17 + $0xd0] sm:$0xff]  ;;  %v1817_v34 = vld [vmem:[#allocation17 + $0x1158] sm:$0xff] }
 0x5d2   : > { %3593 = vmatprep.subr.mxu1 %v1701_v50  ;;  %3632 = vmatprep.subr.mxu0 %v1749_v38  ;;  %v1333_v1 = vld [vmem:[#allocation17 + $0x238] sm:$0xff]  ;;  %v1814_v38 = vld [vmem:[#allocation17 + $0x1140] sm:$0xff] }
 0x5d3   : > { %3594 = vmatpush2.msra.mxu1 %v1700_v39  ;;  %3633 = vmatpush1.msra.mxu0 %v1748_v15  ;;  %v1285_v50 = vld [vmem:[#allocation17 + $0xb8] sm:$0xff]  ;;  %v1330_v39 = vld [vmem:[#allocation17 + $0x220] sm:$0xff]  ;;  %v1812_v15 = vld [vmem:[#allocation17 + $0x1130] sm:$0xff] }
 0x5d4   : > { %3595 = vmatprep.subr.mxu1 %v1698_v32  ;;  %3634 = vmatprep.subr.mxu0 %v1746_v42  ;;  %v1282_v32 = vld [vmem:[#allocation17 + $0xa0] sm:$0xff]  ;;  %v1811_v42 = vld [vmem:[#allocation17 + $0x1128] sm:$0xff] }
 0x5d5   : > { %3596 = vmatpush2.msra.mxu1 %v1697_v43  ;;  %3635 = vmatpush1.msra.mxu0 %v1745_v31  ;;  %v1809_v43 = vld [vmem:[#allocation17 + $0x1118] sm:$0xff]  ;;  %v1279_v31 = vld [vmem:[#allocation17 + $0x88] sm:$0xff] }
 0x5d6   : > { %3597 = vmatprep.subr.mxu1 %v1695_v44  ;;  %3636 = vmatprep.subr.mxu0 %v1743_v48  ;;  %v1808_v44 = vld [vmem:[#allocation17 + $0x1110] sm:$0xff] }
 0x5d7   : > { %3598 = vmatpush2.msra.mxu1 %v1694_v40  ;;  %3637 = vmatpush1.msra.mxu0 %v1742_v24  ;;  %v1324_v48 = vld [vmem:[#allocation17 + $0x1f0] sm:$0xff]  ;;  %v1805_v24 = vld [vmem:[#allocation17 + $0x10f8] sm:$0xff] }
 0x5d8   : > { %3600 = vmatmul.mubr.f32.vlgmr.msra.gmra.mxu1 %v5717_v57  ;;  %4363 = vmatprep.subr.mxu1 %v1357_v53  ;;  %v1276_v40 = vld [vmem:[#allocation17 + $0x70] sm:$0xff]  ;;  %v1321_v53 = vld [vmem:[#allocation17 + $0x1d8] sm:$0xff] }
 0x5d9   : > { %4364 = vmatpush3.msra.mxu1 %v1309_v58  ;;  %3741 = vmatprep.mubr.f32.mxu1 %v5621_v2  ;;  %v1297_v2 = vld [vmem:[#allocation17 + $0x118] sm:$0xff]  ;;  %v1803_v58 = vld [vmem:[#allocation17 + $0x10e8] sm:$0xff] }
 0x5da   : > { %4365 = vmatprep.subr.mxu1 %v1354_v3  ;;  %3638 = vmatprep.subr.mxu0 %v1836_v4  ;;  %v1273_v3 = vld [vmem:[#allocation17 + $0x58] sm:$0xff]  ;;  %v1802_v4 = vld [vmem:[#allocation17 + $0x10e0] sm:$0xff] }
 0x5db   : > { %4366 = vmatpush3.msra.mxu1 %v1306_v9  ;;  %3639 = vmatpush2.msra.mxu0 %v1835_v5  ;;  %v1318_v9 = vld [vmem:[#allocation17 + $0x1c0] sm:$0xff]  ;;  %v1800_v5 = vld [vmem:[#allocation17 + $0x10d0] sm:$0xff] }
 0x5dc   : > { %4367 = vmatprep.subr.mxu1 %v1351_v7  ;;  %3640 = vmatprep.subr.mxu0 %v1833_v37  ;;  %v1270_v7 = vld [vmem:[#allocation17 + $0x40] sm:$0xff]  ;;  %v2306_v37 = vrot.slane %v5695_v52, %v5503_v61 }
 0x5dd   : > { %4368 = vmatpush3.msra.mxu1 %v1303_v8  ;;  %3641 = vmatpush2.msra.mxu0 %v1832_v26  ;;  %v1799_v8 = vld [vmem:[#allocation17 + $0x10c8] sm:$0xff] }
 0x5de   : > { %4369 = vmatprep.subr.mxu1 %v1348_v49  ;;  %3642 = vmatprep.subr.mxu0 %v1830_v10  ;;  %v1315_v26 = vld [vmem:[#allocation17 + $0x1a8] sm:$0xff]  ;;  %v1797_v49 = vld [vmem:[#allocation17 + $0x10b8] sm:$0xff] }
 0x5df   : > { %4370 = vmatpush3.msra.mxu1 %v1300_v13  ;;  %3643 = vmatpush2.msra.mxu0 %v1829_v14  ;;  %v1267_v10 = vld [vmem:[#allocation17 + $0x28] sm:$0xff]  ;;  %v2310_v13 = vrot.slane %v5695_v52, %v2277_v54  ;;  %v1796_v14 = vld [vmem:[#allocation17 + $0x10b0] sm:$0xff]  ;;  %v1501_v52 = vld [vmem:[#allocation17 + $0x778] sm:$0xff] }
 0x5e0   : > { %4371 = vmatprep.subr.mxu1 %v1345_v16  ;;  %3644 = vmatprep.subr.mxu0 %v1827_v17  ;;  %v3170_v16 = vpop.f32.mrf.mxu1  ;;  %v1312_v17 = vld [vmem:[#allocation17 + $0x190] sm:$0xff] }
 0x5e1   : > { %4372 = vmatpush3.msra.mxu1 %v1297_v2  ;;  %3645 = vmatpush2.msra.mxu0 %v1826_v19  ;;  %v1794_v19 = vld [vmem:[#allocation17 + $0x10a0] sm:$0xff] }
 0x5e2   : > { %4373 = vmatprep.subr.mxu1 %v1342_v45  ;;  %3646 = vmatprep.subr.mxu0 %v1824_v21  ;;  %v1264_v21 = vld [vmem:[#allocation17 + $0x10] sm:$0xff] }
 0x5e3   : > { %4374 = vmatpush3.msra.mxu1 %v1294_v20  ;;  %3647 = vmatpush2.msra.mxu0 %v1823_v55  ;;  %v1793_v20 = vld [vmem:[#allocation17 + $0x1098] sm:$0xff] }
 0x5e4   : > { %4375 = vmatprep.subr.mxu1 %v1339_v11  ;;  %3648 = vmatprep.subr.mxu0 %v1821_v18  ;;  %v1549_v55 = vld [vmem:[#allocation17 + $0x8f8] sm:$0xff]  ;;  %v3172_v18 = vpop.f32.mrf.mxu1 }
 0x5e5   : > { %4376 = vmatpush3.msra.mxu1 %v1291_v23  ;;  %3649 = vmatpush2.msra.mxu0 %v1820_v56  ;;  %v1546_v23 = vld [vmem:[#allocation17 + $0x8e0] sm:$0xff]  ;;  %v1791_v56 = vld [vmem:[#allocation17 + $0x1088] sm:$0xff] }
 0x5e6   : > { %4377 = vmatprep.subr.mxu1 %v1336_v30  ;;  %3650 = vmatprep.subr.mxu0 %v1818_v41 }
 0x5e7   : > { %4378 = vmatpush3.msra.mxu1 %v1288_v33  ;;  %3651 = vmatpush2.msra.mxu0 %v1817_v34  ;;  %v1498_v33 = vld [vmem:[#allocation17 + $0x760] sm:$0xff] }
 0x5e8   : > { %4379 = vmatprep.subr.mxu1 %v1333_v1  ;;  %3652 = vmatprep.subr.mxu0 %v1815_v0  ;;  %v1790_v34 = vld [vmem:[#allocation17 + $0x1080] sm:$0xff]  ;;  %v1543_v1 = vld [vmem:[#allocation17 + $0x8c8] sm:$0xff]  ;;  %v1453_v0 = vld [vmem:[#allocation17 + $0x5f8] sm:$0xff] }
 0x5e9   : > { %4380 = vmatpush3.msra.mxu1 %v1285_v50  ;;  %3653 = vmatpush2.msra.mxu0 %v1814_v38  ;;  %v1495_v38 = vld [vmem:[#allocation17 + $0x748] sm:$0xff] }
 0x5ea   : > { %4381 = vmatprep.subr.mxu1 %v1330_v39  ;;  %3654 = vmatprep.subr.mxu0 %v1812_v15  ;;  %v1540_v39 = vld [vmem:[#allocation17 + $0x8b0] sm:$0xff]  ;;  %v1537_v15 = vld [vmem:[#allocation17 + $0x898] sm:$0xff] }
 0x5eb   : > { %4382 = vmatpush3.msra.mxu1 %v1282_v32  ;;  %3655 = vmatpush2.msra.mxu0 %v1811_v42  ;;  %v1489_v32 = vld [vmem:[#allocation17 + $0x718] sm:$0xff]  ;;  %v1486_v42 = vld [vmem:[#allocation17 + $0x700] sm:$0xff] }
 0x5ec   : > { %4383 = vmatprep.subr.mxu1 %v1327_v51  ;;  %3656 = vmatprep.subr.mxu0 %v1809_v43  ;;  %v1531_v51 = vld [vmem:[#allocation17 + $0x868] sm:$0xff] }
 0x5ed   : > { %4384 = vmatpush3.msra.mxu1 %v1279_v31  ;;  %3657 = vmatpush2.msra.mxu0 %v1808_v44  ;;  %v1483_v43 = vld [vmem:[#allocation17 + $0x6e8] sm:$0xff]  ;;  %v1528_v31 = vld [vmem:[#allocation17 + $0x850] sm:$0xff] }
 0x5ee   : > { %4385 = vmatprep.subr.mxu1 %v1324_v48  ;;  %3658 = vmatprep.subr.mxu0 %v1806_v28  ;;  %v1480_v44 = vld [vmem:[#allocation17 + $0x6d0] sm:$0xff]  ;;  %v1525_v48 = vld [vmem:[#allocation17 + $0x838] sm:$0xff] }
 0x5ef   : > { %4386 = vmatpush3.msra.mxu1 %v1276_v40  ;;  %3659 = vmatpush2.msra.mxu0 %v1805_v24  ;;  %v1477_v28 = vld [vmem:[#allocation17 + $0x6b8] sm:$0xff]  ;;  %v1522_v24 = vld [vmem:[#allocation17 + $0x820] sm:$0xff] }
 0x5f0   : > { %4387 = vmatprep.subr.mxu1 %v1321_v53  ;;  %3660 = vmatprep.subr.mxu0 %v1803_v58  ;;  %v1474_v53 = vld [vmem:[#allocation17 + $0x6a0] sm:$0xff] }
 0x5f1   : > { %4388 = vmatpush3.msra.mxu1 %v1273_v3  ;;  %3661 = vmatpush2.msra.mxu0 %v1802_v4  ;;  %v1519_v4 = vld [vmem:[#allocation17 + $0x808] sm:$0xff] }
 0x5f2   : > { %4389 = vmatprep.subr.mxu1 %v1318_v9  ;;  %3662 = vmatprep.subr.mxu0 %v1800_v5  ;;  %v1471_v5 = vld [vmem:[#allocation17 + $0x688] sm:$0xff] }
 0x5f3   : > { %4390 = vmatpush3.msra.mxu1 %v1270_v7  ;;  %v3099_v2 = vpop.f32.mrf.mxu0  ;;  %3663 = vmatpush2.msra.mxu0 %v1799_v8  ;;  %v1516_v8 = vld [vmem:[#allocation17 + $0x7f0] sm:$0xff] }
 0x5f4   : > { %4391 = vmatprep.subr.mxu1 %v1315_v26  ;;  %v3100_v45 = vadd.f32 %v3099_v2, %v2306_v37  ;;  %3664 = vmatprep.subr.mxu0 %v1797_v49  ;;  %v1468_v26 = vld [vmem:[#allocation17 + $0x670] sm:$0xff]  ;;  %v1510_v2 = vld [vmem:[#allocation17 + $0x7c0] sm:$0xff] }
 0x5f5   : > { %4392 = vmatpush3.msra.mxu1 %v1267_v10  ;;  %v3101_v11 = vpop.f32.mrf.mxu0  ;;  %3665 = vmatpush2.msra.mxu0 %v1796_v14  ;;  %v1405_v14 = vld [vmem:[#allocation17 + $0x478] sm:$0xff] }
 0x5f6   : > { %4393 = vmatprep.subr.mxu1 %v1312_v17  ;;  %v5726_v59 = vadd.f32 %v3170_v16, %v3100_v45  ;;  %v3102_v54 = vadd.f32 %v3101_v11, %v2310_v13  ;;  %3666 = vmatprep.subr.mxu0 %v1794_v19  ;;  %v1513_v13 = vld [vmem:[#allocation17 + $0x7d8] sm:$0xff]  ;;  %v1450_v17 = vld [vmem:[#allocation17 + $0x5e0] sm:$0xff]  ;;  %v1399_v11 = vld [vmem:[#allocation17 + $0x448] sm:$0xff] }
 0x5f7   : > { %4394 = vmatpush3.msra.mxu1 %v1264_v21  ;;  %3667 = vmatpush2.msra.mxu0 %v1793_v20  ;;  %v1465_v16 = vld [vmem:[#allocation17 + $0x658] sm:$0xff]  ;;  %v1462_v19 = vld [vmem:[#allocation17 + $0x640] sm:$0xff]  ;;  %v1507_v21 = vld [vmem:[#allocation17 + $0x7a8] sm:$0xff] }
 0x5f8   : > { %v3197_v30 = vmul.f32 0.70710677, %v5726_v59  ;;  %3742 = vmatmul.mubr.f32.vlgmr.msra.gmra.mxu1 %v5652_v46  ;;  %4433 = vmatprep.subr.mxu1 %v1549_v55  ;;  %v3173_v41 = vadd.f32 %v3172_v18, %v3102_v54  ;;  %v1492_v46 = vld [vmem:[#allocation17 + $0x730] sm:$0xff]  ;;  %v3185_v37 = vmul.f32 0.5, %v5726_v59  ;;  %v1402_v45 = vld [vmem:[#allocation17 + $0x460] sm:$0xff]  ;;  %v1447_v20 = vld [vmem:[#allocation17 + $0x5c8] sm:$0xff] }
 0x5f9   : > { %4434 = vmatpush3.msra.mxu1 %v1501_v52  ;;  %3881 = vmatprep.mubr.f32.mxu1 %v5663_v47  ;;  %v1534_v47 = vld [vmem:[#allocation17 + $0x880] sm:$0xff]  ;;  %v1459_v55 = vld [vmem:[#allocation17 + $0x628] sm:$0xff]  ;;  %v1504_v59 = vld [vmem:[#allocation17 + $0x790] sm:$0xff] }
 0x5fa   : > { %4789 = verf.f32 %v3197_v30  ;;  %v3198_v50 = vmul.f32 0.70710677, %v3173_v41  ;;  %4435 = vmatprep.subr.mxu1 %v1546_v23  ;;  %3668 = vmatprep.subr.mxu0 %v1791_v56  ;;  %v3186_v9 = vmul.f32 0.5, %v3173_v41  ;;  %v1444_v54 = vld [vmem:[#allocation17 + $0x5b0] sm:$0xff]  ;;  %v1741_v23 = vld [vmem:[#allocation17 + $0xef8] sm:$0xff] }
 0x5fb   : > { %4436 = vmatpush3.msra.mxu1 %v1498_v33  ;;  %3669 = vmatpush2.msra.mxu0 %v1790_v34  ;;  %v1456_v52 = vld [vmem:[#allocation17 + $0x610] sm:$0xff]  ;;  %v1693_v56 = vld [vmem:[#allocation17 + $0xd78] sm:$0xff]  ;;  %v1690_v33 = vld [vmem:[#allocation17 + $0xd60] sm:$0xff] }
 0x5fc   : > { %4791 = verf.f32 %v3198_v50  ;;  %4437 = vmatprep.subr.mxu1 %v1543_v1  ;;  %4398 = vmatprep.subr.mxu0 %v1453_v0  ;;  %v1396_v18 = vld [vmem:[#allocation17 + $0x430] sm:$0xff]  ;;  %v1441_v30 = vld [vmem:[#allocation17 + $0x598] sm:$0xff]  ;;  %v1438_v34 = vld [vmem:[#allocation17 + $0x580] sm:$0xff] }
 0x5fd   : > { %4438 = vmatpush3.msra.mxu1 %v1495_v38  ;;  %v1393_v41 = vld [vmem:[#allocation17 + $0x418] sm:$0xff]  ;;  %v1735_v1 = vld [vmem:[#allocation17 + $0xec8] sm:$0xff]  ;;  %v1390_v0 = vld [vmem:[#allocation17 + $0x400] sm:$0xff] }
 0x5fe   : > { %4439 = vmatprep.subr.mxu1 %v1540_v39  ;;  %v1687_v50 = vld [vmem:[#allocation17 + $0xd48] sm:$0xff]  ;;  %v1732_v39 = vld [vmem:[#allocation17 + $0xeb0] sm:$0xff] }
 0x5ff   : > { %4440 = vmatpush3.msra.mxu1 %v1492_v46  ;;  %v1435_v38 = vld [vmem:[#allocation17 + $0x568] sm:$0xff] }
 0x600   : > { %4441 = vmatprep.subr.mxu1 %v1537_v15  ;;  %v1387_v46 = vld [vmem:[#allocation17 + $0x3e8] sm:$0xff]  ;;  %v1432_v15 = vld [vmem:[#allocation17 + $0x550] sm:$0xff] }
 0x601   : > { %4442 = vmatpush3.msra.mxu1 %v1489_v32  ;;  %v1729_v32 = vld [vmem:[#allocation17 + $0xe98] sm:$0xff] }
 0x602   : > { %4443 = vmatprep.subr.mxu1 %v1534_v47  ;;  %v1681_v47 = vld [vmem:[#allocation17 + $0xd18] sm:$0xff] }
 0x603   : > { %4444 = vmatpush3.msra.mxu1 %v1486_v42  ;;  %v1429_v42 = vld [vmem:[#allocation17 + $0x538] sm:$0xff] }
 0x604   : > { %4445 = vmatprep.subr.mxu1 %v1531_v51  ;;  %v1726_v51 = vld [vmem:[#allocation17 + $0xe80] sm:$0xff] }
 0x605   : > { %4446 = vmatpush3.msra.mxu1 %v1483_v43  ;;  %v1381_v43 = vld [vmem:[#allocation17 + $0x3b8] sm:$0xff] }
 0x606   : > { %4447 = vmatprep.subr.mxu1 %v1528_v31  ;;  %v1678_v31 = vld [vmem:[#allocation17 + $0xd00] sm:$0xff] }
 0x607   : > { %v4790_v40 = vpop.eup %4789  ;;  %4448 = vmatpush3.msra.mxu1 %v1480_v44  ;;  %v1426_v44 = vld [vmem:[#allocation17 + $0x520] sm:$0xff] }
 0x608   : > { %4449 = vmatprep.subr.mxu1 %v1525_v48  ;;  %v3221_v3 = vadd.f32 1.0, %v4790_v40  ;;  %v1723_v48 = vld [vmem:[#allocation17 + $0xe68] sm:$0xff] }
 0x609   : > { %v4792_v58 = vpop.eup %4791  ;;  %4450 = vmatpush3.msra.mxu1 %v1477_v28  ;;  %v1378_v28 = vld [vmem:[#allocation17 + $0x3a0] sm:$0xff]  ;;  %v1675_v40 = vld [vmem:[#allocation17 + $0xce8] sm:$0xff] }
 0x60a   : > { %4451 = vmatprep.subr.mxu1 %v1522_v24  ;;  %v3222_v7 = vadd.f32 1.0, %v4792_v58  ;;  %v5734_v10 = vmul.f32 %v3221_v3, %v3185_v37  ;;  %v1423_v24 = vld [vmem:[#allocation17 + $0x508] sm:$0xff]  ;;  %v1672_v3 = vld [vmem:[#allocation17 + $0xcd0] sm:$0xff]  ;;  %v1417_v37 = vld [vmem:[#allocation17 + $0x4d8] sm:$0xff] }
 0x60b   : > { %4452 = vmatpush3.msra.mxu1 %v1474_v53  ;;  %v1720_v53 = vld [vmem:[#allocation17 + $0xe50] sm:$0xff]  ;;  %v1375_v58 = vld [vmem:[#allocation17 + $0x388] sm:$0xff] }
 0x60c   : > { %4453 = vmatprep.subr.mxu1 %v1519_v4  ;;  %v5732_v49 = vmul.f32 %v3222_v7, %v3186_v9  ;;  %v1420_v4 = vld [vmem:[#allocation17 + $0x4f0] sm:$0xff]  ;;  %v1717_v9 = vld [vmem:[#allocation17 + $0xe38] sm:$0xff] }
 0x60d   : > { %4454 = vmatpush3.msra.mxu1 %v1471_v5  ;;  %v1372_v5 = vld [vmem:[#allocation17 + $0x370] sm:$0xff]  ;;  %v1669_v7 = vld [vmem:[#allocation17 + $0xcb8] sm:$0xff] }
 0x60e   : > { %4455 = vmatprep.subr.mxu1 %v1516_v8  ;;  %3670 = vmatprep.mubr.f32.mxu0 %v5732_v49  ;;  %v1714_v8 = vld [vmem:[#allocation17 + $0xe20] sm:$0xff] }
 0x60f   : > { %4456 = vmatpush3.msra.mxu1 %v1468_v26  ;;  %3671 = vmatmul.mubr.f32.vlgmr.msra.gmra.mxu0 %v5734_v10  ;;  %v1369_v26 = vld [vmem:[#allocation17 + $0x358] sm:$0xff] }
 0x610   : > { %4457 = vmatprep.subr.mxu1 %v1513_v13  ;;  %4399 = vmatpush3.msra.mxu0 %v1405_v14  ;;  %v1666_v13 = vld [vmem:[#allocation17 + $0xca0] sm:$0xff] }
 0x611   : > { %4458 = vmatpush3.msra.mxu1 %v1465_v16  ;;  %4400 = vmatprep.subr.mxu0 %v1450_v17  ;;  %v1414_v14 = vld [vmem:[#allocation17 + $0x4c0] sm:$0xff]  ;;  %v1711_v16 = vld [vmem:[#allocation17 + $0xe08] sm:$0xff] }
 0x612   : > { %4459 = vmatprep.subr.mxu1 %v1510_v2  ;;  %3811 = vmatprep.mubr.f32.mxu0 %v5639_v6  ;;  %v1738_v6 = vld [vmem:[#allocation17 + $0xee0] sm:$0xff]  ;;  %v1663_v2 = vld [vmem:[#allocation17 + $0xc88] sm:$0xff] }
 0x613   : > { %4460 = vmatpush3.msra.mxu1 %v1462_v19  ;;  %4401 = vmatpush3.msra.mxu0 %v1402_v45  ;;  %v1366_v17 = vld [vmem:[#allocation17 + $0x340] sm:$0xff]  ;;  %v1411_v19 = vld [vmem:[#allocation17 + $0x4a8] sm:$0xff]  ;;  %v1708_v45 = vld [vmem:[#allocation17 + $0xdf0] sm:$0xff] }
 0x614   : > { %4461 = vmatprep.subr.mxu1 %v1507_v21  ;;  %4402 = vmatprep.subr.mxu0 %v1447_v20  ;;  %v1363_v21 = vld [vmem:[#allocation17 + $0x328] sm:$0xff]  ;;  %v1660_v20 = vld [vmem:[#allocation17 + $0xc70] sm:$0xff] }
 0x615   : > { %4462 = vmatpush3.msra.mxu1 %v1459_v55  ;;  %4403 = vmatpush3.msra.mxu0 %v1399_v11  ;;  %v1408_v55 = vld [vmem:[#allocation17 + $0x490] sm:$0xff]  ;;  %v1705_v11 = vld [vmem:[#allocation17 + $0xdd8] sm:$0xff] }
 0x616   : > { %4463 = vmatprep.subr.mxu1 %v1504_v59  ;;  %4404 = vmatprep.subr.mxu0 %v1444_v54  ;;  %v1360_v59 = vld [vmem:[#allocation17 + $0x310] sm:$0xff]  ;;  %v1657_v54 = vld [vmem:[#allocation17 + $0xc58] sm:$0xff] }
 0x617   : > { %4464 = vmatpush3.msra.mxu1 %v1456_v52  ;;  %4405 = vmatpush3.msra.mxu0 %v1396_v18  ;;  %v1645_v52 = vld [vmem:[#allocation17 + $0xbf8] sm:$0xff]  ;;  %v1702_v18 = vld [vmem:[#allocation17 + $0xdc0] sm:$0xff] }
 0x618   : > { %3882 = vmatmul.mubr.f32.vlgmr.msra.gmra.mxu1 %v5683_v36  ;;  %4503 = vmatprep.subr.mxu1 %v1741_v23  ;;  %v1684_v36 = vld [vmem:[#allocation17 + $0xd30] sm:$0xff]  ;;  %v1597_v23 = vld [vmem:[#allocation17 + $0xa78] sm:$0xff] }
 0x619   : > { %4504 = vmatpush3.msra.mxu1 %v1693_v56  ;;  %4021 = vmatprep.mubr.f32.mxu1 %v5713_v22  ;;  %v1384_v22 = vld [vmem:[#allocation17 + $0x3d0] sm:$0xff]  ;;  %v1654_v56 = vld [vmem:[#allocation17 + $0xc40] sm:$0xff] }
 0x61a   : > { %4406 = vmatprep.subr.mxu0 %v1441_v30  ;;  %4505 = vmatprep.subr.mxu1 %v1738_v6  ;;  %v1642_v30 = vld [vmem:[#allocation17 + $0xbe0] sm:$0xff]  ;;  %v1699_v6 = vld [vmem:[#allocation17 + $0xda8] sm:$0xff] }
 0x61b   : > { %4407 = vmatpush3.msra.mxu0 %v1393_v41  ;;  %4506 = vmatpush3.msra.mxu1 %v1690_v33  ;;  %v1594_v41 = vld [vmem:[#allocation17 + $0xa60] sm:$0xff]  ;;  %v1651_v33 = vld [vmem:[#allocation17 + $0xc28] sm:$0xff] }
 0x61c   : > { %4408 = vmatprep.subr.mxu0 %v1438_v34  ;;  %4507 = vmatprep.subr.mxu1 %v1735_v1  ;;  %v1639_v34 = vld [vmem:[#allocation17 + $0xbc8] sm:$0xff]  ;;  %v1696_v1 = vld [vmem:[#allocation17 + $0xd90] sm:$0xff] }
 0x61d   : > { %4409 = vmatpush3.msra.mxu0 %v1390_v0  ;;  %4508 = vmatpush3.msra.mxu1 %v1687_v50  ;;  %v1591_v0 = vld [vmem:[#allocation17 + $0xa48] sm:$0xff]  ;;  %v1648_v50 = vld [vmem:[#allocation17 + $0xc10] sm:$0xff] }
 0x61e   : > { %4410 = vmatprep.subr.mxu0 %v1435_v38  ;;  %4509 = vmatprep.subr.mxu1 %v1732_v39  ;;  %v1636_v38 = vld [vmem:[#allocation17 + $0xbb0] sm:$0xff]  ;;  %v1633_v39 = vld [vmem:[#allocation17 + $0xb98] sm:$0xff] }
 0x61f   : > { %4411 = vmatpush3.msra.mxu0 %v1387_v46  ;;  %4510 = vmatpush3.msra.mxu1 %v1684_v36  ;;  %v1630_v46 = vld [vmem:[#allocation17 + $0xb80] sm:$0xff] }
 0x620   : > { %4412 = vmatprep.subr.mxu0 %v1432_v15  ;;  %4511 = vmatprep.subr.mxu1 %v1729_v32  ;;  %v1582_v36 = vld [vmem:[#allocation17 + $0xa00] sm:$0xff]  ;;  %v1627_v15 = vld [vmem:[#allocation17 + $0xb68] sm:$0xff] }
 0x621   : > { %4413 = vmatpush3.msra.mxu0 %v1384_v22  ;;  %4512 = vmatpush3.msra.mxu1 %v1681_v47  ;;  %v1579_v32 = vld [vmem:[#allocation17 + $0x9e8] sm:$0xff]  ;;  %v1624_v22 = vld [vmem:[#allocation17 + $0xb50] sm:$0xff] }
 0x622   : > { %4414 = vmatprep.subr.mxu0 %v1429_v42  ;;  %4513 = vmatprep.subr.mxu1 %v1726_v51  ;;  %v1576_v47 = vld [vmem:[#allocation17 + $0x9d0] sm:$0xff]  ;;  %v1621_v42 = vld [vmem:[#allocation17 + $0xb38] sm:$0xff] }
 0x623   : > { %4415 = vmatpush3.msra.mxu0 %v1381_v43  ;;  %4514 = vmatpush3.msra.mxu1 %v1678_v31  ;;  %v1573_v51 = vld [vmem:[#allocation17 + $0x9b8] sm:$0xff]  ;;  %v1618_v43 = vld [vmem:[#allocation17 + $0xb20] sm:$0xff]  ;;  %v1615_v31 = vld [vmem:[#allocation17 + $0xb08] sm:$0xff] }
 0x624   : > { %4416 = vmatprep.subr.mxu0 %v1426_v44  ;;  %4515 = vmatprep.subr.mxu1 %v1723_v48  ;;  %v1567_v44 = vld [vmem:[#allocation17 + $0x988] sm:$0xff]  ;;  %v1612_v48 = vld [vmem:[#allocation17 + $0xaf0] sm:$0xff] }
 0x625   : > { %4417 = vmatpush3.msra.mxu0 %v1378_v28  ;;  %4516 = vmatpush3.msra.mxu1 %v1675_v40  ;;  %v1564_v28 = vld [vmem:[#allocation17 + $0x970] sm:$0xff]  ;;  %v1609_v40 = vld [vmem:[#allocation17 + $0xad8] sm:$0xff] }
 0x626   : > { %4418 = vmatprep.subr.mxu0 %v1423_v24  ;;  %4517 = vmatprep.subr.mxu1 %v1720_v53  ;;  %v1561_v24 = vld [vmem:[#allocation17 + $0x958] sm:$0xff]  ;;  %v1606_v53 = vld [vmem:[#allocation17 + $0xac0] sm:$0xff] }
 0x627   : > { %4419 = vmatpush3.msra.mxu0 %v1375_v58  ;;  %4518 = vmatpush3.msra.mxu1 %v1672_v3  ;;  %v1558_v58 = vld [vmem:[#allocation17 + $0x940] sm:$0xff]  ;;  %v1603_v3 = vld [vmem:[#allocation17 + $0xaa8] sm:$0xff] }
 0x628   : > { %4420 = vmatprep.subr.mxu0 %v1420_v4  ;;  %4519 = vmatprep.subr.mxu1 %v1717_v9  ;;  %v1555_v4 = vld [vmem:[#allocation17 + $0x928] sm:$0xff]  ;;  %v1600_v9 = vld [vmem:[#allocation17 + $0xa90] sm:$0xff] }
 0x629   : > { %4421 = vmatpush3.msra.mxu0 %v1372_v5  ;;  %4520 = vmatpush3.msra.mxu1 %v1669_v7  ;;  %v1552_v5 = vld [vmem:[#allocation17 + $0x910] sm:$0xff]  ;;  %v1837_v7 = vld [vmem:[#allocation17 + $0x11f8] sm:$0xff] }
 0x62a   : > { %4422 = vmatprep.subr.mxu0 %v1417_v37  ;;  %4521 = vmatprep.subr.mxu1 %v1714_v8  ;;  %v1789_v37 = vld [vmem:[#allocation17 + $0x1078] sm:$0xff]  ;;  %v1834_v8 = vld [vmem:[#allocation17 + $0x11e0] sm:$0xff] }
 0x62b   : > { %4423 = vmatpush3.msra.mxu0 %v1369_v26  ;;  %4522 = vmatpush3.msra.mxu1 %v1666_v13  ;;  %v1786_v26 = vld [vmem:[#allocation17 + $0x1060] sm:$0xff]  ;;  %v1831_v13 = vld [vmem:[#allocation17 + $0x11c8] sm:$0xff] }
 0x62c   : > { %4424 = vmatprep.subr.mxu0 %v1414_v14  ;;  %4523 = vmatprep.subr.mxu1 %v1711_v16  ;;  %v1783_v14 = vld [vmem:[#allocation17 + $0x1048] sm:$0xff]  ;;  %v1828_v16 = vld [vmem:[#allocation17 + $0x11b0] sm:$0xff] }
 0x62d   : > { %4425 = vmatpush3.msra.mxu0 %v1366_v17  ;;  %4524 = vmatpush3.msra.mxu1 %v1663_v2  ;;  %v1780_v17 = vld [vmem:[#allocation17 + $0x1030] sm:$0xff]  ;;  %v1825_v2 = vld [vmem:[#allocation17 + $0x1198] sm:$0xff] }
 0x62e   : > { %4426 = vmatprep.subr.mxu0 %v1411_v19  ;;  %4525 = vmatprep.subr.mxu1 %v1708_v45  ;;  %v1777_v19 = vld [vmem:[#allocation17 + $0x1018] sm:$0xff]  ;;  %v1822_v45 = vld [vmem:[#allocation17 + $0x1180] sm:$0xff] }
 0x62f   : > { %4427 = vmatpush3.msra.mxu0 %v1363_v21  ;;  %4526 = vmatpush3.msra.mxu1 %v1660_v20  ;;  %v1819_v21 = vld [vmem:[#allocation17 + $0x1168] sm:$0xff] }
 0x630   : > { %4428 = vmatprep.subr.mxu0 %v1408_v55  ;;  %4527 = vmatprep.subr.mxu1 %v1705_v11  ;;  %v1771_v20 = vld [vmem:[#allocation17 + $0xfe8] sm:$0xff]  ;;  %v1768_v55 = vld [vmem:[#allocation17 + $0xfd0] sm:$0xff]  ;;  %v1813_v11 = vld [vmem:[#allocation17 + $0x1138] sm:$0xff] }
 0x631   : > { %4429 = vmatpush3.msra.mxu0 %v1360_v59  ;;  %4528 = vmatpush3.msra.mxu1 %v1657_v54  ;;  %v1765_v59 = vld [vmem:[#allocation17 + $0xfb8] sm:$0xff]  ;;  %v1810_v54 = vld [vmem:[#allocation17 + $0x1120] sm:$0xff] }
 0x632   : > { %3812 = vmatmul.mubr.f32.vlgmr.msra.gmra.mxu0 %v5670_v63  ;;  %4468 = vmatprep.subr.mxu0 %v1645_v52  ;;  %v1588_v63 = vld [vmem:[#allocation17 + $0xa30] sm:$0xff]  ;;  %v1762_v52 = vld [vmem:[#allocation17 + $0xfa0] sm:$0xff] }
 0x633   : > { %4529 = vmatprep.subr.mxu1 %v1702_v18  ;;  %4469 = vmatpush3.msra.mxu0 %v1597_v23  ;;  %v1807_v18 = vld [vmem:[#allocation17 + $0x1108] sm:$0xff] }
 0x634   : > { %3951 = vmatprep.mubr.f32.mxu0 %v5693_v35  ;;  %4530 = vmatpush3.msra.mxu1 %v1654_v56  ;;  %v1585_v35 = vld [vmem:[#allocation17 + $0xa18] sm:$0xff]  ;;  %v1759_v23 = vld [vmem:[#allocation17 + $0xf88] sm:$0xff]  ;;  %v1804_v56 = vld [vmem:[#allocation17 + $0x10f0] sm:$0xff] }
 0x635   : > { %4470 = vmatprep.subr.mxu0 %v1642_v30  ;;  %4531 = vmatprep.subr.mxu1 %v1699_v6  ;;  %v1756_v30 = vld [vmem:[#allocation17 + $0xf70] sm:$0xff]  ;;  %v1801_v6 = vld [vmem:[#allocation17 + $0x10d8] sm:$0xff] }
 0x636   : > { %4471 = vmatpush3.msra.mxu0 %v1594_v41  ;;  %4532 = vmatpush3.msra.mxu1 %v1651_v33  ;;  %v1753_v41 = vld [vmem:[#allocation17 + $0xf58] sm:$0xff]  ;;  %v1798_v33 = vld [vmem:[#allocation17 + $0x10c0] sm:$0xff] }
 0x637   : > { %4472 = vmatprep.subr.mxu0 %v1639_v34  ;;  %4533 = vmatprep.subr.mxu1 %v1696_v1  ;;  %v1750_v34 = vld [vmem:[#allocation17 + $0xf40] sm:$0xff]  ;;  %v1795_v1 = vld [vmem:[#allocation17 + $0x10a8] sm:$0xff] }
 0x638   : > { %4473 = vmatpush3.msra.mxu0 %v1591_v0  ;;  %4534 = vmatpush3.msra.mxu1 %v1648_v50  ;;  %v1747_v0 = vld [vmem:[#allocation17 + $0xf28] sm:$0xff]  ;;  %v1792_v50 = vld [vmem:[#allocation17 + $0x1090] sm:$0xff] }
 0x639   : > { %4474 = vmatprep.subr.mxu0 %v1636_v38  ;;  %4022 = vmatmul.mubr.f32.vlgmr.msra.gmra.mxu1 %v5717_v57  ;;  %v1570_v57 = vld [vmem:[#allocation17 + $0x9a0] sm:$0xff]  ;;  %v1744_v38 = vld [vmem:[#allocation17 + $0xf10] sm:$0xff] }
 0x63a   : > { %4475 = vmatpush3.msra.mxu0 %v1588_v63  ;;  %v3317_v63 = vpop.f32.mrf.mxu1 }
 0x63b   : > { %4476 = vmatprep.subr.mxu0 %v1633_v39  ;;  %v541_v39 = vld [vmem:[#allocation19] sm:$0x7] }
 0x63c   : > { %4477 = vmatpush3.msra.mxu0 %v1585_v35  ;;  %v3319_v35 = vpop.f32.mrf.mxu1 }
 0x63d   : > { %4478 = vmatprep.subr.mxu0 %v1630_v46  ;;  %v3388_v46 = vpop.f32.mrf.mxu0 }
 0x63e   : > { %4479 = vmatpush3.msra.mxu0 %v1582_v36  ;;  %v3239_v36 = vrot.slane %v541_v39, %v5506_v62 }
 0x63f   : > { %4480 = vmatprep.subr.mxu0 %v1627_v15 }
 0x640   : > { %4481 = vmatpush3.msra.mxu0 %v1579_v32  ;;  %v3243_v32 = vrot.slane %v541_v39, %v5500_v60 }
 0x641   : > { %4482 = vmatprep.subr.mxu0 %v1624_v22  ;;  %v3390_v22 = vpop.f32.mrf.mxu0 }
 0x642   : > { %4483 = vmatpush3.msra.mxu0 %v1576_v47  ;;  %v3318_v47 = vadd.f32 %v3317_v63, %v3239_v36 }
 0x643   : > { %4484 = vmatprep.subr.mxu0 %v1621_v42 }
 0x644   : > { %4485 = vmatpush3.msra.mxu0 %v1573_v51 }
 0x645   : > { %4486 = vmatprep.subr.mxu0 %v1618_v43  ;;  %v3320_v43 = vadd.f32 %v3319_v35, %v3243_v32 }
 0x646   : > { %4487 = vmatpush3.msra.mxu0 %v1570_v57  ;;  %v3389_v57 = vadd.f32 %v3388_v46, %v3318_v47 }
 0x647   : > { %4488 = vmatprep.subr.mxu0 %v1615_v31 }
 0x648   : > { %4489 = vmatpush3.msra.mxu0 %v1567_v44  ;;  %v3391_v44 = vadd.f32 %v3390_v22, %v3320_v43 }
 0x649   : > { %4490 = vmatprep.subr.mxu0 %v1612_v48 }
 0x64a   : > { %4491 = vmatpush3.msra.mxu0 %v1564_v28 }
 0x64b   : > { %4492 = vmatprep.subr.mxu0 %v1609_v40 }
 0x64c   : > { %4493 = vmatpush3.msra.mxu0 %v1561_v24 }
 0x64d   : > { %4494 = vmatprep.subr.mxu0 %v1606_v53 }
 0x64e   : > { %4495 = vmatpush3.msra.mxu0 %v1558_v58 }
 0x64f   : > { %4496 = vmatprep.subr.mxu0 %v1603_v3 }
 0x650   : > { %4497 = vmatpush3.msra.mxu0 %v1555_v4 }
 0x651   : > { %4498 = vmatprep.subr.mxu0 %v1600_v9 }
 0x652   : > { %4499 = vmatpush3.msra.mxu0 %v1552_v5 }
 0x653   : > { %3952 = vmatmul.mubr.f32.vlgmr.msra.gmra.mxu0 %v5703_v12  ;;  %4538 = vmatprep.subr.mxu0 %v1837_v7  ;;  %v1774_v12 = vld [vmem:[#allocation17 + $0x1000] sm:$0xff] }
 0x654   : > { %4539 = vmatpush3.msra.mxu0 %v1789_v37  ;;  %4091 = vmatprep.mubr.f32.mxu0 %v5732_v49  ;;  %v1816_v49 = vld [vmem:[#allocation17 + $0x1150] sm:$0xff] }
 0x655   : > { %4540 = vmatprep.subr.mxu0 %v1834_v8 }
 0x656   : > { %4541 = vmatpush3.msra.mxu0 %v1786_v26  ;;  %v3459_v15 = vpop.f32.mrf.mxu1 }
 0x657   : > { %4542 = vmatprep.subr.mxu0 %v1831_v13  ;;  %v3460_v48 = vadd.f32 %v3459_v15, %v3389_v57 }
 0x658   : > { %4543 = vmatpush3.msra.mxu0 %v1783_v14  ;;  %v3461_v42 = vpop.f32.mrf.mxu1  ;;  %v3247_v14 = vrot.slane %v541_v39, %v5503_v61 }
 0x659   : > { %4544 = vmatprep.subr.mxu0 %v1828_v16  ;;  %v3462_v28 = vadd.f32 %v3461_v42, %v3391_v44 }
 0x65a   : > { %4545 = vmatpush3.msra.mxu0 %v1780_v17 }
 0x65b   : > { %4546 = vmatprep.subr.mxu0 %v1825_v2 }
 0x65c   : > { %4547 = vmatpush3.msra.mxu0 %v1777_v19 }
 0x65d   : > { %4548 = vmatprep.subr.mxu0 %v1822_v45 }
 0x65e   : > { %4549 = vmatpush3.msra.mxu0 %v1774_v12 }
 0x65f   : > { %4550 = vmatprep.subr.mxu0 %v1819_v21 }
 0x660   : > { %4551 = vmatpush3.msra.mxu0 %v1771_v20 }
 0x661   : > { %4552 = vmatprep.subr.mxu0 %v1816_v49 }
 0x662   : > { %4553 = vmatpush3.msra.mxu0 %v1768_v55 }
 0x663   : > { %4554 = vmatprep.subr.mxu0 %v1813_v11 }
 0x664   : > { %4555 = vmatpush3.msra.mxu0 %v1765_v59 }
 0x665   : > { %4556 = vmatprep.subr.mxu0 %v1810_v54 }
 0x666   : > { %4557 = vmatpush3.msra.mxu0 %v1762_v52 }
 0x667   : > { %4558 = vmatprep.subr.mxu0 %v1807_v18 }
 0x668   : > { %4559 = vmatpush3.msra.mxu0 %v1759_v23 }
 0x669   : > { %4560 = vmatprep.subr.mxu0 %v1804_v56 }
 0x66a   : > { %4561 = vmatpush3.msra.mxu0 %v1756_v30 }
 0x66b   : > { %4562 = vmatprep.subr.mxu0 %v1801_v6 }
 0x66c   : > { %4563 = vmatpush3.msra.mxu0 %v1753_v41 }
 0x66d   : > { %4564 = vmatprep.subr.mxu0 %v1798_v33 }
 0x66e   : > { %4565 = vmatpush3.msra.mxu0 %v1750_v34 }
 0x66f   : > { %4566 = vmatprep.subr.mxu0 %v1795_v1 }
 0x670   : > { %4567 = vmatpush3.msra.mxu0 %v1747_v0 }
 0x671   : > { %4568 = vmatprep.subr.mxu0 %v1792_v50 }
 0x672   : > { %4569 = vmatpush3.msra.mxu0 %v1744_v38 }
 0x673   : > { %4092 = vmatmul.mubr.f32.vlgmr.msra.gmra.mxu0 %v5734_v10 }
 0x676   : > { %v3530_v51 = vpop.f32.mrf.mxu0 }
 0x677   : > { %v3531_v40 = vadd.f32 %v3530_v51, %v3460_v48 }
 0x678   : > { %v3532_v10 = vpop.f32.mrf.mxu0 }
 0x679   : > { %v3533_v53 = vadd.f32 %v3532_v10, %v3462_v28 }
 0x698   : > { %v3601_v31 = vpop.f32.mrf.mxu1 }
 0x699   : > { %v3602_v58 = vadd.f32 %v3601_v31, %v3531_v40 }
 0x69a   : > { %v3603_v24 = vpop.f32.mrf.mxu1 }
 0x69b   : > { %v3604_v3 = vadd.f32 %v3603_v24, %v3533_v53 }
 0x6b8   : > { %v4395_v37 = vpop.f32.mrf.mxu1 }
 0x6ba   : > { %v4396_v26 = vpop.f32.mrf.mxu1 }
 0x6bb   : > { %v4397_v16 = vadd.f32 %v4396_v26, %v4395_v37 }
 0x6bd   : > { %v3744_v19 = vadd.f32 %v4397_v16, %v3247_v14 }
 0x6cf   : > { %v3672_v62 = vpop.f32.mrf.mxu0 }
 0x6d0   : > { %v3673_v4 = vadd.f32 %v3672_v62, %v3602_v58 }
 0x6d1   : > { %v3674_v60 = vpop.f32.mrf.mxu0 }
 0x6d2   : > { %v4097_v9 = vadd.f32 %v3673_v4, %v5549_v27  ;;  %v3675_v5 = vadd.f32 %v3674_v60, %v3604_v3 }
 0x6d4   : > { %4100 = vst [vmem:[%s5752_s1] sm:$0xff] %v4097_v9  ;;  %v4098_v7 = vadd.f32 %v3675_v5, %v5546_v25 }
 0x6d6   : > { %4101 = vst [vmem:[%s5752_s1 + $0x8] sm:$0xff] %v4098_v7 }
 0x6d8   : > { %v4465_v17 = vpop.f32.mrf.mxu1 }
 0x6da   : > { %v4466_v45 = vpop.f32.mrf.mxu1 }
 0x6db   : > { %v4467_v49 = vadd.f32 %v4466_v45, %v4465_v17 }
 0x6f2   : > { %v4430_v8 = vpop.f32.mrf.mxu0 }
 0x6f4   : > { %v4431_v13 = vpop.f32.mrf.mxu0 }
 0x6f5   : > { %v4432_v27 = vadd.f32 %v4431_v13, %v4430_v8 }
 0x6f7   : > { %v3814_v21 = vadd.f32 %v4432_v27, %v3744_v19 }
 0x6f9   : > { %v4535_v20 = vpop.f32.mrf.mxu1  ;;  %v3884_v55 = vadd.f32 %v4467_v49, %v3814_v21 }
 0x6fb   : > { %v4536_v11 = vpop.f32.mrf.mxu1 }
 0x6fc   : > { %v4537_v54 = vadd.f32 %v4536_v11, %v4535_v20 }
 0x713   : > { %v4500_v2 = vpop.f32.mrf.mxu0 }
 0x715   : > { %v4501_v12 = vpop.f32.mrf.mxu0 }
 0x716   : > { %v4502_v25 = vadd.f32 %v4501_v12, %v4500_v2 }
 0x718   : > { %v3954_v59 = vadd.f32 %v4502_v25, %v3884_v55 }
 0x71a   : > { %v4024_v18 = vadd.f32 %v4537_v54, %v3954_v59 }
 0x733   : > { %v4570_v61 = vpop.f32.mrf.mxu0 }
 0x735   : > { %v4571_v52 = vpop.f32.mrf.mxu0 }
 0x736   : > { %v4572_v23 = vadd.f32 %v4571_v52, %v4570_v61 }
 0x738   : > { %v4094_v56 = vadd.f32 %v4572_v23, %v4024_v18 }
 0x73a   : > { %v4099_v30 = vadd.f32 %v4094_v56, %v5552_v29 }
 0x73c   : > { %4102 = vst [vmem:[%s5752_s1 + $0x10] sm:$0xff] %v4099_v30 }
 0x73d   : > { %5095 = shalt.err (!%p5092_p7)
}
 0x73e   : > { %s5096_s12 = scalar_lea.hbm %s4116_s30, 384  ;;  %s5100_s4 = scalar_lea.hbm %s5807_s11, 768 }
 0x73f   : > { %p5097_p3 = scmp.ne.s32.totalorder %s4116_s30, %s5096_s12  ;;  %p5101_p6 = scmp.lt.s32.totalorder %s4116_s30, %s5807_s11 }
 0x740   : > { %p5102_p10 = scmp.lt.s32.totalorder %s5100_s4, %s5096_s12 }
 0x741   : > { %p5098_p4 = pnand %p5097_p3, %p5848_p9 }
 0x742   : > { %p5103_p13 = por %p5102_p10, %p5101_p6 }
 0x743   : > { %p5099_p11 = pneg %p5098_p4 }
 0x745   : > { %p5104_p8 = pnand %p5103_p13, %p5099_p11 }
 0x747   : > { %5107 = shalt.err (!%p5104_p8)
}
 0x748   : > { %4654 = dma.vmem_to_hbm [thread:$0]  (%p5848_p9), %s4119_s24, 384, %s4116_s30, %s4104_s26  }
 0x749 PF: > { %s4130_s1 = sand.u32 1, %s5154_s17   ;;  %p5849_p1 = scmp.ne.s32.totalorder %s5834_s16, 0 }
 0x74a   : > { %p5850_p0 = scmp.ge.s32.totalorder %s5166_s20, 2  ;;  %s4131_s2 = scalar_lea.sflag [#allocation4], %s4130_s1 }
 0x74c   : > { %p4692_p12 = pnand %p5850_p0, %p5849_p1 }
 0x74e   : > { %p4693_p5 = pneg %p4692_p12 }
 0x750   : > { %5149 = dma.done.wait (%p4693_p5), %s4131_s2, 384  }
 0x751   : > { %5151 = vsyncadd (%p4693_p5), %s4131_s2, 4294966912  ;;  %p29_p2 = scmp.ge.s32.totalorder %s5384_s27, 4   ;;  %s5851_s17 = smov %s5158_s18 }
 0x752   : > { %s5852_s18 = smov %s5162_s19  ;;  %s5853_s19 = smov %s5395_s28 }
 0x753   : > { %s5854_s20 = smov %s5384_s27  ;;  %31 = sbr.rel (!%p29_p2) target bundleno = 17 (0x11), region = 149 }
 0x758   :  { %4136 = vsyncpa [#allocation3], 1 }
 0x759   :  { %4138 = vsyncpa [#allocation3 + $0x1], 1 }
 0x75a   :  { %4139 = vsyncpa [#allocation6], 1 }
 0x75b   :  { %4140 = vsyncpa [#allocation9], 1 }
 0x75c   :  { %4141 = vsyncpa [#allocation12], 1 }
 0x75d   :  { %4142 = vsyncpa [#allocation15], 1 }
 0x75e   :  { %4143 = vsyncpa [#allocation18], 1 }
 0x75f   :  { %4144 = vsyncpa [#allocation4], 1 }
 0x760   :  { %4146 = vsyncpa [#allocation4 + $0x1], 1 }

</bundles_post_ra>
